<compile_context>
chip_gen: v6e
topology: v6e:2x2x1
jax: 0.10.0
libtpu: 0.0.40
codegen_flags: <defaults>
</compile_context>

<pallas_src>
from functools import partial

import jax
import jax.numpy as jnp
from jax.experimental import pallas as pl
from jax.experimental.pallas import tpu as pltpu


# ----------------------------------------------------------------------------
# VMEM policy (generation aware)
# ----------------------------------------------------------------------------
def _vmem_capacity_bytes():
    """Per-core VMEM capacity; conservative 64 MiB fallback (v7x per-TC size)."""
    try:
        info = pltpu.get_tpu_info()
        cap = int(getattr(info, "vmem_capacity_bytes", 0) or 0)
        if cap > 0:
            return min(max(cap, 32 * 1024 * 1024), 256 * 1024 * 1024)
    except Exception:
        pass
    return 64 * 1024 * 1024


_VMEM_CAP = _vmem_capacity_bytes()
_VMEM_BUDGET = int(0.68 * _VMEM_CAP)      # tile-selection working-set budget
_VMEM_LIMIT = int(0.84 * _VMEM_CAP)       # mosaic scoped-vmem limit
# Single-buffer the resident image on 64 MiB-class parts (v7x); keep 2 buffers
# on 128 MiB parts so the next batch element's image DMA overlaps compute.
_IMG_BUFS = 1 if _VMEM_CAP <= 96 * 1024 * 1024 else 2

_SUB = 16          # bf16 sublane granule used for VMEM size estimates
_COL0 = 16         # sublane-aligned band column where the image interior starts


def _rup(x, m):
    return ((x + m - 1) // m) * m


# ----------------------------------------------------------------------------
# Pallas kernel: fused 3x3 conv (in-VMEM halo + im2col) + BN shift + act
#                (+ optional fused 2x2 max-pool)
# ----------------------------------------------------------------------------
def _conv3x3_kernel(x_ref, w_ref, shift_ref, o_ref, band_ref, *rest,
                    tile_h, width, cin, cout, act, pool, use_concat):
    """One H-tile of a 3x3 / stride-1 / pad-1 convolution.

    x_ref:     (1, H, W, cin)   whole UNPADDED image; its block index is
                                constant over the H-tile grid axis, so it is
                                DMA'd once per batch element and stays VMEM
                                resident across tiles.
    w_ref:     (9*cin, cout)    bf16 weights, BN scale pre-folded.
    shift_ref: (1, cout)        f32 folded BN shift / conv bias.
    o_ref:     (1, tile_h*W, cout)          if pool is False
               (1, tile_h//2, W//2, cout)   if pool is True
    band_ref:  (tile_h+2, W+_COL0+1, cin)   zero-padded halo band built here.
    rest:      [tap_ref (tile_h, W, 9*cin)]  when use_concat is False, then
               [pool scratch (tile_h, W, cout) f32] when pool is True.
    """
    k = 0
    tap_ref = None
    if not use_concat:
        tap_ref = rest[k]
        k += 1
    pool_ref = rest[k] if pool else None

    i = pl.program_id(1)
    n_h = pl.num_programs(1)
    row0 = i * tile_h
    if tile_h % 8 == 0:
        row0 = pl.multiple_of(row0, 8)
    dt = band_ref.dtype
    c0 = _COL0

    # ---- build the zero-padded halo band in VMEM (padding fused, no HBM pad)
    # Interior rows (always valid); stored at a sublane-aligned column offset.
    band_ref[pl.ds(1, tile_h), pl.ds(c0, width), :] = (
        x_ref[0, pl.ds(row0, tile_h), :, :])

    # Top halo row: previous image row, or zeros on the first tile.
    @pl.when(i > 0)
    def _():
        band_ref[pl.ds(0, 1), pl.ds(c0, width), :] = (
            x_ref[0, pl.ds(row0 - 1, 1), :, :])

    @pl.when(i == 0)
    def _():
        band_ref[pl.ds(0, 1), pl.ds(c0 - 1, width + 2), :] = (
            jnp.zeros((1, width + 2, cin), dt))

    # Bottom halo row: next image row, or zeros on the last tile.
    @pl.when(i < n_h - 1)
    def _():
        band_ref[pl.ds(tile_h + 1, 1), pl.ds(c0, width), :] = (
            x_ref[0, pl.ds(row0 + tile_h, 1), :, :])

    @pl.when(i == n_h - 1)
    def _():
        band_ref[pl.ds(tile_h + 1, 1), pl.ds(c0 - 1, width + 2), :] = (
            jnp.zeros((1, width + 2, cin), dt))

    # Left / right halo columns (always zero).
    zcol = jnp.zeros((tile_h + 2, 1, cin), dt)
    band_ref[:, pl.ds(c0 - 1, 1), :] = zcol
    band_ref[:, pl.ds(c0 + width, 1), :] = zcol

    # ---- im2col taps -> single wide-K MXU matmul (K = 9*cin), f32 acc ----
    rows = tile_h * width
    if use_concat:
        # cin % 128 == 0: lane-aligned concatenation in registers, no tap
        # scratch store/load round trip.
        taps = [band_ref[pl.ds(dy, tile_h), pl.ds(c0 - 1 + dx, width), :]
                for dy in range(3) for dx in range(3)]
        tap = jnp.concatenate(taps, axis=-1)
    else:
        for t in range(9):
            dy, dx = divmod(t, 3)
            tap_ref[:, :, t * cin:(t + 1) * cin] = (
                band_ref[pl.ds(dy, tile_h), pl.ds(c0 - 1 + dx, width), :])
        tap = tap_ref[...]

    acc = jnp.dot(tap.reshape(rows, 9 * cin), w_ref[...],
                  preferred_element_type=jnp.float32)

    y = acc + shift_ref[...]
    if act == "leaky":
        y = jnp.where(y >= 0.0, y, 0.01 * y)
    elif act == "sigmoid":
        y = 1.0 / (1.0 + jnp.exp(-y))
    # act == "none": identity

    if pool:
        # Fused 2x2 max-pool: pair along W with stride-2 reads, then along H.
        # TODO(synk): run the pool epilogue on a bf16 scratch (halves pool
        # scratch + vst/vld) once packed strided sublane loads are verified.
        w2, t2 = width // 2, tile_h // 2
        pool_ref[...] = y.reshape(tile_h, width, cout)
        wmax = jnp.maximum(pool_ref[:, pl.ds(0, w2, 2), :],
                           pool_ref[:, pl.ds(1, w2, 2), :])
        pool_ref[:, pl.ds(0, w2), :] = wmax
        pooled = jnp.maximum(pool_ref[pl.ds(0, t2, 2), pl.ds(0, w2), :],
                             pool_ref[pl.ds(1, t2, 2), pl.ds(0, w2), :])
        o_ref[0] = pooled.astype(o_ref.dtype)
    else:
        o_ref[0] = y.astype(o_ref.dtype)


# ----------------------------------------------------------------------------
# Tiling heuristic + wrapper
# ----------------------------------------------------------------------------
def _choose_tile_h(B, H, W, cin, cout, pool, out_bytes, img_bufs,
                   budget_bytes=_VMEM_BUDGET, max_tile_h=128):
    """Largest legal H tile whose estimated working set fits the VMEM budget."""
    def legal(th):
        if H % th:
            return False
        if pool and th % 2:
            return False
        if (th * W) % 16 and th != H:        # keep flat output tiles aligned
            return False
        if B == 1 and H > 1 and H // th < 2:  # >=2 grid steps for megacore
            return False
        return True

    cands = [th for th in range(1, H + 1) if legal(th)]
    if not cands:
        return H

    lane_in = _rup(cin, 128)
    lane_k = _rup(9 * cin, 128)
    lane_out = _rup(cout, 128)

    # VMEM that tiling cannot change: resident (lane-padded) image + weights.
    fixed = (img_bufs * H * _rup(W, _SUB) * lane_in * 2
             + _rup(9 * cin, _SUB) * lane_out * 2
             + 8 * lane_out * 4)
    # TODO(synk): for >=480p inputs with cin<=64 the resident image dominates;
    # switch to a manually double-buffered row-band DMA instead of shrinking
    # tile_h towards 1.
    avail = budget_bytes - fixed

    def per_tile(th):
        band = (th + 2) * _rup(W + _COL0 + 1, _SUB) * lane_in * 2
        tap = th * _rup(W, _SUB) * lane_k * 2
        acc = th * _rup(W, _SUB) * lane_out * 4
        pool_s = th * _rup(W, _SUB) * lane_out * 4 if pool else 0
        if pool:
            out_blk = (th // 2) * _rup(W // 2, _SUB) * lane_out * out_bytes
        else:
            out_blk = th * _rup(W, _SUB) * lane_out * out_bytes
        return band + tap + acc + pool_s + 2 * out_blk

    best = None
    for th in cands:
        if th <= max_tile_h and per_tile(th) <= avail:
            best = th
    if best is None:
        best = cands[0]
    return best


def conv3x3_bn_act(x, w, shift, *, act, pool=False, out_dtype=jnp.bfloat16,
                   cin_block=0, max_tile_h=128):
    """Fused 3x3 conv (stride 1, pad 1) + BN shift + activation (+ 2x2 pool).

    x:     (B, H, W, Ctot) bf16 UNPADDED NHWC activation (padding is fused).
    w:     (9*cin, cout) bf16 with BN scale folded in.   shift: (1, cout) f32.
    The conv consumes the `cin_block`-th block of `cin` channels of x
    (Ctot == cin for normal layers, Ctot == 3*cin for the fused decoder stem).
    Returns (B, H, W, cout), or (B, H//2, W//2, cout) when pool=True.
    """
    B, H, W, ctot = x.shape
    cin = w.shape[0] // 9
    cout = w.shape[1]
    assert ctot % cin == 0 and 0 <= cin_block < ctot // cin
    assert (not pool) or (H % 2 == 0 and W % 2 == 0)

    use_concat = (cin % 128 == 0)
    out_bytes = jnp.dtype(out_dtype).itemsize
    tile_h = _choose_tile_h(B, H, W, cin, cout, pool, out_bytes, _IMG_BUFS,
                            max_tile_h=max_tile_h)
    n_h = H // tile_h
    cb = cin_block

    kernel = partial(_conv3x3_kernel, tile_h=tile_h, width=W, cin=cin,
                     cout=cout, act=act, pool=pool, use_concat=use_concat)

    in_specs = [
        # Whole unpadded image; constant block index over the H axis -> fetched
        # once per batch element and kept resident.
        # TODO(synk): for very large inputs (>=480p with cin<=64) switch this
        # input to a manually double-buffered row-band DMA (memory_space=
        # pl.ANY) to cut the lane-padded resident footprint.
        pl.BlockSpec((1, H, W, cin), lambda b, i: (b, 0, 0, cb),
                     pipeline_mode=pl.Buffered(_IMG_BUFS)),
        pl.BlockSpec((9 * cin, cout), lambda b, i: (0, 0),
                     pipeline_mode=pl.Buffered(1)),       # resident weights
        pl.BlockSpec((1, cout), lambda b, i: (0, 0),
                     pipeline_mode=pl.Buffered(1)),       # resident shift
    ]

    scratch = [pltpu.VMEM((tile_h + 2, W + _COL0 + 1, cin), x.dtype)]
    if not use_concat:
        scratch.append(pltpu.VMEM((tile_h, W, 9 * cin), x.dtype))
    if pool:
        out_shape = jax.ShapeDtypeStruct((B, H // 2, W // 2, cout), out_dtype)
        out_spec = pl.BlockSpec((1, tile_h // 2, W // 2, cout),
                                lambda b, i: (b, i, 0, 0))
        scratch.append(pltpu.VMEM((tile_h, W, cout), jnp.float32))
    else:
        out_shape = jax.ShapeDtypeStruct((B, H * W, cout), out_dtype)
        out_spec = pl.BlockSpec((1, tile_h * W, cout), lambda b, i: (b, i, 0))

    out = pl.pallas_call(
        kernel,
        out_shape=out_shape,
        grid=(B, n_h),
        in_specs=in_specs,
        out_specs=out_spec,
        scratch_shapes=scratch,
        compiler_params=pltpu.CompilerParams(
            dimension_semantics=("parallel", "parallel"),
            vmem_limit_bytes=_VMEM_LIMIT,
        ),
    )(x, w, shift)

    if not pool:
        out = out.reshape(B, H, W, cout)
    return out


# ----------------------------------------------------------------------------
# Glue ops (plain JAX)
# ----------------------------------------------------------------------------
def rel_to_abs_nhwc(prel):
    # prel: (B, h, w, 2). Channel 0 += col index, channel 1 += row index; *8.
    _, h, w, _ = prel.shape
    cols = jnp.broadcast_to(jnp.arange(w, dtype=jnp.float32)[None, :], (h, w))
    rows = jnp.broadcast_to(jnp.arange(h, dtype=jnp.float32)[:, None], (h, w))
    grid = jnp.stack([cols, rows], axis=-1)[None]
    return (prel + grid) * 8.0


# ----------------------------------------------------------------------------
# Parameters (deterministic synthetic init; BN folded, eval mode)
# ----------------------------------------------------------------------------
LAYER_CFG = [
    (3, 32, True), (32, 32, True),          # bb_conv(3, 32)
    (32, 64, True), (64, 64, True),         # bb_conv(32, 64)
    (64, 128, True), (128, 128, True),      # bb_conv(64, 128)
    (128, 256, True), (256, 256, False),    # bb_conv(128, 256, last_layer=True)
    (256, 256, True), (256, 1, False),      # score_decoder
    (256, 256, True), (256, 2, False),      # position_decoder
    (256, 256, True), (256, 256, False),    # descriptor_decoder
]


def init_layer(key, cin, cout, with_bn):
    k1, k2, k3, k4 = jax.random.split(key, 4)
    w = jax.random.normal(k1, (9, cin, cout), jnp.float32) / jnp.sqrt(9.0 * cin)
    bias = 0.1 * jax.random.normal(k2, (cout,), jnp.float32)
    if with_bn:
        gamma = 1.0 + 0.1 * jax.random.normal(k3, (cout,), jnp.float32)
        beta = 0.1 * jax.random.normal(k4, (cout,), jnp.float32)
        rmean = jnp.zeros((cout,), jnp.float32)
        rvar = jnp.ones((cout,), jnp.float32)
        scale = gamma / jnp.sqrt(rvar + 1e-5)
        w = w * scale[None, None, :]            # fold BN scale into weights
        shift = scale * (bias - rmean) + beta
    else:
        shift = bias
    return (w.reshape(9 * cin, cout).astype(jnp.bfloat16),
            shift.reshape(1, cout).astype(jnp.float32))


def init_params(key):
    keys = jax.random.split(key, len(LAYER_CFG))
    return [init_layer(k, ci, co, bn) for k, (ci, co, bn) in zip(keys, LAYER_CFG)]


# ----------------------------------------------------------------------------
# Full forward
# ----------------------------------------------------------------------------
def unsuperpoint_forward(image_nchw, params, N):
    B = image_nchw.shape[0]
    x = jnp.transpose(image_nchw, (0, 2, 3, 1)).astype(jnp.float32)  # -> NHWC
    # TODO(synk): utils.normalize_image is not provided; using [-1, 1] scaling.
    x = (x / 255.0 * 2.0 - 1.0).astype(jnp.bfloat16)

    def L(x, idx, act, pool=False):
        w, sh = params[idx]
        return conv3x3_bn_act(x, w, sh, act=act, pool=pool)

    # Backbone (2x2 max-pools fused into layers 1, 3, 5).
    # TODO(synk): fuse layer pairs 0+1 (and 2+3) into a single two-conv kernel
    # keeping the full-resolution intermediate row band in VMEM to cut the
    # remaining HBM round trip of the largest activations.
    x = L(x, 0, "leaky")
    x = L(x, 1, "leaky", pool=True)
    x = L(x, 2, "leaky")
    x = L(x, 3, "leaky", pool=True)
    x = L(x, 4, "leaky")
    x = L(x, 5, "leaky", pool=True)
    x = L(x, 6, "leaky")
    feat = L(x, 7, "none")                           # (B, h, w, 256) bf16

    # Decoders: the three 256->256 stems reading `feat` are fused into one
    # Cout=768 conv (one pass over feat); the final heads read 256-channel
    # blocks of the fused result directly through the BlockSpec channel index.
    w_mid = jnp.concatenate([params[8][0], params[10][0], params[12][0]], axis=1)
    sh_mid = jnp.concatenate([params[8][1], params[10][1], params[12][1]], axis=1)
    mid = conv3x3_bn_act(feat, w_mid, sh_mid, act="leaky")   # (B, h, w, 768)

    # NOTE: Cout=1/2 head outputs are tiny at the /8 decoder resolution, so
    # their non-lane-dense stores are negligible; intentionally left as-is.
    S = conv3x3_bn_act(mid, params[9][0], params[9][1], act="sigmoid",
                       out_dtype=jnp.float32, cin_block=0)        # (B,h,w,1)
    Prel = conv3x3_bn_act(mid, params[11][0], params[11][1], act="sigmoid",
                          out_dtype=jnp.float32, cin_block=1)     # (B,h,w,2)
    # Descriptor map kept in bf16; cast to f32 only after the top-k gather.
    F = conv3x3_bn_act(mid, params[13][0], params[13][1], act="none",
                       out_dtype=jnp.bfloat16, cin_block=2)       # (B,h,w,256)

    P = rel_to_abs_nhwc(Prel)
    h, w = S.shape[1], S.shape[2]

    # Match PyTorch NCHW .view() flattening order.
    Sflat = S.reshape(B, h * w)
    Pflat = jnp.transpose(P, (0, 3, 1, 2)).reshape(B, 2, h * w)
    Prelflat = jnp.transpose(Prel, (0, 3, 1, 2)).reshape(B, 2, h * w)
    Fflat = jnp.transpose(F, (0, 3, 1, 2)).reshape(B, 256, h * w)

    # torch.topk(largest=True, sorted=False): same value/index set; JAX sorts.
    Smax, ids = jax.lax.top_k(Sflat, N)
    Pmax = jnp.take_along_axis(Pflat, ids[:, None, :], axis=2)
    Fmax = jnp.take_along_axis(Fflat, ids[:, None, :], axis=2).astype(jnp.float32)

    return {"S": Smax, "P": Pmax, "Prel": Prelflat, "F": Fmax}


# ----------------------------------------------------------------------------
# Correctness check of the fused conv kernel against a pure-XLA reference
# ----------------------------------------------------------------------------
def _reference_conv(x_bf16, w, shift, act, pool):
    x = x_bf16.astype(jnp.float32)
    cout = w.shape[1]
    cin = w.shape[0] // 9
    wk = w.astype(jnp.float32).reshape(3, 3, cin, cout)          # HWIO
    y = jax.lax.conv_general_dilated(
        x, wk, window_strides=(1, 1), padding="SAME",
        dimension_numbers=("NHWC", "HWIO", "NHWC"))
    y = y + shift.astype(jnp.float32).reshape(1, 1, 1, cout)
    if act == "leaky":
        y = jnp.where(y >= 0.0, y, 0.01 * y)
    elif act == "sigmoid":
        y = 1.0 / (1.0 + jnp.exp(-y))
    if pool:
        B, H, W, C = y.shape
        y = y.reshape(B, H // 2, 2, W // 2, 2, C).max(axis=(2, 4))
    return y


def _check_against_reference():
    def run_one(key, B, H, W, ctot, cout, act, pool, cin_block, n_blocks,
                max_tile_h=128):
        kx, kw, ks = jax.random.split(key, 3)
        cin = ctot // n_blocks
        x = jax.random.normal(kx, (B, H, W, ctot), jnp.float32).astype(jnp.bfloat16)
        w = (jax.random.normal(kw, (9 * cin, cout), jnp.float32)
             / jnp.sqrt(9.0 * cin)).astype(jnp.bfloat16)
        s = 0.1 * jax.random.normal(ks, (1, cout), jnp.float32)
        got = conv3x3_bn_act(x, w, s, act=act, pool=pool, out_dtype=jnp.float32,
                             cin_block=cin_block, max_tile_h=max_tile_h)
        xs = x[..., cin_block * cin:(cin_block + 1) * cin]
        ref = _reference_conv(xs, w, s, act, pool)
        err = float(jnp.max(jnp.abs(got - ref)))
        assert got.shape == ref.shape and err < 0.1, (
            f"conv mismatch (act={act}, pool={pool}): max |err| = {err}")

    keys = jax.random.split(jax.random.PRNGKey(42), 4)
    # multi H-tile (4 tiles): exercises top / interior / bottom halo paths
    run_one(keys[0], 1, 64, 16, 32, 64, "leaky", False, 0, 1, max_tile_h=16)
    # fused 2x2 max-pool with 8 H tiles
    run_one(keys[1], 2, 64, 16, 32, 32, "leaky", True, 0, 1, max_tile_h=8)
    # channel block read + lane-aligned concat tap path (cin=256), 2 tiles
    run_one(keys[2], 1, 8, 8, 512, 32, "sigmoid", False, 1, 2)
    # cin=3 taps (tap-scratch path)
    run_one(keys[3], 1, 8, 8, 3, 32, "none", False, 0, 1)


# ----------------------------------------------------------------------------
if __name__ == "__main__":
    _check_against_reference()

    key = jax.random.PRNGKey(0)
    kp, kx = jax.random.split(key)
    params = init_params(kp)

    B, C, H, W = 2, 3, 64, 64          # feature grid = 8x8 -> 64 cells
    N = 16
    image = jax.random.uniform(kx, (B, C, H, W), jnp.float32) * 255.0

    fwd = jax.jit(partial(unsuperpoint_forward, N=N))
    out = fwd(image, params)
    jax.block_until_ready(out)

    hw = (H // 8) * (W // 8)
    assert out["S"].shape == (B, N)
    assert out["P"].shape == (B, 2, N)
    assert out["Prel"].shape == (B, 2, hw)
    assert out["F"].shape == (B, 256, N)
    for v in out.values():
        assert bool(jnp.all(jnp.isfinite(v)))
    print("KERNEL_OK")
</pallas_src>

<mosaic_0001>
module attributes {stable_mosaic.version = 11 : i64} {
  func.func @_conv3x3_kernel(%arg0: i32, %arg1: i32, %arg2: memref<1x64x16x32xbf16, #tpu.memory_space<vmem>>, %arg3: memref<288x64xbf16, #tpu.memory_space<vmem>>, %arg4: memref<1x64xf32, #tpu.memory_space<vmem>>, %arg5: memref<1x256x64xf32, #tpu.memory_space<vmem>>, %arg6: memref<18x33x32xbf16, #tpu.memory_space<vmem>>, %arg7: memref<16x16x288xbf16, #tpu.memory_space<vmem>>) attributes {dimension_semantics = [#tpu.dimension_semantics<parallel>, #tpu.dimension_semantics<parallel>], iteration_bounds = array<i64: 1, 4>, scalar_prefetch = 0 : i64, scratch_operands = 2 : i64, tpu.core_type = #tpu.core_type<tc>, window_params = [{pipeline_mode = #tpu.pipeline_mode<synchronous>, transform_indices = @transform_0, window_bounds = array<i64: 1, 64, 16, 32>}, {pipeline_mode = #tpu.pipeline_mode<synchronous>, transform_indices = @transform_1, window_bounds = array<i64: 288, 64>}, {pipeline_mode = #tpu.pipeline_mode<synchronous>, transform_indices = @transform_2, window_bounds = array<i64: 1, 64>}, {transform_indices = @transform_3, window_bounds = array<i64: 1, 256, 64>}]} {
    %c16_i32 = arith.constant 16 : i32
    %0 = arith.muli %arg1, %c16_i32 : i32
    %1 = tpu.assume_multiple %0, 8 : i32
    %c0 = arith.constant 0 : index
    %2 = arith.index_cast %1 : i32 to index
    %c0_0 = arith.constant 0 : index
    %c0_1 = arith.constant 0 : index
    %3 = vector.load %arg2[%c0, %2, %c0_0, %c0_1] : memref<1x64x16x32xbf16, #tpu.memory_space<vmem>>, vector<1x16x16x32xbf16>
    %4 = vector.shape_cast %3 : vector<1x16x16x32xbf16> to vector<16x16x32xbf16>
    %c1 = arith.constant 1 : index
    %c16 = arith.constant 16 : index
    %c0_2 = arith.constant 0 : index
    %5 = vector.load %arg6[%c1, %c16, %c0_2] : memref<18x33x32xbf16, #tpu.memory_space<vmem>>, vector<16x16x32xbf16>
    tpu.vector_store %arg6[%c1, %c16, %c0_2], %4 {strides = array<i32>} : memref<18x33x32xbf16, #tpu.memory_space<vmem>>, vector<16x16x32xbf16>,
    %c0_i32 = arith.constant 0 : i32
    %6 = arith.cmpi sgt, %arg1, %c0_i32 : i32
    %7 = arith.extui %6 : i1 to i32
    %c0_i32_3 = arith.constant 0 : i32
    %8 = arith.cmpi ne, %7, %c0_i32_3 : i32
    scf.if %8 {
      %c1_i32 = arith.constant 1 : i32
      %54 = arith.subi %1, %c1_i32 : i32
      %c0_71 = arith.constant 0 : index
      %55 = arith.index_cast %54 : i32 to index
      %c0_72 = arith.constant 0 : index
      %c0_73 = arith.constant 0 : index
      %56 = vector.load %arg2[%c0_71, %55, %c0_72, %c0_73] : memref<1x64x16x32xbf16, #tpu.memory_space<vmem>>, vector<1x1x16x32xbf16>
      %57 = vector.shape_cast %56 : vector<1x1x16x32xbf16> to vector<1x16x32xbf16>
      %c0_74 = arith.constant 0 : index
      %c16_75 = arith.constant 16 : index
      %c0_76 = arith.constant 0 : index
      %58 = vector.load %arg6[%c0_74, %c16_75, %c0_76] : memref<18x33x32xbf16, #tpu.memory_space<vmem>>, vector<1x16x32xbf16>
      tpu.vector_store %arg6[%c0_74, %c16_75, %c0_76], %57 {strides = array<i32>} : memref<18x33x32xbf16, #tpu.memory_space<vmem>>, vector<1x16x32xbf16>,
    } else {
    }
    %c0_i32_4 = arith.constant 0 : i32
    %9 = arith.cmpi eq, %arg1, %c0_i32_4 : i32
    %10 = arith.extui %9 : i1 to i32
    %c0_i32_5 = arith.constant 0 : i32
    %11 = arith.cmpi ne, %10, %c0_i32_5 : i32
    scf.if %11 {
      %cst_71 = arith.constant 0.000000e+00 : bf16
      %54 = vector.broadcast %cst_71 : bf16 to vector<1x18x32xbf16>
      %c0_72 = arith.constant 0 : index
      %c15_73 = arith.constant 15 : index
      %c0_74 = arith.constant 0 : index
      %55 = vector.load %arg6[%c0_72, %c15_73, %c0_74] : memref<18x33x32xbf16, #tpu.memory_space<vmem>>, vector<1x18x32xbf16>
      tpu.vector_store %arg6[%c0_72, %c15_73, %c0_74], %54 {strides = array<i32>} : memref<18x33x32xbf16, #tpu.memory_space<vmem>>, vector<1x18x32xbf16>,
    } else {
    }
    %c3_i32 = arith.constant 3 : i32
    %12 = arith.cmpi slt, %arg1, %c3_i32 : i32
    %13 = arith.extui %12 : i1 to i32
    %c0_i32_6 = arith.constant 0 : i32
    %14 = arith.cmpi ne, %13, %c0_i32_6 : i32
    scf.if %14 {
      %c16_i32_71 = arith.constant 16 : i32
      %54 = arith.addi %1, %c16_i32_71 : i32
      %c0_72 = arith.constant 0 : index
      %55 = arith.index_cast %54 : i32 to index
      %c0_73 = arith.constant 0 : index
      %c0_74 = arith.constant 0 : index
      %56 = vector.load %arg2[%c0_72, %55, %c0_73, %c0_74] : memref<1x64x16x32xbf16, #tpu.memory_space<vmem>>, vector<1x1x16x32xbf16>
      %57 = vector.shape_cast %56 : vector<1x1x16x32xbf16> to vector<1x16x32xbf16>
      %c17_75 = arith.constant 17 : index
      %c16_76 = arith.constant 16 : index
      %c0_77 = arith.constant 0 : index
      %58 = vector.load %arg6[%c17_75, %c16_76, %c0_77] : memref<18x33x32xbf16, #tpu.memory_space<vmem>>, vector<1x16x32xbf16>
      tpu.vector_store %arg6[%c17_75, %c16_76, %c0_77], %57 {strides = array<i32>} : memref<18x33x32xbf16, #tpu.memory_space<vmem>>, vector<1x16x32xbf16>,
    } else {
    }
    %c3_i32_7 = arith.constant 3 : i32
    %15 = arith.cmpi eq, %arg1, %c3_i32_7 : i32
    %16 = arith.extui %15 : i1 to i32
    %c0_i32_8 = arith.constant 0 : i32
    %17 = arith.cmpi ne, %16, %c0_i32_8 : i32
    scf.if %17 {
      %cst_71 = arith.constant 0.000000e+00 : bf16
      %54 = vector.broadcast %cst_71 : bf16 to vector<1x18x32xbf16>
      %c17_72 = arith.constant 17 : index
      %c15_73 = arith.constant 15 : index
      %c0_74 = arith.constant 0 : index
      %55 = vector.load %arg6[%c17_72, %c15_73, %c0_74] : memref<18x33x32xbf16, #tpu.memory_space<vmem>>, vector<1x18x32xbf16>
      tpu.vector_store %arg6[%c17_72, %c15_73, %c0_74], %54 {strides = array<i32>} : memref<18x33x32xbf16, #tpu.memory_space<vmem>>, vector<1x18x32xbf16>,
    } else {
    }
    %cst = arith.constant 0.000000e+00 : bf16
    %18 = vector.broadcast %cst : bf16 to vector<18x1x32xbf16>
    %c0_9 = arith.constant 0 : index
    %c15 = arith.constant 15 : index
    %c0_10 = arith.constant 0 : index
    %19 = vector.load %arg6[%c0_9, %c15, %c0_10] : memref<18x33x32xbf16, #tpu.memory_space<vmem>>, vector<18x1x32xbf16>
    tpu.vector_store %arg6[%c0_9, %c15, %c0_10], %18 {strides = array<i32>} : memref<18x33x32xbf16, #tpu.memory_space<vmem>>, vector<18x1x32xbf16>,
    %c0_11 = arith.constant 0 : index
    %c32 = arith.constant 32 : index
    %c0_12 = arith.constant 0 : index
    %20 = vector.load %arg6[%c0_11, %c32, %c0_12] : memref<18x33x32xbf16, #tpu.memory_space<vmem>>, vector<18x1x32xbf16>
    tpu.vector_store %arg6[%c0_11, %c32, %c0_12], %18 {strides = array<i32>} : memref<18x33x32xbf16, #tpu.memory_space<vmem>>, vector<18x1x32xbf16>,
    %c0_13 = arith.constant 0 : index
    %c15_14 = arith.constant 15 : index
    %c0_15 = arith.constant 0 : index
    %21 = vector.load %arg6[%c0_13, %c15_14, %c0_15] : memref<18x33x32xbf16, #tpu.memory_space<vmem>>, vector<16x16x32xbf16>
    %c0_16 = arith.constant 0 : index
    %c0_17 = arith.constant 0 : index
    %c0_18 = arith.constant 0 : index
    %22 = vector.load %arg7[%c0_16, %c0_17, %c0_18] : memref<16x16x288xbf16, #tpu.memory_space<vmem>>, vector<16x16x32xbf16>
    tpu.vector_store %arg7[%c0_16, %c0_17, %c0_18], %21 {strides = array<i32>} : memref<16x16x288xbf16, #tpu.memory_space<vmem>>, vector<16x16x32xbf16>,
    %c0_19 = arith.constant 0 : index
    %c16_20 = arith.constant 16 : index
    %c0_21 = arith.constant 0 : index
    %23 = vector.load %arg6[%c0_19, %c16_20, %c0_21] : memref<18x33x32xbf16, #tpu.memory_space<vmem>>, vector<16x16x32xbf16>
    %c0_22 = arith.constant 0 : index
    %c0_23 = arith.constant 0 : index
    %c32_24 = arith.constant 32 : index
    %24 = vector.load %arg7[%c0_22, %c0_23, %c32_24] : memref<16x16x288xbf16, #tpu.memory_space<vmem>>, vector<16x16x32xbf16>
    tpu.vector_store %arg7[%c0_22, %c0_23, %c32_24], %23 {strides = array<i32>} : memref<16x16x288xbf16, #tpu.memory_space<vmem>>, vector<16x16x32xbf16>,
    %c0_25 = arith.constant 0 : index
    %c17 = arith.constant 17 : index
    %c0_26 = arith.constant 0 : index
    %25 = vector.load %arg6[%c0_25, %c17, %c0_26] : memref<18x33x32xbf16, #tpu.memory_space<vmem>>, vector<16x16x32xbf16>
    %c0_27 = arith.constant 0 : index
    %c0_28 = arith.constant 0 : index
    %c64 = arith.constant 64 : index
    %26 = vector.load %arg7[%c0_27, %c0_28, %c64] : memref<16x16x288xbf16, #tpu.memory_space<vmem>>, vector<16x16x32xbf16>
    tpu.vector_store %arg7[%c0_27, %c0_28, %c64], %25 {strides = array<i32>} : memref<16x16x288xbf16, #tpu.memory_space<vmem>>, vector<16x16x32xbf16>,
    %c1_29 = arith.constant 1 : index
    %c15_30 = arith.constant 15 : index
    %c0_31 = arith.constant 0 : index
    %27 = vector.load %arg6[%c1_29, %c15_30, %c0_31] : memref<18x33x32xbf16, #tpu.memory_space<vmem>>, vector<16x16x32xbf16>
    %c0_32 = arith.constant 0 : index
    %c0_33 = arith.constant 0 : index
    %c96 = arith.constant 96 : index
    %28 = vector.load %arg7[%c0_32, %c0_33, %c96] : memref<16x16x288xbf16, #tpu.memory_space<vmem>>, vector<16x16x32xbf16>
    tpu.vector_store %arg7[%c0_32, %c0_33, %c96], %27 {strides = array<i32>} : memref<16x16x288xbf16, #tpu.memory_space<vmem>>, vector<16x16x32xbf16>,
    %c1_34 = arith.constant 1 : index
    %c16_35 = arith.constant 16 : index
    %c0_36 = arith.constant 0 : index
    %29 = vector.load %arg6[%c1_34, %c16_35, %c0_36] : memref<18x33x32xbf16, #tpu.memory_space<vmem>>, vector<16x16x32xbf16>
    %c0_37 = arith.constant 0 : index
    %c0_38 = arith.constant 0 : index
    %c128 = arith.constant 128 : index
    %30 = vector.load %arg7[%c0_37, %c0_38, %c128] : memref<16x16x288xbf16, #tpu.memory_space<vmem>>, vector<16x16x32xbf16>
    tpu.vector_store %arg7[%c0_37, %c0_38, %c128], %29 {strides = array<i32>} : memref<16x16x288xbf16, #tpu.memory_space<vmem>>, vector<16x16x32xbf16>,
    %c1_39 = arith.constant 1 : index
    %c17_40 = arith.constant 17 : index
    %c0_41 = arith.constant 0 : index
    %31 = vector.load %arg6[%c1_39, %c17_40, %c0_41] : memref<18x33x32xbf16, #tpu.memory_space<vmem>>, vector<16x16x32xbf16>
    %c0_42 = arith.constant 0 : index
    %c0_43 = arith.constant 0 : index
    %c160 = arith.constant 160 : index
    %32 = vector.load %arg7[%c0_42, %c0_43, %c160] : memref<16x16x288xbf16, #tpu.memory_space<vmem>>, vector<16x16x32xbf16>
    tpu.vector_store %arg7[%c0_42, %c0_43, %c160], %31 {strides = array<i32>} : memref<16x16x288xbf16, #tpu.memory_space<vmem>>, vector<16x16x32xbf16>,
    %c2 = arith.constant 2 : index
    %c15_44 = arith.constant 15 : index
    %c0_45 = arith.constant 0 : index
    %33 = vector.load %arg6[%c2, %c15_44, %c0_45] : memref<18x33x32xbf16, #tpu.memory_space<vmem>>, vector<16x16x32xbf16>
    %c0_46 = arith.constant 0 : index
    %c0_47 = arith.constant 0 : index
    %c192 = arith.constant 192 : index
    %34 = vector.load %arg7[%c0_46, %c0_47, %c192] : memref<16x16x288xbf16, #tpu.memory_space<vmem>>, vector<16x16x32xbf16>
    tpu.vector_store %arg7[%c0_46, %c0_47, %c192], %33 {strides = array<i32>} : memref<16x16x288xbf16, #tpu.memory_space<vmem>>, vector<16x16x32xbf16>,
    %c2_48 = arith.constant 2 : index
    %c16_49 = arith.constant 16 : index
    %c0_50 = arith.constant 0 : index
    %35 = vector.load %arg6[%c2_48, %c16_49, %c0_50] : memref<18x33x32xbf16, #tpu.memory_space<vmem>>, vector<16x16x32xbf16>
    %c0_51 = arith.constant 0 : index
    %c0_52 = arith.constant 0 : index
    %c224 = arith.constant 224 : index
    %36 = vector.load %arg7[%c0_51, %c0_52, %c224] : memref<16x16x288xbf16, #tpu.memory_space<vmem>>, vector<16x16x32xbf16>
    tpu.vector_store %arg7[%c0_51, %c0_52, %c224], %35 {strides = array<i32>} : memref<16x16x288xbf16, #tpu.memory_space<vmem>>, vector<16x16x32xbf16>,
    %c2_53 = arith.constant 2 : index
    %c17_54 = arith.constant 17 : index
    %c0_55 = arith.constant 0 : index
    %37 = vector.load %arg6[%c2_53, %c17_54, %c0_55] : memref<18x33x32xbf16, #tpu.memory_space<vmem>>, vector<16x16x32xbf16>
    %c0_56 = arith.constant 0 : index
    %c0_57 = arith.constant 0 : index
    %c256 = arith.constant 256 : index
    %38 = vector.load %arg7[%c0_56, %c0_57, %c256] : memref<16x16x288xbf16, #tpu.memory_space<vmem>>, vector<16x16x32xbf16>
    tpu.vector_store %arg7[%c0_56, %c0_57, %c256], %37 {strides = array<i32>} : memref<16x16x288xbf16, #tpu.memory_space<vmem>>, vector<16x16x32xbf16>,
    %c0_58 = arith.constant 0 : index
    %c0_59 = arith.constant 0 : index
    %c0_60 = arith.constant 0 : index
    %39 = vector.load %arg7[%c0_58, %c0_59, %c0_60] : memref<16x16x288xbf16, #tpu.memory_space<vmem>>, vector<16x16x288xbf16>
    %40 = vector.shape_cast %39 : vector<16x16x288xbf16> to vector<256x288xbf16>
    %c0_61 = arith.constant 0 : index
    %c0_62 = arith.constant 0 : index
    %41 = vector.load %arg3[%c0_61, %c0_62] : memref<288x64xbf16, #tpu.memory_space<vmem>>, vector<288x64xbf16>
    %cst_63 = arith.constant dense<0.000000e+00> : vector<256x64xf32>
    %42 = tpu.matmul %40, %41, %cst_63 {dimension_numbers = #tpu.dot_dimension_numbers<[1], [0], [0], [1], [0, 0, 1, 1], [], []>} : vector<256x288xbf16>, vector<288x64xbf16>, vector<256x64xf32> -> vector<256x64xf32>
    %c0_64 = arith.constant 0 : index
    %c0_65 = arith.constant 0 : index
    %43 = vector.load %arg4[%c0_64, %c0_65] : memref<1x64xf32, #tpu.memory_space<vmem>>, vector<1x64xf32>
    %44 = vector.broadcast %43 : vector<1x64xf32> to vector<256x64xf32>
    %45 = arith.addf %42, %44 : vector<256x64xf32>
    %cst_66 = arith.constant 0.000000e+00 : f32
    %46 = vector.broadcast %cst_66 : f32 to vector<256x64xf32>
    %47 = arith.cmpf oge, %45, %46 : vector<256x64xf32>
    %cst_67 = arith.constant 0.00999999977 : f32
    %48 = vector.broadcast %cst_67 : f32 to vector<256x64xf32>
    %49 = arith.mulf %48, %45 : vector<256x64xf32>
    %50 = arith.select %47, %45, %49 : vector<256x64xi1>, vector<256x64xf32>
    %c0_68 = arith.constant 0 : index
    %c0_69 = arith.constant 0 : index
    %c0_70 = arith.constant 0 : index
    %51 = vector.load %arg5[%c0_68, %c0_69, %c0_70] : memref<1x256x64xf32, #tpu.memory_space<vmem>>, vector<1x256x64xf32>
    %52 = vector.shape_cast %51 : vector<1x256x64xf32> to vector<256x64xf32>
    %53 = vector.shape_cast %50 : vector<256x64xf32> to vector<1x256x64xf32>
    tpu.vector_store %arg5[%c0_68, %c0_69, %c0_70], %53 {strides = array<i32>} : memref<1x256x64xf32, #tpu.memory_space<vmem>>, vector<1x256x64xf32>,
    return
  }
  func.func @transform_0(%arg0: i32, %arg1: i32) -> (i32, i32, i32, i32) {
    %c0_i32 = arith.constant 0 : i32
    %c0_i32_0 = arith.constant 0 : i32
    %c0_i32_1 = arith.constant 0 : i32
    %c0_i32_2 = arith.constant 0 : i32
    return %arg0, %c0_i32, %c0_i32_0, %c0_i32_1 : i32, i32, i32, i32
  }
  func.func @transform_1(%arg0: i32, %arg1: i32) -> (i32, i32) {
    %c0_i32 = arith.constant 0 : i32
    %c0_i32_0 = arith.constant 0 : i32
    %c0_i32_1 = arith.constant 0 : i32
    return %c0_i32, %c0_i32_0 : i32, i32
  }
  func.func @transform_2(%arg0: i32, %arg1: i32) -> (i32, i32) {
    %c0_i32 = arith.constant 0 : i32
    %c0_i32_0 = arith.constant 0 : i32
    %c0_i32_1 = arith.constant 0 : i32
    return %c0_i32, %c0_i32_0 : i32, i32
  }
  func.func @transform_3(%arg0: i32, %arg1: i32) -> (i32, i32, i32) {
    %c0_i32 = arith.constant 0 : i32
    %c0_i32_0 = arith.constant 0 : i32
    return %arg0, %arg1, %c0_i32 : i32, i32, i32
  }
}

</mosaic_0001>

<bundles_post_ra>
// kernel: tpu_custom_call.1
= control target key start
LH: loop header
LB: loop body
LE: loop exit
PB: predicated region body
PF: predicated region fallthrough
CT: control target
= control target key end

     0   :  { %s5568_s12 = smov 0   ;;  %s5570_s13 = smov 0   ;;  %s8353_s0 = inlined_call_operand.vmem [shape: bf16[1,64,16,32], index: 0, kind: input, shape index: {}]   ;;  %s8354_s1 = inlined_call_operand.vmem [shape: bf16[288,64], index: 1, kind: input, shape index: {}]   ;;  %s8355_s2 = inlined_call_operand.vmem [shape: f32[1,64], index: 2, kind: input, shape index: {}]   ;;  %s8356_s3 = inlined_call_operand.vmem [shape: f32[1,1024,64], index: 3, kind: output, shape index: {}]  }
   0x1   :  { %s5572_s14 = smov 0  }
   0x2 LB: > { %s22_s15 = sadd.s32 1, %s5537_s13  ;;  %p5085_p0 = scmp.ge.s32.totalorder %s5541_s14, 1  ;;  %s5541_s14 = sphi %s5572_s14, %s13_s14   ;;  %s5537_s13 = sphi %s5570_s13, %s8429_s13   ;;  %s5533_s12 = sphi %s5568_s12, %s8428_s12  }
   0x3   : > { %p23_p1 = scmp.ge.s32.totalorder %s22_s15, 4  ;;  %p151_p2 = scmp.lt.s32.totalorder %s5541_s14, 5 }
   0x5   : > { %s8431_s15 = smov (%p23_p1, %s22_s15), 0  ;;  %p152_p3 = pnand %p5085_p0, %p151_p2 }
   0x7   : > { %155 = sbr.rel (%p152_p3) target bundleno = 841 (0x349), region = 32 }
   0xc   : > { %s5086_s16 = sshll.u32 %s5533_s12, 5  ;;  %s5088_s17 = sshll.u32 %s5533_s12, 4  ;;  %vm232_vm0 = vcmask 257024  }
   0xd   : > { %p187_p4 = scmp.lt.s32.totalorder %s5086_s16, 127  ;;  %s5236_s18 = sshll.u32 %s5533_s12, 7 }
   0xe   : > { %s5594_s21 = scalar_lea.vmem %s8353_s0, %s5236_s18  ;;  %p5091_p5 = scmp.le.s32.totalorder %s5533_s12, 0 }
   0xf   : > { %s8433_s16 = smov (!%p187_p4, %s5086_s16), 127  ;;  %v199_v0 = vld [vmem:[%s5594_s21] sm:$0xf]  ;;  %v200_v1 = vld [vmem:[%s5594_s21 + $0x4] sm:$0xf]  ;;  %s5092_s26 = sadd.s32 (!%p5091_p5), 4294967295, %s5088_s17 }
  0x10   : > { %233 = vst.msk [vmem:[#allocation2 + $0x1c] sm:$0xf] %vm232_vm0, %v199_v0  ;;  %234 = vst.msk [vmem:[#allocation2 + $0x20] sm:$0xf] %vm232_vm0, %v200_v1  ;;  %v201_v2 = vld [vmem:[%s5594_s21 + $0x8] sm:$0xf] }
  0x11   : > { %v202_v3 = vld [vmem:[%s5594_s21 + $0xc] sm:$0xf]  ;;  %v203_v4 = vld [vmem:[%s5594_s21 + $0x10] sm:$0xf]  ;;  %s5087_s22 = sshll.u32 %s8433_s16, 3  ;;  %s5237_s27 = sshll.u32 (!%p5091_p5), %s5092_s26, 3 }
  0x12   : > { %235 = vst.msk [vmem:[#allocation2 + $0x30] sm:$0xf] %vm232_vm0, %v201_v2  ;;  %236 = vst.msk [vmem:[#allocation2 + $0x34] sm:$0xf] %vm232_vm0, %v202_v3  ;;  %v204_v5 = vld [vmem:[%s5594_s21 + $0x14] sm:$0xf]  ;;  %s5611_s25 = scalar_lea.vmem %s8356_s3, %s5087_s22  ;;  %s272_s30 = scalar_lea.vmem (!%p5091_p5), %s8353_s0, %s5237_s27 }
  0x13   : > { %237 = vst.msk [vmem:[#allocation2 + $0x44] sm:$0xf] %vm232_vm0, %v203_v4  ;;  %v205_v6 = vld [vmem:[%s5594_s21 + $0x18] sm:$0xf]  ;;  %238 = vst.msk [vmem:[#allocation2 + $0x48] sm:$0xf] %vm232_vm0, %v204_v5 }
  0x14   : > { %239 = vst.msk [vmem:[#allocation2 + $0x58] sm:$0xf] %vm232_vm0, %v205_v6  ;;  %v206_v7 = vld [vmem:[%s5594_s21 + $0x1c] sm:$0xf]  ;;  %v207_v8 = vld [vmem:[%s5594_s21 + $0x20] sm:$0xf] }
  0x15   : > { %v208_v9 = vld [vmem:[%s5594_s21 + $0x24] sm:$0xf]  ;;  %240 = vst.msk [vmem:[#allocation2 + $0x5c] sm:$0xf] %vm232_vm0, %v206_v7  ;;  %241 = vst.msk [vmem:[#allocation2 + $0x6c] sm:$0xf] %vm232_vm0, %v207_v8 }
  0x16   : > { %242 = vst.msk [vmem:[#allocation2 + $0x70] sm:$0xf] %vm232_vm0, %v208_v9  ;;  %v209_v10 = vld [vmem:[%s5594_s21 + $0x28] sm:$0xf]  ;;  %v210_v11 = vld [vmem:[%s5594_s21 + $0x2c] sm:$0xf] }
  0x17   : > { %v211_v12 = vld [vmem:[%s5594_s21 + $0x30] sm:$0xf]  ;;  %243 = vst.msk [vmem:[#allocation2 + $0x80] sm:$0xf] %vm232_vm0, %v209_v10  ;;  %244 = vst.msk [vmem:[#allocation2 + $0x84] sm:$0xf] %vm232_vm0, %v210_v11 }
  0x18   : > { %245 = vst.msk [vmem:[#allocation2 + $0x94] sm:$0xf] %vm232_vm0, %v211_v12  ;;  %v212_v13 = vld [vmem:[%s5594_s21 + $0x34] sm:$0xf]  ;;  %v213_v14 = vld [vmem:[%s5594_s21 + $0x38] sm:$0xf] }
  0x19   : > { %v214_v15 = vld [vmem:[%s5594_s21 + $0x3c] sm:$0xf]  ;;  %246 = vst.msk [vmem:[#allocation2 + $0x98] sm:$0xf] %vm232_vm0, %v212_v13  ;;  %247 = vst.msk [vmem:[#allocation2 + $0xa8] sm:$0xf] %vm232_vm0, %v213_v14 }
  0x1a   : > { %248 = vst.msk [vmem:[#allocation2 + $0xac] sm:$0xf] %vm232_vm0, %v214_v15  ;;  %v215_v16 = vld [vmem:[%s5594_s21 + $0x40] sm:$0xf]  ;;  %v216_v17 = vld [vmem:[%s5594_s21 + $0x44] sm:$0xf] }
  0x1b   : > { %v217_v18 = vld [vmem:[%s5594_s21 + $0x48] sm:$0xf]  ;;  %249 = vst.msk [vmem:[#allocation2 + $0xbc] sm:$0xf] %vm232_vm0, %v215_v16  ;;  %250 = vst.msk [vmem:[#allocation2 + $0xc0] sm:$0xf] %vm232_vm0, %v216_v17 }
  0x1c   : > { %251 = vst.msk [vmem:[#allocation2 + $0xd0] sm:$0xf] %vm232_vm0, %v217_v18  ;;  %v218_v19 = vld [vmem:[%s5594_s21 + $0x4c] sm:$0xf]  ;;  %v219_v20 = vld [vmem:[%s5594_s21 + $0x50] sm:$0xf] }
  0x1d   : > { %v220_v21 = vld [vmem:[%s5594_s21 + $0x54] sm:$0xf]  ;;  %252 = vst.msk [vmem:[#allocation2 + $0xd4] sm:$0xf] %vm232_vm0, %v218_v19  ;;  %253 = vst.msk [vmem:[#allocation2 + $0xe4] sm:$0xf] %vm232_vm0, %v219_v20 }
  0x1e   : > { %254 = vst.msk [vmem:[#allocation2 + $0xe8] sm:$0xf] %vm232_vm0, %v220_v21  ;;  %v221_v22 = vld [vmem:[%s5594_s21 + $0x58] sm:$0xf]  ;;  %v222_v23 = vld [vmem:[%s5594_s21 + $0x5c] sm:$0xf] }
  0x1f   : > { %v223_v24 = vld [vmem:[%s5594_s21 + $0x60] sm:$0xf]  ;;  %255 = vst.msk [vmem:[#allocation2 + $0xf8] sm:$0xf] %vm232_vm0, %v221_v22  ;;  %256 = vst.msk [vmem:[#allocation2 + $0xfc] sm:$0xf] %vm232_vm0, %v222_v23 }
  0x20   : > { %257 = vst.msk [vmem:[#allocation2 + $0x10c] sm:$0xf] %vm232_vm0, %v223_v24  ;;  %v224_v25 = vld [vmem:[%s5594_s21 + $0x64] sm:$0xf]  ;;  %v225_v26 = vld [vmem:[%s5594_s21 + $0x68] sm:$0xf] }
  0x21   : > { %v226_v27 = vld [vmem:[%s5594_s21 + $0x6c] sm:$0xf]  ;;  %258 = vst.msk [vmem:[#allocation2 + $0x110] sm:$0xf] %vm232_vm0, %v224_v25  ;;  %259 = vst.msk [vmem:[#allocation2 + $0x120] sm:$0xf] %vm232_vm0, %v225_v26 }
  0x22   : > { %260 = vst.msk [vmem:[#allocation2 + $0x124] sm:$0xf] %vm232_vm0, %v226_v27  ;;  %v227_v28 = vld [vmem:[%s5594_s21 + $0x70] sm:$0xf]  ;;  %v228_v29 = vld [vmem:[%s5594_s21 + $0x74] sm:$0xf] }
  0x23   : > { %v229_v30 = vld [vmem:[%s5594_s21 + $0x78] sm:$0xf]  ;;  %261 = vst.msk [vmem:[#allocation2 + $0x134] sm:$0xf] %vm232_vm0, %v227_v28  ;;  %262 = vst.msk [vmem:[#allocation2 + $0x138] sm:$0xf] %vm232_vm0, %v228_v29 }
  0x24   : > { %263 = vst.msk [vmem:[#allocation2 + $0x148] sm:$0xf] %vm232_vm0, %v229_v30  ;;  %v230_v31 = vld [vmem:[%s5594_s21 + $0x7c] sm:$0xf]  ;;  %268 = sbr.rel (%p5091_p5) target bundleno = 43 (0x2b), region = 36 }
  0x25   : > { %264 = vst.msk [vmem:[#allocation2 + $0x14c] sm:$0xf] %vm232_vm0, %v230_v31 }
  0x29   : > { %v273_v32 = vld [vmem:[%s272_s30] sm:$0xf]  ;;  %v274_v33 = vld [vmem:[%s272_s30 + $0x4] sm:$0xf] }
  0x2a   : > { %275 = vst.msk [vmem:[#allocation2 + $0x8] sm:$0xf] %vm232_vm0, %v273_v32  ;;  %276 = vst.msk [vmem:[#allocation2 + $0xc] sm:$0xf] %vm232_vm0, %v274_v33 }
  0x2b PF: > { %p5095_p6 = scmp.ne.s32.totalorder %s5533_s12, 0 }
  0x2d   : > { %280 = sbr.rel (%p5095_p6) target bundleno = 55 (0x37), region = 40 }
  0x32   : > { %vm281_vm1 = vcmask 257027   ;;  %vm282_vm2 = vsmask.f32 7950  ;;  %v284_v34 = vld [vmem:[#allocation2 + $0x4] sm:$0x8]  ;;  %v5543_v35 = vmov 0  }
  0x33   : > { %vm283_vm3 = vmand %vm281_vm1, %vm282_vm2  ;;  %287 = vst.msk [vmem:[#allocation2 + $0x8] sm:$0xf] %vm232_vm0, %v5543_v35  ;;  %vm289_vm4 = vcmask 253952   ;;  %vm290_vm5 = vsmask.f32 256 }
  0x34   : > { %288 = vst.msk [vmem:[#allocation2 + $0xc] sm:$0xf] %vm232_vm0, %v5543_v35  ;;  %v292_v36 = vld [vmem:[#allocation2 + $0x10] sm:$0x1]  ;;  %v285_v37 = vsel %vm283_vm3, 0, %v284_v34  ;;  %vm291_vm6 = vmand %vm289_vm4, %vm290_vm5 }
  0x35   : > { %286 = vst [vmem:[#allocation2 + $0x4] sm:$0x8] %v285_v37  ;;  %v293_v38 = vsel %vm291_vm6, 0, %v292_v36 }
  0x36   : > { %294 = vst [vmem:[#allocation2 + $0x10] sm:$0x1] %v293_v38 }
  0x37 PF: > { %p5096_p7 = scmp.ge.s32.totalorder %s5533_s12, 3 }
  0x39   : > { %298 = sbr.rel (%p5096_p7) target bundleno = 64 (0x40), region = 44 }
  0x3e   : > { %v5099_v39 = vld [vmem:[%s5594_s21 + $0x80] sm:$0xf]  ;;  %v5100_v40 = vld [vmem:[%s5594_s21 + $0x84] sm:$0xf] }
  0x3f   : > { %306 = vst.msk [vmem:[#allocation2 + $0x15c] sm:$0xf] %vm232_vm0, %v5099_v39  ;;  %307 = vst.msk [vmem:[#allocation2 + $0x160] sm:$0xf] %vm232_vm0, %v5100_v40 }
  0x40 PF: > { %p5101_p8 = scmp.ne.s32.totalorder %s5533_s12, 3 }
  0x42   : > { %311 = sbr.rel (%p5101_p8) target bundleno = 76 (0x4c), region = 48 }
  0x47   : > { %vm313_vm7 = vcmask 257027   ;;  %vm314_vm8 = vsmask.f32 7950  ;;  %v316_v41 = vld [vmem:[#allocation2 + $0x158] sm:$0x8]  ;;  %v5544_v42 = vmov 0  }
  0x48   : > { %vm315_vm9 = vmand %vm313_vm7, %vm314_vm8  ;;  %319 = vst.msk [vmem:[#allocation2 + $0x15c] sm:$0xf] %vm232_vm0, %v5544_v42  ;;  %vm321_vm10 = vcmask 253952   ;;  %vm322_vm11 = vsmask.f32 256 }
  0x49   : > { %320 = vst.msk [vmem:[#allocation2 + $0x160] sm:$0xf] %vm232_vm0, %v5544_v42  ;;  %v324_v43 = vld [vmem:[#allocation2 + $0x164] sm:$0x1]  ;;  %v317_v44 = vsel %vm315_vm9, 0, %v316_v41  ;;  %vm323_vm12 = vmand %vm321_vm10, %vm322_vm11 }
  0x4a   : > { %318 = vst [vmem:[#allocation2 + $0x158] sm:$0x8] %v317_v44  ;;  %v325_v45 = vsel %vm323_vm12, 0, %v324_v43 }
  0x4b   : > { %326 = vst [vmem:[#allocation2 + $0x164] sm:$0x1] %v325_v45 }
  0x4c PF: > { %v909_v46 = vld [vmem:[#allocation2 + $0x1c] sm:$0xf]  ;;  %v907_v47 = vld [vmem:[#allocation2 + $0x8] sm:$0xf]  ;;  %s5545_s4 = smov 32   ;;  %vm384_vm15 = vcmask 253952  }
  0x4d   : > { %975 = vrot.lane.b32.xlu1 %v909_v46, %s5545_s4  ;;  %971 = vrot.lane.b32.xlu0 %v907_v47, %s5545_s4  ;;  %v910_v48 = vld [vmem:[#allocation2 + $0x20] sm:$0xf]  ;;  %v908_v49 = vld [vmem:[#allocation2 + $0xc] sm:$0xf]  ;;  %vm1148_vm13 = vsmask.f32 3328 }
  0x4e   : > { %v2257_v50 = vld [vmem:[#allocation2 + $0x1c] sm:$0xf]  ;;  %v912_v51 = vld [vmem:[#allocation2 + $0x34] sm:$0xf]  ;;  %v911_v52 = vld [vmem:[#allocation2 + $0x30] sm:$0xf] }
  0x4f   : > { %vm1149_vm14 = vsmask.f32 7440  ;;  %v2258_v53 = vld [vmem:[#allocation2 + $0x20] sm:$0xf]  ;;  %v2306_v54 = vshrl.u32 %v2257_v50, 16  ;;  %v2309_v55 = vshll.u32 %v2257_v50, 16 }
  0x50   : > { %v2315_v56 = vshll.u32 %v2258_v53, 16  ;;  %v2319_v57 = vshrl.u32 %v2258_v53, 16  ;;  %v1100_v58 = vld [vmem:[#allocation2 + $0x8] sm:$0xf]  ;;  %v1101_v59 = vld [vmem:[#allocation2 + $0xc] sm:$0xf]  ;;  %vm5708_vm3 = vmor %vm1148_vm13, %vm1149_vm14 }
  0x51   : > { %977 = vrot.lane.b32.xlu1 %v910_v48, %s5545_s4  ;;  %973 = vrot.lane.b32.xlu0 %v908_v49, %s5545_s4  ;;  %v2308_v60 = vrot.slane %v2306_v54, 4  ;;  %v2311_v61 = vrot.slane %v2309_v55, 5  ;;  %v1152_v62 = vshrl.u32 %v1100_v58, 16  ;;  %v1155_v63 = vshll.u32 %v1100_v58, 16  ;;  %v390_v0 = vld [vmem:[#allocation2 + $0x24] sm:$0x1] }
  0x52   : > { %v1161_v1 = vshll.u32 %v1101_v59, 16  ;;  %v1165_v2 = vshrl.u32 %v1101_v59, 16  ;;  %v387_v3 = vld [vmem:[#allocation2 + $0x10] sm:$0x1]  ;;  %v914_v4 = vld [vmem:[#allocation2 + $0x48] sm:$0xf] }
  0x53   : > { %v913_v5 = vld [vmem:[#allocation2 + $0x44] sm:$0xf]  ;;  %v2312_v6 = vor.u32 %v2311_v61, %v2308_v60  ;;  %v1154_v7 = vrot.slane %v1152_v62, 4  ;;  %v1157_v8 = vrot.slane %v1155_v63, 5  ;;  %vm385_vm1 = vsmask.f32 256 }
  0x54   : > { %v2317_v9 = vrot.slane %v2315_v56, 5  ;;  %v5690_v10 = vrot.slane %v1161_v1, 5  ;;  %vm5693_vm2 = vmand %vm384_vm15, %vm385_vm1  ;;  %v2321_v12 = vrot.slane %v2319_v57, 4  ;;  %v1167_v13 = vrot.slane %v1165_v2, 4  ;;  %v336_v14 = vld [vmem:[#allocation2 + $0x2c] sm:$0x8] }
  0x55   : > { %981 = vrot.lane.b32.xlu1 %v912_v51, %s5545_s4  ;;  %979 = vrot.lane.b32.xlu0 %v911_v52, %s5545_s4  ;;  %v2313_v15 = vrot.slane %v2312_v6, 4  ;;  %v1158_v16 = vor.u32 %v1157_v8, %v1154_v7  ;;  %v391_v17 = vsel %vm5693_vm2, 0, %v390_v0  ;;  %v388_v18 = vsel %vm5693_vm2, 0, %v387_v3  ;;  %v5701_v19 = vld [vmem:[#allocation2 + $0x30] sm:$0xf]  ;;  %v5450_v20 = vld [vmem:[%s8354_s1 + $0x78] sm:$0xff]  }
  0x56   : > { %392 = vst [vmem:[#allocation2 + $0x24] sm:$0x1] %v391_v17  ;;  %389 = vst [vmem:[#allocation2 + $0x10] sm:$0x1] %v388_v18  ;;  %vm327_vm4 = vcmask 257027   ;;  %v5451_v23 = vld [vmem:[%s8354_s1 + $0x38] sm:$0xff]   ;;  %5239 = vmatprep.subr.bf16.mxu0 %v5450_v20  ;;  %5405 = vmatprep.subr.bf16.mxu1 %v5450_v20  ;;  %v2322_v36 = vor.u32 %v2321_v12, %v2317_v9  ;;  %v1168_v37 = vor.u32 %v1167_v13, %v5690_v10 }
  0x57   : > { %vm328_vm5 = vsmask.f32 7950  ;;  %v2820_v22 = vld [vmem:[#allocation2 + $0x34] sm:$0xf]  ;;  %v333_v25 = vld [vmem:[#allocation2 + $0x18] sm:$0x8]  ;;  %v2318_v31 = vsel %vm5708_vm3, %v2313_v15, %v2317_v9  ;;  %5240 = vmatpush3.bf16.msra.mxu0 %v5451_v23  ;;  %5413 = vmatpush3.bf16.msra.mxu1 %v5451_v23 }
  0x58   : > { %vm5715_vm6 = vmand %vm327_vm4, %vm328_vm5  ;;  %v5452_v26 = vld [vmem:[%s8354_s1 + $0x70] sm:$0xff]   ;;  %v2872_v28 = vshrl.u32 %v5701_v19, 16  ;;  %v2881_v29 = vshrl.u32 %v2820_v22, 16  ;;  %v1665_v30 = vld [vmem:[#allocation2 + $0x1c] sm:$0xf]  ;;  %v1159_v33 = vrot.slane %v1158_v16, 4 }
  0x59   : > { %985 = vrot.lane.b32.xlu1 %v914_v4, %s5545_s4  ;;  %983 = vrot.lane.b32.xlu0 %v913_v5, %s5545_s4  ;;  %v337_v27 = vsel %vm5715_vm6, 0, %v336_v14  ;;  %v915_v32 = vld [vmem:[#allocation2 + $0x58] sm:$0xf]  ;;  %v334_v34 = vsel %vm5715_vm6, 0, %v333_v25  ;;  %v5453_v35 = vld [vmem:[%s8354_s1 + $0x30] sm:$0xff]   ;;  %v1718_v38 = vshrl.u32 %v1665_v30, 16 }
  0x5a   : > { %338 = vst [vmem:[#allocation2 + $0x2c] sm:$0x8] %v337_v27  ;;  %335 = vst [vmem:[#allocation2 + $0x18] sm:$0x8] %v334_v34  ;;  %5241 = vmatprep.subr.bf16.mxu0 %v5452_v26  ;;  %5406 = vmatprep.subr.bf16.mxu1 %v5452_v26  ;;  %vm489_vm7 = vsmask.f32 4368  ;;  %v1164_v44 = vsel %vm5708_vm3, %v1159_v33, %v5690_v10 }
  0x5b   : > { %v5737_v39 = vrot.slane %v2872_v28, 7  ;;  %v2875_v40 = vshll.u32 %v5701_v19, 16  ;;  %v2883_v41 = vrot.slane %v2881_v29, 7  ;;  %v2884_v42 = vshll.u32 %v2820_v22, 16  ;;  %v5740_v43 = vld [vmem:[#allocation2 + $0x20] sm:$0xf]  ;;  %5242 = vmatpush3.bf16.msra.mxu0 %v5453_v35  ;;  %5414 = vmatpush3.bf16.msra.mxu1 %v5453_v35  ;;  %vm5760_vm8 = vmor %vm385_vm1, %vm489_vm7 }
  0x5c   : > { %v5745_v47 = vrot.slane %v1718_v38, 7  ;;  %v1721_v48 = vshll.u32 %v1665_v30, 16  ;;  %v2323_v49 = vrot.slane %v2322_v36, 4  ;;  %v1169_v51 = vrot.slane %v1168_v37, 4  ;;  %v2293_v54 = vld [vmem:[#allocation2 + $0x10c] sm:$0xf] }
  0x5d   : > { %2689 = vrot.lane.b32.xlu1 %v2318_v31, %s5545_s4  ;;  %987 = vrot.lane.b32.xlu0 %v915_v32, %s5545_s4  ;;  %v2259_v45 = vld [vmem:[#allocation2 + $0x24] sm:$0x1]  ;;  %v1102_v46 = vld [vmem:[#allocation2 + $0x10] sm:$0x1]  ;;  %v1727_v53 = vshrl.u32 %v5740_v43, 16  ;;  %v5454_v56 = vld [vmem:[%s8354_s1 + $0x68] sm:$0xff]   ;;  %v2877_v60 = vor.u32 %v2875_v40, %v5737_v39  ;;  %v2886_v0 = vor.u32 %v2884_v42, %v2883_v41 }
  0x5e   : > { %v2325_v50 = vshll.u32 %v2259_v45, 16  ;;  %v1171_v52 = vshll.u32 %v1102_v46, 16  ;;  %v2294_v55 = vld [vmem:[#allocation2 + $0x110] sm:$0xf]  ;;  %s5546_s18 = smov 64   ;;  %v2879_v63 = vrot.slane %v5737_v39, 4  ;;  %v1723_v2 = vor.u32 %v1721_v48, %v5745_v47  ;;  %5243 = vmatprep.subr.bf16.mxu0 %v5454_v56  ;;  %5407 = vmatprep.subr.bf16.mxu1 %v5454_v56 }
  0x5f   : > { %v426_v61 = vld [vmem:[#allocation2 + $0x114] sm:$0x1]  ;;  %v5455_v3 = vld [vmem:[%s8354_s1 + $0x28] sm:$0xff]   ;;  %v2594_v7 = vshrl.u32 %v2293_v54, 16  ;;  %v2597_v8 = vshll.u32 %v2293_v54, 16  ;;  %v2603_v12 = vshll.u32 %v2294_v55, 16 }
  0x60   : > { %v2327_v57 = vrot.slane %v2325_v50, 5  ;;  %v1173_v58 = vrot.slane %v1171_v52, 5  ;;  %v1136_v9 = vld [vmem:[#allocation2 + $0xf8] sm:$0xf]  ;;  %v2607_v13 = vshrl.u32 %v2294_v55, 16  ;;  %v427_v14 = vsel %vm5693_vm2, 0, %v426_v61  ;;  %5244 = vmatpush3.bf16.msra.mxu0 %v5455_v3  ;;  %5415 = vmatpush3.bf16.msra.mxu1 %v5455_v3 }
  0x61   : > { %1535 = vrot.lane.b32.xlu1 %v1164_v44, %s5546_s18  ;;  %v2818_v59 = vld [vmem:[#allocation2 + $0x2c] sm:$0x8]  ;;  %v1664_v1 = vld [vmem:[#allocation2 + $0x18] sm:$0x8]  ;;  %v5456_v15 = vld [vmem:[%s8354_s1 + $0x60] sm:$0xff]   ;;  %v1729_v18 = vrot.slane %v1727_v53, 7  ;;  %v2887_v28 = vsel %vm5760_vm8, %v2879_v63, %v2886_v0 }
  0x62   : > { %v2867_v62 = vshrl.u32 %v2818_v59, 16  ;;  %v2328_v5 = vsel %vm5708_vm3, %v2323_v49, %v2327_v57  ;;  %v1713_v6 = vshrl.u32 %v1664_v1, 16  ;;  %v1174_v16 = vsel %vm5708_vm3, %v1169_v51, %v1173_v58  ;;  %428 = vst [vmem:[#allocation2 + $0x114] sm:$0x1] %v427_v14  ;;  %v423_v20 = vld [vmem:[#allocation2 + $0x100] sm:$0x1]  ;;  %5245 = vmatprep.subr.bf16.mxu0 %v5456_v15  ;;  %5408 = vmatprep.subr.bf16.mxu1 %v5456_v15 }
  0x63   : > { %2691 = vrot.lane.b32.xlu0 %v2328_v5, %s5545_s4  ;;  %v1730_v19 = vshll.u32 %v5740_v43, 16  ;;  %v1137_v23 = vld [vmem:[#allocation2 + $0xfc] sm:$0xf]  ;;  %v1440_v25 = vshrl.u32 %v1136_v9, 16  ;;  %v1443_v26 = vshll.u32 %v1136_v9, 16  ;;  %v1725_v29 = vrot.slane %v5745_v47, 4 }
  0x64   : > { %v5134_v10 = vrot.slane %v2867_v62, 11  ;;  %v5118_v17 = vrot.slane %v1713_v6, 11  ;;  %v372_v27 = vld [vmem:[#allocation2 + $0x11c] sm:$0x8]  ;;  %v2596_v30 = vrot.slane %v2594_v7, 4  ;;  %v2599_v31 = vrot.slane %v2597_v8, 5 }
  0x65   : > { %v369_v32 = vld [vmem:[#allocation2 + $0x108] sm:$0x8]  ;;  %v5457_v33 = vld [vmem:[%s8354_s1 + $0x20] sm:$0xff]   ;;  %v5787_v35 = vrot.slane %v2603_v12, 5  ;;  %v2609_v36 = vrot.slane %v2607_v13, 4  ;;  %v424_v37 = vsel %vm5693_vm2, 0, %v423_v20  ;;  %v1732_v39 = vor.u32 %v1730_v19, %v1729_v18 }
  0x66   : > { %v2878_v22 = vsel %vm5760_vm8, %v5134_v10, %v2877_v60  ;;  %v1724_v34 = vsel %vm5760_vm8, %v5118_v17, %v1723_v2  ;;  %v5458_v38 = vld [vmem:[%s8354_s1 + $0x58] sm:$0xff]   ;;  %v1449_v40 = vshll.u32 %v1137_v23, 16  ;;  %v1453_v41 = vshrl.u32 %v1137_v23, 16  ;;  %425 = vst [vmem:[#allocation2 + $0x100] sm:$0x1] %v424_v37  ;;  %5246 = vmatpush3.bf16.msra.mxu0 %v5457_v33  ;;  %5416 = vmatpush3.bf16.msra.mxu1 %v5457_v33  ;;  %v5460_v47 = vld [vmem:[%s8354_s1 + $0x50] sm:$0xff]  }
  0x67   : > { %3218 = vrot.lane.b32.xlu1 %v2878_v22, %s5546_s18  ;;  %1537 = vrot.lane.b32.xlu0 %v1174_v16, %s5546_s18  ;;  %v373_v42 = vsel %vm5715_vm6, 0, %v372_v27  ;;  %v5459_v43 = vld [vmem:[%s8354_s1 + $0x18] sm:$0xff]   ;;  %v1442_v44 = vrot.slane %v1440_v25, 4  ;;  %v1445_v45 = vrot.slane %v1443_v26, 5  ;;  %v370_v46 = vsel %vm5715_vm6, 0, %v369_v32  ;;  %s5547_s6 = smov 96  }
  0x68   : > { %374 = vst [vmem:[#allocation2 + $0x11c] sm:$0x8] %v373_v42  ;;  %5247 = vmatprep.subr.bf16.mxu0 %v5458_v38  ;;  %5409 = vmatprep.subr.bf16.mxu1 %v5458_v38  ;;  %v2600_v48 = vor.u32 %v2599_v31, %v2596_v30  ;;  %v5805_v49 = vld [vmem:[#allocation2 + $0x120] sm:$0xf]  ;;  %371 = vst [vmem:[#allocation2 + $0x108] sm:$0x8] %v370_v46  ;;  %v2610_v51 = vor.u32 %v2609_v36, %v5787_v35 }
  0x69   : > { %v3346_v50 = vld [vmem:[#allocation2 + $0x30] sm:$0xf]  ;;  %v1733_v52 = vsel %vm5760_vm8, %v1725_v29, %v1732_v39  ;;  %v5811_v53 = vrot.slane %v1449_v40, 5  ;;  %v1455_v54 = vrot.slane %v1453_v41, 4  ;;  %v2295_v55 = vld [vmem:[#allocation2 + $0x114] sm:$0x1]  ;;  %v1446_v56 = vor.u32 %v1445_v45, %v1442_v44 }
  0x6a   : > { %5248 = vmatpush3.bf16.msra.mxu0 %v5459_v43  ;;  %5417 = vmatpush3.bf16.msra.mxu1 %v5459_v43  ;;  %v3136_v57 = vshrl.u32 %v5805_v49, 16  ;;  %v5814_v58 = vld [vmem:[#allocation2 + $0x124] sm:$0xf]  ;;  %v5461_v59 = vld [vmem:[%s8354_s1 + $0x10] sm:$0xff]   ;;  %v931_v61 = vld [vmem:[#allocation2 + $0xf8] sm:$0xf] }
  0x6b   : > { %2064 = vrot.lane.b32.xlu1 %v1724_v34, %s5547_s6  ;;  %3220 = vrot.lane.b32.xlu0 %v2887_v28, %s5546_s18  ;;  %v3347_v60 = vld [vmem:[#allocation2 + $0x34] sm:$0xf]  ;;  %v2601_v62 = vrot.slane %v2600_v48, 4  ;;  %v393_v63 = vld [vmem:[#allocation2 + $0x38] sm:$0x1]  ;;  %v5821_v0 = vrot.slane %v2610_v51, 4  ;;  %v1456_v6 = vor.u32 %v1455_v54, %v5811_v53 }
  0x6c   : > { %5249 = vmatprep.subr.bf16.mxu0 %v5460_v47  ;;  %5410 = vmatprep.subr.bf16.mxu1 %v5460_v47  ;;  %v5823_v1 = vld [vmem:[#allocation2 + $0x10c] sm:$0xf]  ;;  %v2260_v2 = vld [vmem:[#allocation2 + $0x30] sm:$0xf]  ;;  %v2613_v5 = vshll.u32 %v2295_v55, 16  ;;  %v3139_v8 = vshll.u32 %v5805_v49, 16 }
  0x6d   : > { %v5462_v3 = vld [vmem:[%s8354_s1 + $0x48] sm:$0xff]   ;;  %v3145_v9 = vshrl.u32 %v5814_v58, 16  ;;  %v1447_v12 = vrot.slane %v1446_v56, 4  ;;  %v1138_v13 = vld [vmem:[#allocation2 + $0x100] sm:$0x1]  ;;  %v5834_v14 = vrot.slane %v3136_v57, 7  ;;  %v2606_v25 = vsel %vm5708_vm3, %v2601_v62, %v5787_v35 }
  0x6e   : > { %5250 = vmatpush3.bf16.msra.mxu0 %v5461_v59  ;;  %v5463_v10 = vld [vmem:[%s8354_s1 + $0x8] sm:$0xff]   ;;  %5418 = vmatpush3.bf16.msra.mxu1 %v5461_v59  ;;  %v394_v15 = vsel %vm5693_vm2, 0, %v393_v63  ;;  %v5464_v16 = vld [vmem:[%s8354_s1 + $0x40] sm:$0xff]   ;;  %v932_v17 = vld [vmem:[#allocation2 + $0xfc] sm:$0xf]  ;;  %v3148_v18 = vshll.u32 %v5814_v58, 16 }
  0x6f   : > { %3410 = vrot.lane.b32.xlu1 %v3346_v50, %s5547_s6  ;;  %2066 = vrot.lane.b32.xlu0 %v1733_v52, %s5547_s6  ;;  %v2854_v7 = vld [vmem:[#allocation2 + $0x11c] sm:$0x8]  ;;  %v1982_v19 = vshrl.u32 %v5823_v1, 16  ;;  %v2261_v20 = vld [vmem:[#allocation2 + $0x34] sm:$0xf]  ;;  %v2330_v22 = vshrl.u32 %v2260_v2, 16  ;;  %v1452_v36 = vsel %vm5708_vm3, %v1447_v12, %v5811_v53  ;;  %v3141_v35 = vor.u32 %v3139_v8, %v5834_v14 }
  0x70   : > { %5251 = vmatprep.subr.bf16.mxu0 %v5462_v3  ;;  %5411 = vmatprep.subr.bf16.mxu1 %v5462_v3  ;;  %v2333_v23 = vshll.u32 %v2260_v2, 16  ;;  %395 = vst [vmem:[#allocation2 + $0x38] sm:$0x1] %v394_v15  ;;  %v3131_v26 = vshrl.u32 %v2854_v7, 16  ;;  %v1700_v27 = vld [vmem:[#allocation2 + $0x108] sm:$0x8] }
  0x71   : > { %v1985_v28 = vshll.u32 %v5823_v1, 16  ;;  %v1103_v29 = vld [vmem:[#allocation2 + $0x1c] sm:$0xf]  ;;  %v2615_v30 = vrot.slane %v2613_v5, 5  ;;  %v1457_v31 = vrot.slane %v1456_v6, 4  ;;  %v1459_v32 = vshll.u32 %v1138_v13, 16 }
  0x72   : > { %v339_v33 = vld [vmem:[#allocation2 + $0x40] sm:$0x8]  ;;  %5252 = vmatpush3.bf16.msra.mxu0 %v5463_v10  ;;  %5419 = vmatpush3.bf16.msra.mxu1 %v5463_v10  ;;  %v1702_v37 = vld [vmem:[#allocation2 + $0x110] sm:$0xf]  ;;  %v2339_v38 = vshll.u32 %v2261_v20, 16  ;;  %v2343_v39 = vshrl.u32 %v2261_v20, 16 }
  0x73   : > { %1019 = vrot.lane.b32.xlu1 %v931_v61, %s5545_s4  ;;  %3412 = vrot.lane.b32.xlu0 %v3347_v60, %s5547_s6  ;;  %v5465_v34 = vld [vmem:[%s8354_s1] sm:$0xff]   ;;  %v1977_v40 = vshrl.u32 %v1700_v27, 16  ;;  %v5857_v41 = vrot.slane %v1982_v19, 7  ;;  %v2332_v42 = vrot.slane %v2330_v22, 4  ;;  %v2335_v43 = vrot.slane %v2333_v23, 5 }
  0x74   : > { %5253 = vmatprep.subr.bf16.mxu0 %v5464_v16  ;;  %5412 = vmatprep.subr.bf16.mxu1 %v5464_v16  ;;  %v5146_v44 = vrot.slane %v3131_v26, 11  ;;  %v1176_v45 = vshrl.u32 %v1103_v29, 16  ;;  %v1179_v46 = vshll.u32 %v1103_v29, 16  ;;  %v340_v47 = vsel %vm5715_vm6, 0, %v339_v33  ;;  %v1104_v57 = vld [vmem:[#allocation2 + $0x20] sm:$0xf] }
  0x75   : > { %v2616_v48 = vsel %vm5708_vm3, %v5821_v0, %v2615_v30  ;;  %v1461_v49 = vrot.slane %v1459_v32, 5  ;;  %v3147_v50 = vrot.slane %v3145_v9, 7  ;;  %v1991_v51 = vshrl.u32 %v1702_v37, 16  ;;  %341 = vst [vmem:[#allocation2 + $0x40] sm:$0x8] %v340_v47 }
  0x76   : > { %5254 = vmatpush3.bf16.msra.mxu0 %v5465_v34  ;;  %5420 = vmatpush3.bf16.msra.mxu1 %v5465_v34  ;;  %v5865_v52 = vrot.slane %v2339_v38, 5  ;;  %v2345_v53 = vrot.slane %v2343_v39, 4  ;;  %v1987_v54 = vor.u32 %v1985_v28, %v5857_v41  ;;  %v1994_v55 = vshll.u32 %v1702_v37, 16  ;;  %v1105_v2 = vld [vmem:[#allocation2 + $0x24] sm:$0x1] }
  0x77   : > { %2737 = vrot.lane.b32.xlu1 %v2606_v25, %s5545_s4  ;;  %1021 = vrot.lane.b32.xlu0 %v932_v17, %s5545_s4  ;;  %v2336_v56 = vor.u32 %v2335_v43, %v2332_v42  ;;  %v3142_v58 = vsel %vm5760_vm8, %v5146_v44, %v3141_v35  ;;  %v5130_v59 = vrot.slane %v1977_v40, 11  ;;  %v1178_v60 = vrot.slane %v1176_v45, 4  ;;  %v5876_v7 = vld [vmem:[#allocation2 + $0x44] sm:$0xf]  ;;  %v429_v8 = vld [vmem:[#allocation2 + $0x128] sm:$0x1] }
  0x78   : > { %v1181_v61 = vrot.slane %v1179_v46, 5  ;;  %v1462_v62 = vsel %vm5708_vm3, %v1457_v31, %v1461_v49  ;;  %v3143_v63 = vrot.slane %v5834_v14, 4  ;;  %v3150_v0 = vor.u32 %v3148_v18, %v3147_v50  ;;  %v2262_v13 = vld [vmem:[#allocation2 + $0x38] sm:$0x1]  ;;  %v5883_v16 = vld [vmem:[#allocation2 + $0x48] sm:$0xf] }
  0x79   : > { %v1993_v1 = vrot.slane %v1991_v51, 7  ;;  %v2346_v3 = vor.u32 %v2345_v53, %v5865_v52  ;;  %v1185_v5 = vshll.u32 %v1104_v57, 16  ;;  %v1189_v6 = vshrl.u32 %v1104_v57, 16  ;;  %v5888_v20 = vld [vmem:[#allocation2 + $0x2c] sm:$0x8] }
  0x7a   : > { %v1989_v9 = vrot.slane %v5857_v41, 4  ;;  %v1988_v10 = vsel %vm5760_vm8, %v5130_v59, %v1987_v54  ;;  %v2337_v12 = vrot.slane %v2336_v56, 4  ;;  %v1182_v14 = vor.u32 %v1181_v61, %v1178_v60  ;;  %v2296_v22 = vld [vmem:[#allocation2 + $0x120] sm:$0xf]  ;;  %v5897_v30 = vld [vmem:[#allocation2 + $0x30] sm:$0xf] }
  0x7b   : > { %1583 = vrot.lane.b32.xlu1 %v1452_v36, %s5546_s18  ;;  %2739 = vrot.lane.b32.xlu0 %v2616_v48, %s5545_s4  ;;  %v1195_v15 = vshll.u32 %v1105_v2, 16  ;;  %v3151_v17 = vsel %vm5760_vm8, %v3143_v63, %v3150_v0  ;;  %v1996_v18 = vor.u32 %v1994_v55, %v1993_v1  ;;  %v2894_v19 = vshrl.u32 %v5876_v7, 16  ;;  %v3370_v25 = vld [vmem:[#allocation2 + $0x120] sm:$0xf]  ;;  %v1139_v33 = vld [vmem:[#allocation2 + $0x10c] sm:$0xf] }
  0x7c   : > { %v430_v23 = vsel %vm5693_vm2, 0, %v429_v8  ;;  %v5892_v26 = vrot.slane %v2346_v3, 4  ;;  %v5894_v27 = vrot.slane %v1185_v5, 5  ;;  %v1191_v28 = vrot.slane %v1189_v6, 4  ;;  %v375_v34 = vld [vmem:[#allocation2 + $0x130] sm:$0x8] }
  0x7d   : > { %v2897_v29 = vshll.u32 %v5876_v7, 16  ;;  %431 = vst [vmem:[#allocation2 + $0x128] sm:$0x1] %v430_v23  ;;  %v2349_v31 = vshll.u32 %v2262_v13, 16  ;;  %v2903_v32 = vshrl.u32 %v5883_v16, 16  ;;  %v1183_v36 = vrot.slane %v1182_v14, 4 }
  0x7e   : > { %v5902_v35 = vrot.slane %v1195_v15, 5  ;;  %v2906_v37 = vshll.u32 %v5883_v16, 16  ;;  %v5905_v38 = vld [vmem:[#allocation2 + $0x34] sm:$0xf]  ;;  %v2618_v39 = vshrl.u32 %v2296_v22, 16  ;;  %v1997_v40 = vsel %vm5760_vm8, %v1989_v9, %v1996_v18 }
  0x7f   : > { %3266 = vrot.lane.b32.xlu1 %v3142_v58, %s5546_s18  ;;  %1585 = vrot.lane.b32.xlu0 %v1462_v62, %s5546_s18  ;;  %v2342_v41 = vsel %vm5708_vm3, %v2337_v12, %v5865_v52  ;;  %v2821_v42 = vld [vmem:[#allocation2 + $0x40] sm:$0x8]  ;;  %v5912_v43 = vrot.slane %v2894_v19, 7  ;;  %v2297_v44 = vld [vmem:[#allocation2 + $0x124] sm:$0xf]  ;;  %v2621_v45 = vshll.u32 %v2296_v22, 16  ;;  %v1192_v53 = vor.u32 %v1191_v28, %v5894_v27 }
  0x80   : > { %v1735_v46 = vshrl.u32 %v5888_v20, 16  ;;  %v1140_v47 = vld [vmem:[#allocation2 + $0x110] sm:$0xf]  ;;  %v1464_v48 = vshrl.u32 %v1139_v33, 16  ;;  %v1467_v49 = vshll.u32 %v1139_v33, 16  ;;  %v376_v50 = vsel %vm5715_vm6, 0, %v375_v34 }
  0x81   : > { %v2351_v51 = vrot.slane %v2349_v31, 5  ;;  %v2905_v54 = vrot.slane %v2903_v32, 7  ;;  %v1740_v52 = vshrl.u32 %v5897_v30, 16  ;;  %377 = vst [vmem:[#allocation2 + $0x130] sm:$0x8] %v376_v50  ;;  %v2889_v55 = vshrl.u32 %v2821_v42, 16 }
  0x82   : > { %v1749_v56 = vshrl.u32 %v5905_v38, 16  ;;  %v2620_v57 = vrot.slane %v2618_v39, 4  ;;  %v2627_v58 = vshll.u32 %v2297_v44, 16  ;;  %v3371_v59 = vld [vmem:[#allocation2 + $0x124] sm:$0xf]  ;;  %v2623_v60 = vrot.slane %v2621_v45, 5 }
  0x83   : > { %2112 = vrot.lane.b32.xlu1 %v1988_v10, %s5547_s6  ;;  %3268 = vrot.lane.b32.xlu0 %v3151_v17, %s5546_s18  ;;  %v2631_v61 = vshrl.u32 %v2297_v44, 16  ;;  %v1473_v62 = vshll.u32 %v1140_v47, 16  ;;  %v1477_v63 = vshrl.u32 %v1140_v47, 16  ;;  %v1188_v0 = vsel %vm5708_vm3, %v1183_v36, %v5894_v27  ;;  %v2858_v9 = vld [vmem:[#allocation2 + $0x134] sm:$0xf] }
  0x84   : > { %v2899_v1 = vor.u32 %v2897_v29, %v5912_v43  ;;  %v1466_v2 = vrot.slane %v1464_v48, 4  ;;  %v1469_v3 = vrot.slane %v1467_v49, 5  ;;  %v1193_v5 = vrot.slane %v1192_v53, 4  ;;  %v5935_v15 = vld [vmem:[#allocation2 + $0x138] sm:$0xf] }
  0x85   : > { %v1742_v6 = vrot.slane %v1740_v52, 7  ;;  %v1743_v7 = vshll.u32 %v5897_v30, 16  ;;  %v1752_v8 = vshll.u32 %v5905_v38, 16  ;;  %v2352_v10 = vsel %vm5708_vm3, %v5892_v26, %v2351_v51  ;;  %v396_v20 = vld [vmem:[#allocation2 + $0x4c] sm:$0x1] }
  0x86   : > { %v5135_v12 = vrot.slane %v2889_v55, 11  ;;  %v1751_v13 = vrot.slane %v1749_v56, 7  ;;  %v5933_v14 = vrot.slane %v2627_v58, 5  ;;  %v2624_v16 = vor.u32 %v2623_v60, %v2620_v57  ;;  %v1141_v27 = vld [vmem:[#allocation2 + $0x114] sm:$0x1] }
  0x87   : > { %3458 = vrot.lane.b32.xlu1 %v3370_v25, %s5547_s6  ;;  %2114 = vrot.lane.b32.xlu0 %v1997_v40, %s5547_s6  ;;  %v2633_v17 = vrot.slane %v2631_v61, 4  ;;  %v5937_v18 = vrot.slane %v1473_v62, 5  ;;  %v1479_v19 = vrot.slane %v1477_v63, 4  ;;  %v2901_v22 = vrot.slane %v5912_v43, 4  ;;  %v1703_v32 = vld [vmem:[#allocation2 + $0x11c] sm:$0x8] }
  0x88   : > { %v5119_v23 = vrot.slane %v1735_v46, 11  ;;  %v1470_v25 = vor.u32 %v1469_v3, %v1466_v2  ;;  %v3158_v28 = vshrl.u32 %v2858_v9, 16  ;;  %v1198_v26 = vsel %vm5708_vm3, %v1193_v5, %v5902_v35  ;;  %v2298_v38 = vld [vmem:[#allocation2 + $0x128] sm:$0x1]  ;;  %v5948_v39 = vld [vmem:[#allocation2 + $0x120] sm:$0xf] }
  0x89   : > { %v2908_v29 = vor.u32 %v2906_v37, %v2905_v54  ;;  %v1747_v30 = vrot.slane %v1742_v6, 4  ;;  %v3167_v31 = vshrl.u32 %v5935_v15, 16  ;;  %v2900_v33 = vsel %vm5760_vm8, %v5135_v12, %v2899_v1  ;;  %v342_v47 = vld [vmem:[#allocation2 + $0x54] sm:$0x8]  ;;  %v2263_v55 = vld [vmem:[#allocation2 + $0x44] sm:$0xf] }
  0x8a   : > { %v1745_v34 = vor.u32 %v1743_v7, %v1742_v6  ;;  %v1754_v36 = vor.u32 %v1752_v8, %v1751_v13  ;;  %v397_v40 = vsel %vm5693_vm2, 0, %v396_v20  ;;  %v2634_v35 = vor.u32 %v2633_v17, %v5933_v14  ;;  %v2264_v60 = vld [vmem:[#allocation2 + $0x48] sm:$0xf]  ;;  %v444_v62 = vld [vmem:[#allocation2 + $0x18] sm:$0x8] }
  0x8b   : > { %2693 = vrot.lane.b32.xlu1 %v2342_v41, %s5545_s4  ;;  %3460 = vrot.lane.b32.xlu0 %v3371_v59, %s5547_s6  ;;  %v5952_v41 = vrot.slane %v2624_v16, 4  ;;  %v1480_v37 = vor.u32 %v1479_v19, %v5937_v18  ;;  %v1483_v42 = vshll.u32 %v1141_v27, 16  ;;  %398 = vst [vmem:[#allocation2 + $0x4c] sm:$0x1] %v397_v40  ;;  %v5956_v43 = vrot.slane %v1470_v25, 4 }
  0x8c   : > { %v5958_v44 = vrot.slane %v3158_v28, 7  ;;  %v3161_v45 = vshll.u32 %v2858_v9, 16  ;;  %v3170_v46 = vshll.u32 %v5935_v15, 16  ;;  %v2637_v48 = vshll.u32 %v2298_v38, 16  ;;  %v5976_v59 = vld [vmem:[#allocation2 + $0x124] sm:$0xf] }
  0x8d   : > { %v3169_v49 = vrot.slane %v3167_v31, 7  ;;  %v1999_v50 = vshrl.u32 %v1703_v32, 16  ;;  %v2004_v51 = vshrl.u32 %v5948_v39, 16  ;;  %v2909_v53 = vsel %vm5760_vm8, %v2901_v22, %v2908_v29  ;;  %v3348_v63 = vld [vmem:[#allocation2 + $0x44] sm:$0xf] }
  0x8e   : > { %v1746_v54 = vsel %vm5760_vm8, %v5119_v23, %v1745_v34  ;;  %v1755_v52 = vsel %vm5760_vm8, %v1747_v30, %v1754_v36  ;;  %v5970_v56 = vrot.slane %v2634_v35, 4  ;;  %v5972_v57 = vrot.slane %v1480_v37, 4  ;;  %v445_v5 = vld [vmem:[#allocation2 + $0x1c] sm:$0xf]  ;;  %v330_v6 = vld [vmem:[#allocation2 + $0x4] sm:$0x8] }
  0x8f   : > { %1539 = vrot.lane.b32.xlu1 %v1188_v0, %s5546_s18  ;;  %2695 = vrot.lane.b32.xlu0 %v2352_v10, %s5545_s4  ;;  %v5974_v58 = vrot.slane %v1483_v42, 5  ;;  %v343_v61 = vsel %vm5715_vm6, 0, %v342_v47  ;;  %v2630_v0 = vsel %vm5708_vm3, %v5952_v41, %v5933_v14  ;;  %v1476_v1 = vsel %vm5708_vm3, %v5956_v43, %v5937_v18  ;;  %v2857_v8 = vld [vmem:[#allocation2 + $0x130] sm:$0x8]  ;;  %v442_v19 = vld [vmem:[#allocation2 + $0x8] sm:$0xf] }
  0x90   : > { %v5989_v2 = vor.u32 %v3161_v45, %v5958_v44  ;;  %v3165_v3 = vrot.slane %v5958_v44, 4  ;;  %344 = vst [vmem:[#allocation2 + $0x54] sm:$0x8] %v343_v61  ;;  %v5993_v7 = vrot.slane %v2637_v48, 5  ;;  %v5995_v9 = vor.u32 %v3170_v46, %v3169_v49  ;;  %v1106_v22 = vld [vmem:[#allocation2 + $0x30] sm:$0xf] }
  0x91   : > { %v5997_v10 = vrot.slane %v1999_v50, 11  ;;  %v5999_v12 = vrot.slane %v2004_v51, 7  ;;  %v2007_v13 = vshll.u32 %v5948_v39, 16  ;;  %v2354_v15 = vshrl.u32 %v2263_v55, 16  ;;  %v933_v31 = vld [vmem:[#allocation2 + $0x10c] sm:$0xf] }
  0x92   : > { %v2357_v16 = vshll.u32 %v2263_v55, 16  ;;  %v514_v17 = vshrl.u32 %v444_v62, 16  ;;  %v1486_v20 = vsel %vm5708_vm3, %v5972_v57, %v5974_v58  ;;  %v519_v23 = vshrl.u32 %v445_v5, 16  ;;  %v1107_v35 = vld [vmem:[#allocation2 + $0x34] sm:$0xf] }
  0x93   : > { %3222 = vrot.lane.b32.xlu1 %v2900_v33, %s5546_s18  ;;  %1541 = vrot.lane.b32.xlu0 %v1198_v26, %s5546_s18  ;;  %v522_v25 = vshll.u32 %v445_v5, 16  ;;  %v331_v27 = vsel %vm5715_vm6, 0, %v330_v6  ;;  %v3153_v28 = vshrl.u32 %v2857_v8, 16  ;;  %v2013_v26 = vshrl.u32 %v5976_v59, 16  ;;  %v3349_v42 = vld [vmem:[#allocation2 + $0x48] sm:$0xf] }
  0x94   : > { %v2016_v29 = vshll.u32 %v5976_v59, 16  ;;  %v2363_v30 = vshll.u32 %v2264_v60, 16  ;;  %332 = vst [vmem:[#allocation2 + $0x4] sm:$0x8] %v331_v27  ;;  %v2367_v32 = vshrl.u32 %v2264_v60, 16  ;;  %v5103_v33 = vrot.slane %v514_v17, 11 }
  0x95   : > { %v6012_v34 = vrot.slane %v519_v23, 7  ;;  %v497_v36 = vshrl.u32 %v442_v19, 16  ;;  %v6016_v38 = vor.u32 %v2007_v13, %v5999_v12  ;;  %v2356_v39 = vrot.slane %v2354_v15, 4  ;;  %v446_v49 = vld [vmem:[#allocation2 + $0x20] sm:$0xf] }
  0x96   : > { %v2359_v40 = vrot.slane %v2357_v16, 5  ;;  %v1200_v37 = vshrl.u32 %v1106_v22, 16  ;;  %v2640_v45 = vsel %vm5708_vm3, %v5970_v56, %v5993_v7  ;;  %v2011_v46 = vrot.slane %v5999_v12, 4  ;;  %v934_v55 = vld [vmem:[#allocation2 + $0x110] sm:$0xf] }
  0x97   : > { %2068 = vrot.lane.b32.xlu1 %v1746_v54, %s5547_s6  ;;  %3224 = vrot.lane.b32.xlu0 %v2909_v53, %s5546_s18  ;;  %v1203_v47 = vshll.u32 %v1106_v22, 16  ;;  %v524_v48 = vor.u32 %v522_v25, %v6012_v34  ;;  %v6024_v50 = vrot.slane %v3153_v28, 11  ;;  %v6026_v51 = vrot.slane %v2013_v26, 7  ;;  %v6035_v5 = vld [vmem:[#allocation2 + $0x30] sm:$0xf] }
  0x98   : > { %v499_v53 = vrot.slane %v497_v36, 7  ;;  %v500_v54 = vshll.u32 %v442_v19, 16  ;;  %v6029_v60 = vrot.slane %v2363_v30, 5  ;;  %v6031_v61 = vrot.slane %v2367_v32, 4  ;;  %v6044_v15 = vld [vmem:[#allocation2 + $0x38] sm:$0x1] }
  0x99   : > { %v1209_v62 = vshll.u32 %v1107_v35, 16  ;;  %v2010_v6 = vsel %vm5760_vm8, %v5997_v10, %v6016_v38  ;;  %v2360_v8 = vor.u32 %v2359_v40, %v2356_v39  ;;  %v6042_v13 = vrot.slane %v1200_v37, 4  ;;  %v449_v17 = vld [vmem:[#allocation2 + $0x34] sm:$0xf]  ;;  %v2193_v32 = vld [vmem:[#allocation2 + $0x1c] sm:$0xf] }
  0x9a   : > { %v528_v16 = vshrl.u32 %v446_v49, 16  ;;  %v6047_v19 = vrot.slane %v1203_v47, 5  ;;  %v531_v23 = vshll.u32 %v446_v49, 16  ;;  %v3164_v28 = vsel %vm5760_vm8, %v6024_v50, %v5989_v2  ;;  %v447_v37 = vld [vmem:[#allocation2 + $0x2c] sm:$0x8] }
  0x9b   : > { %3414 = vrot.lane.b32.xlu1 %v3348_v63, %s5547_s6  ;;  %2070 = vrot.lane.b32.xlu0 %v1755_v52, %s5547_s6  ;;  %v443_v52 = vld [vmem:[#allocation2 + $0xc] sm:$0xf]  ;;  %v525_v63 = vsel %vm5760_vm8, %v5103_v33, %v524_v48  ;;  %v441_v22 = vld [vmem:[#allocation2 + $0x4] sm:$0x8]  ;;  %v1213_v26 = vshrl.u32 %v1107_v35, 16  ;;  %v526_v33 = vrot.slane %v6012_v34, 4 }
  0x9c   : > { %877 = vst.msk [vmem:[#allocation3 + $0x18] sm:$0xf] %vm232_vm0, %v525_v63  ;;  %v506_v25 = vshrl.u32 %v443_v52, 16  ;;  %v509_v27 = vshll.u32 %v443_v52, 16  ;;  %v492_v30 = vshrl.u32 %v441_v22, 16  ;;  %v530_v36 = vrot.slane %v528_v16, 7 }
  0x9d   : > { %v504_v39 = vrot.slane %v499_v53, 4  ;;  %2225 = vst.msk [vmem:[#allocation3 + $0x4] sm:$0xf] %vm232_vm0, %v2193_v32  ;;  %v6062_v2 = vrot.slane %v2360_v8, 4  ;;  %v6064_v35 = vrot.slane %v1209_v62, 5  ;;  %v541_v47 = vshrl.u32 %v6035_v5, 16 }
  0x9e   : > { %v508_v40 = vrot.slane %v506_v25, 7  ;;  %v451_v48 = vld [vmem:[#allocation2 + $0x44] sm:$0xf]  ;;  %v1219_v14 = vshll.u32 %v6044_v15, 16  ;;  %v533_v41 = vor.u32 %v531_v23, %v530_v36  ;;  %v550_v34 = vshrl.u32 %v449_v17, 16 }
  0x9f   : > { %1023 = vrot.lane.b32.xlu1 %v933_v31, %s5545_s4  ;;  %3416 = vrot.lane.b32.xlu0 %v3349_v42, %s5547_s6  ;;  %v502_v31 = vor.u32 %v500_v54, %v499_v53  ;;  %v5102_v42 = vrot.slane %v492_v30, 11  ;;  %v543_v50 = vrot.slane %v541_v47, 7  ;;  %v553_v53 = vshll.u32 %v449_v17, 16  ;;  %v452_v52 = vld [vmem:[#allocation2 + $0x48] sm:$0xf] }
  0xa0   : > { %v536_v54 = vshrl.u32 %v447_v37, 16  ;;  %v6078_v62 = vld [vmem:[#allocation2 + $0x58] sm:$0xf]  ;;  %v534_v63 = vsel %vm5760_vm8, %v526_v33, %v533_v41  ;;  %v552_v16 = vrot.slane %v550_v34, 7  ;;  %v450_v17 = vld [vmem:[#allocation2 + $0x40] sm:$0x8]  ;;  %v2018_v23 = vor.u32 %v2016_v29, %v6026_v51 }
  0xa1   : > { %v503_v49 = vsel %vm5760_vm8, %v5102_v42, %v502_v31  ;;  %878 = vst.msk [vmem:[#allocation3 + $0x24] sm:$0xf] %vm232_vm0, %v534_v63  ;;  %v548_v18 = vrot.slane %v543_v50, 4  ;;  %v563_v22 = vshrl.u32 %v451_v48, 16  ;;  %v453_v30 = vld [vmem:[#allocation2 + $0x54] sm:$0x8]  ;;  %v1206_v42 = vor.u32 %v6047_v19, %v6042_v13 }
  0xa2   : > { %875 = vst.msk [vmem:[#allocation3] sm:$0xf] %vm232_vm0, %v503_v49  ;;  %v5104_v43 = vrot.slane %v536_v54, 11  ;;  %v555_v25 = vor.u32 %v553_v53, %v552_v16  ;;  %v2194_v31 = vld [vmem:[#allocation2 + $0x20] sm:$0xf]  ;;  %v566_v32 = vshll.u32 %v451_v48, 16 }
  0xa3   : > { %2741 = vrot.lane.b32.xlu1 %v2630_v0, %s5545_s4  ;;  %1025 = vrot.lane.b32.xlu0 %v934_v55, %s5545_s4  ;;  %v511_v0 = vor.u32 %v509_v27, %v508_v40  ;;  %v6076_v55 = vrot.slane %v1213_v26, 4  ;;  %v572_v27 = vshrl.u32 %v452_v52, 16  ;;  %v575_v26 = vshll.u32 %v452_v52, 16  ;;  %2226 = vst.msk [vmem:[#allocation3 + $0x10] sm:$0xf] %vm232_vm0, %v2194_v31 }
  0xa4   : > { %v565_v7 = vrot.slane %v563_v22, 7  ;;  %v2916_v33 = vshrl.u32 %v6078_v62, 16  ;;  %v556_v59 = vsel %vm5760_vm8, %v548_v18, %v555_v25  ;;  %v454_v51 = vld [vmem:[#allocation2 + $0x58] sm:$0xf]  ;;  %v3173_v40 = vsel %vm5760_vm8, %v3165_v3, %v5995_v9  ;;  %v2265_v37 = vld [vmem:[#allocation2 + $0x4c] sm:$0x1] }
  0xa5   : > { %v512_v8 = vsel %vm5760_vm8, %v504_v39, %v511_v0  ;;  %v574_v29 = vrot.slane %v572_v27, 7  ;;  %880 = vst.msk [vmem:[#allocation3 + $0x3c] sm:$0xf] %vm232_vm0, %v556_v59  ;;  %v2299_v58 = vld [vmem:[#allocation2 + $0x134] sm:$0xf]  ;;  %v1216_v48 = vor.u32 %v6076_v55, %v6064_v35  ;;  %v580_v0 = vshrl.u32 %v453_v30, 16 }
  0xa6   : > { %876 = vst.msk [vmem:[#allocation3 + $0xc] sm:$0xf] %vm232_vm0, %v512_v8  ;;  %v568_v39 = vor.u32 %v566_v32, %v565_v7  ;;  %v3372_v47 = vld [vmem:[#allocation2 + $0x134] sm:$0xf]  ;;  %v2300_v44 = vld [vmem:[#allocation2 + $0x138] sm:$0xf]  ;;  %v2019_v3 = vsel %vm5760_vm8, %v2011_v46, %v2018_v23 }
  0xa7   : > { %1587 = vrot.lane.b32.xlu1 %v1476_v1, %s5546_s18  ;;  %2743 = vrot.lane.b32.xlu0 %v2640_v45, %s5545_s4  ;;  %v544_v1 = vshll.u32 %v6035_v5, 16  ;;  %v558_v45 = vshrl.u32 %v450_v17, 16  ;;  %v2370_v5 = vor.u32 %v6031_v61, %v6029_v60  ;;  %v570_v61 = vrot.slane %v565_v7, 4  ;;  %v6137_v13 = vld [vmem:[#allocation2 + $0x5c] sm:$0xf] }
  0xa8   : > { %v577_v57 = vor.u32 %v575_v26, %v574_v29  ;;  %v585_v34 = vshrl.u32 %v454_v51, 16  ;;  %v6139_v19 = vld [vmem:[#allocation2 + $0x44] sm:$0xf]  ;;  %v6147_v10 = vrot.slane %v1219_v14, 5  ;;  %v5106_v12 = vrot.slane %v580_v0, 11 }
  0xa9   : > { %v546_v56 = vor.u32 %v544_v1, %v543_v50  ;;  %v5105_v36 = vrot.slane %v558_v45, 11  ;;  %v6135_v9 = vrot.slane %v2370_v5, 4  ;;  %v588_v50 = vshll.u32 %v454_v51, 16  ;;  %v2824_v53 = vld [vmem:[#allocation2 + $0x54] sm:$0x8] }
  0xaa   : > { %v578_v49 = vsel %vm5760_vm8, %v570_v61, %v577_v57  ;;  %v6150_v38 = vrot.slane %v585_v34, 7  ;;  %v2919_v54 = vshll.u32 %v6078_v62, 16  ;;  %v2642_v52 = vshrl.u32 %v2299_v58, 16  ;;  %v1670_v14 = vld [vmem:[#allocation2 + $0x40] sm:$0x8] }
  0xab   : > { %3270 = vrot.lane.b32.xlu1 %v3164_v28, %s5546_s18  ;;  %1589 = vrot.lane.b32.xlu0 %v1486_v20, %s5546_s18  ;;  %v547_v28 = vsel %vm5760_vm8, %v5104_v43, %v546_v56  ;;  %v432_v20 = vld [vmem:[#allocation2 + $0x13c] sm:$0x1]  ;;  %v569_v41 = vsel %vm5760_vm8, %v5105_v36, %v568_v39  ;;  %882 = vst.msk [vmem:[#allocation3 + $0x54] sm:$0xf] %vm232_vm0, %v578_v49  ;;  %v2645_v55 = vshll.u32 %v2299_v58, 16  ;;  %v1207_v63 = vrot.slane %v1206_v42, 4 }
  0xac   : > { %879 = vst.msk [vmem:[#allocation3 + $0x30] sm:$0xf] %vm232_vm0, %v547_v28  ;;  %881 = vst.msk [vmem:[#allocation3 + $0x48] sm:$0xf] %vm232_vm0, %v569_v41  ;;  %v433_v46 = vsel %vm5693_vm2, 0, %v432_v20  ;;  %v6155_v8 = vrot.slane %v1216_v48, 4  ;;  %v590_v16 = vor.u32 %v588_v50, %v6150_v38  ;;  %v2366_v62 = vsel %vm5708_vm3, %v6062_v2, %v6029_v60 }
  0xad   : > { %434 = vst [vmem:[#allocation2 + $0x13c] sm:$0x1] %v433_v46  ;;  %v6157_v15 = vrot.slane %v2916_v33, 7  ;;  %v378_v17 = vld [vmem:[#allocation2 + $0x144] sm:$0x8]  ;;  %v2651_v43 = vshll.u32 %v2300_v44, 16  ;;  %v1212_v2 = vsel %vm5708_vm3, %v1207_v63, %v6064_v35 }
  0xae   : > { %v3373_v18 = vld [vmem:[#allocation2 + $0x138] sm:$0xf]  ;;  %v2655_v1 = vshrl.u32 %v2300_v44, 16  ;;  %v1142_v22 = vld [vmem:[#allocation2 + $0x120] sm:$0xf]  ;;  %v2911_v23 = vshrl.u32 %v2824_v53, 16  ;;  %v591_v30 = vsel %vm5760_vm8, %v5106_v12, %v590_v16 }
  0xaf   : > { %2116 = vrot.lane.b32.xlu1 %v2010_v6, %s5547_s6  ;;  %3272 = vrot.lane.b32.xlu0 %v3173_v40, %s5546_s18  ;;  %v2373_v6 = vshll.u32 %v2265_v37, 16  ;;  %v2925_v25 = vshrl.u32 %v6137_v13, 16  ;;  %v1762_v27 = vshrl.u32 %v6139_v19, 16  ;;  %v6168_v26 = vld [vmem:[#allocation2 + $0x48] sm:$0xf]  ;;  %vm1067_vm9 = vcmask 519424  }
  0xb0   : > { %v2644_v56 = vrot.slane %v2642_v52, 4  ;;  %v2647_v7 = vrot.slane %v2645_v55, 5  ;;  %883 = vst.msk [vmem:[#allocation3 + $0x60] sm:$0xf] %vm232_vm0, %v591_v30  ;;  %v379_v60 = vsel %vm5715_vm6, 0, %v378_v17  ;;  %v2921_v45 = vor.u32 %v2919_v54, %v6157_v15 }
  0xb1   : > { %v2375_v31 = vrot.slane %v2373_v6, 5  ;;  %v1143_v32 = vld [vmem:[#allocation2 + $0x124] sm:$0xf]  ;;  %v1488_v5 = vshrl.u32 %v1142_v22, 16  ;;  %v1491_v33 = vshll.u32 %v1142_v22, 16  ;;  %v2928_v59 = vshll.u32 %v6137_v13, 16 }
  0xb2   : > { %380 = vst [vmem:[#allocation2 + $0x144] sm:$0x8] %v379_v60  ;;  %v1757_v29 = vshrl.u32 %v1670_v14, 16  ;;  %v6181_v51 = vrot.slane %v2651_v43, 5  ;;  %v2657_v28 = vrot.slane %v2655_v1, 4  ;;  %v5136_v61 = vrot.slane %v2911_v23, 11 }
  0xb3   : > { %3462 = vrot.lane.b32.xlu1 %v3372_v47, %s5547_s6  ;;  %2118 = vrot.lane.b32.xlu0 %v2019_v3, %s5547_s6  ;;  %v2927_v36 = vrot.slane %v2925_v25, 7  ;;  %v6184_v39 = vrot.slane %v1762_v27, 7  ;;  %v1765_v35 = vshll.u32 %v6139_v19, 16  ;;  %v2376_v40 = vsel %vm5708_vm3, %v6135_v9, %v2375_v31  ;;  %v1144_v0 = vld [vmem:[#allocation2 + $0x128] sm:$0x1] }
  0xb4   : > { %v1771_v37 = vshrl.u32 %v6168_v26, 16  ;;  %v2648_v42 = vor.u32 %v2647_v7, %v2644_v56  ;;  %v1497_v57 = vshll.u32 %v1143_v32, 16  ;;  %v1490_v58 = vrot.slane %v1488_v5, 4  ;;  %v6202_v19 = vld [vmem:[#allocation2 + $0x148] sm:$0xf] }
  0xb5   : > { %v1493_v20 = vrot.slane %v1491_v33, 5  ;;  %v1222_v47 = vsel %vm5708_vm3, %v6155_v8, %v6147_v10  ;;  %v2923_v48 = vrot.slane %v6157_v15, 4  ;;  %v5120_v41 = vrot.slane %v1757_v29, 11  ;;  %v6210_v54 = vld [vmem:[#allocation2 + $0x14c] sm:$0xf] }
  0xb6   : > { %v2658_v44 = vor.u32 %v2657_v28, %v6181_v51  ;;  %v2922_v34 = vsel %vm5760_vm8, %v5136_v61, %v2921_v45  ;;  %v2930_v3 = vor.u32 %v2928_v59, %v2927_v36  ;;  %v1767_v9 = vor.u32 %v1765_v35, %v6184_v39  ;;  %v366_v15 = vld [vmem:[#allocation2 + $0xf4] sm:$0x8]  ;;  %v6223_v17 = vld [vmem:[#allocation2 + $0x58] sm:$0xf]  ;;  %v399_v56 = vld [vmem:[#allocation2 + $0x60] sm:$0x1] }
  0xb7   : > { %2697 = vrot.lane.b32.xlu1 %v2366_v62, %s5545_s4  ;;  %3464 = vrot.lane.b32.xlu0 %v3373_v18, %s5547_s6  ;;  %v1501_v13 = vshrl.u32 %v1143_v32, 16  ;;  %v1769_v49 = vrot.slane %v6184_v39, 4  ;;  %v1773_v50 = vrot.slane %v1771_v37, 7  ;;  %v1774_v10 = vshll.u32 %v6168_v26, 16  ;;  %v478_v62 = vld [vmem:[#allocation2 + $0xf8] sm:$0xf] }
  0xb8   : > { %v6206_v12 = vrot.slane %v2648_v42, 4  ;;  %v1494_v46 = vor.u32 %v1493_v20, %v1490_v58  ;;  %v6208_v6 = vrot.slane %v1497_v57, 5  ;;  %v1507_v53 = vshll.u32 %v1144_v0, 16  ;;  %v3350_v25 = vld [vmem:[#allocation2 + $0x58] sm:$0xf] }
  0xb9   : > { %v6213_v63 = vrot.slane %v2658_v44, 4  ;;  %v3180_v8 = vshrl.u32 %v6202_v19, 16  ;;  %v1768_v14 = vsel %vm5760_vm8, %v5120_v41, %v1767_v9  ;;  %v6221_v16 = vrot.slane %v1501_v13, 4  ;;  %v2267_v32 = vld [vmem:[#allocation2 + $0x5c] sm:$0xf] }
  0xba   : > { %v367_v18 = vsel %vm5715_vm6, 0, %v366_v15  ;;  %v2931_v43 = vsel %vm5760_vm8, %v2923_v48, %v2930_v3  ;;  %v1776_v1 = vor.u32 %v1774_v10, %v1773_v50  ;;  %v3183_v22 = vshll.u32 %v6202_v19, 16  ;;  %v1109_v33 = vld [vmem:[#allocation2 + $0x44] sm:$0xf]  ;;  %v1110_v39 = vld [vmem:[#allocation2 + $0x48] sm:$0xf] }
  0xbb   : > { %1543 = vrot.lane.b32.xlu1 %v1212_v2, %s5546_s18  ;;  %2699 = vrot.lane.b32.xlu0 %v2376_v40, %s5545_s4  ;;  %368 = vst [vmem:[#allocation2 + $0xf4] sm:$0x8] %v367_v18  ;;  %v761_v23 = vshrl.u32 %v478_v62, 16  ;;  %v6230_v27 = vrot.slane %v1494_v46, 4  ;;  %v6232_v26 = vrot.slane %v1507_v53, 5  ;;  %v3189_v30 = vshrl.u32 %v6210_v54, 16 }
  0xbc   : > { %v3192_v31 = vshll.u32 %v6210_v54, 16  ;;  %v6237_v2 = vld [vmem:[#allocation2 + $0x13c] sm:$0x1]  ;;  %v6239_v45 = vrot.slane %v3180_v8, 7  ;;  %v400_v5 = vsel %vm5693_vm2, 0, %v399_v56  ;;  %v2378_v59 = vshrl.u32 %v6223_v17, 16 }
  0xbd   : > { %v2381_v29 = vshll.u32 %v6223_v17, 16  ;;  %v6248_v28 = vrot.slane %v761_v23, 7  ;;  %v764_v61 = vshll.u32 %v478_v62, 16  ;;  %401 = vst [vmem:[#allocation2 + $0x60] sm:$0x1] %v400_v5  ;;  %v1777_v36 = vsel %vm5760_vm8, %v1769_v49, %v1776_v1 }
  0xbe   : > { %v479_v35 = vld [vmem:[#allocation2 + $0xfc] sm:$0xf]  ;;  %v935_v40 = vld [vmem:[#allocation2 + $0x120] sm:$0xf]  ;;  %v2387_v37 = vshll.u32 %v2267_v32, 16  ;;  %v2391_v42 = vshrl.u32 %v2267_v32, 16  ;;  %v2654_v44 = vsel %vm5708_vm3, %v6206_v12, %v6181_v51  ;;  %v1504_v0 = vor.u32 %v6221_v16, %v6208_v6 }
  0xbf   : > { %3226 = vrot.lane.b32.xlu1 %v2922_v34, %s5546_s18  ;;  %v976_v52 = vpop.permute.xlu1 %975  ;;  %v972_v55 = vpop.permute.xlu0 %971  ;;  %1545 = vrot.lane.b32.xlu0 %v1222_v47, %s5546_s18  ;;  %v1224_v57 = vshrl.u32 %v1109_v33, 16  ;;  %v1227_v58 = vshll.u32 %v1109_v33, 16  ;;  %v2217_v20 = vld [vmem:[#allocation2 + $0x10c] sm:$0xf]  ;;  %v3351_v41 = vld [vmem:[#allocation2 + $0x5c] sm:$0xf] }
  0xc0   : > { %1070 = vst.msk [vmem:[#allocation3 + $0x18] sm:$0xf] %vm1067_vm9, %v976_v52  ;;  %1068 = vst.msk [vmem:[#allocation3] sm:$0xf] %vm1067_vm9, %v972_v55  ;;  %v6259_v34 = vld [vmem:[#allocation2 + $0x144] sm:$0x8]  ;;  %v766_v55 = vor.u32 %v764_v61, %v6248_v28 }
  0xc1   : > { %v6261_v3 = vld [vmem:[#allocation2 + $0x134] sm:$0xf]  ;;  %v6263_v9 = vld [vmem:[#allocation2 + $0x138] sm:$0xf]  ;;  %v770_v13 = vshrl.u32 %v479_v35, 16  ;;  %v773_v49 = vshll.u32 %v479_v35, 16 }
  0xc2   : > { %2249 = vst.msk [vmem:[#allocation3 + $0x124] sm:$0xf] %vm232_vm0, %v2217_v20  ;;  %v2661_v51 = vshll.u32 %v6237_v2, 16  ;;  %v6270_v50 = vrot.slane %v2378_v59, 4  ;;  %v477_v10 = vld [vmem:[#allocation2 + $0xf4] sm:$0x8]  ;;  %v1500_v20 = vsel %vm5708_vm3, %v6230_v27, %v6208_v6 }
  0xc3   : > { %2072 = vrot.lane.b32.xlu1 %v1768_v14, %s5547_s6  ;;  %v978_v7 = vpop.permute.xlu1 %977  ;;  %v974_v60 = vpop.permute.xlu0 %973  ;;  %3228 = vrot.lane.b32.xlu0 %v2931_v43, %s5546_s18  ;;  %v1233_v12 = vshll.u32 %v1110_v39, 16  ;;  %v1237_v46 = vshrl.u32 %v1110_v39, 16  ;;  %vm1631_vm10 = vcmask 781824   ;;  %v1706_v53 = vld [vmem:[#allocation2 + $0x130] sm:$0x8]  ;;  %v756_v52 = vshrl.u32 %v477_v10, 16 }
  0xc4   : > { %1071 = vst.msk [vmem:[#allocation3 + $0x24] sm:$0xf] %vm1067_vm9, %v978_v7  ;;  %1069 = vst.msk [vmem:[#allocation3 + $0xc] sm:$0xf] %vm1067_vm9, %v974_v60  ;;  %v768_v8 = vrot.slane %v6248_v28, 4  ;;  %v772_v15 = vrot.slane %v770_v13, 7 }
  0xc5   : > { %v345_v14 = vld [vmem:[#allocation2 + $0x68] sm:$0x8]  ;;  %v2383_v16 = vrot.slane %v2381_v29, 5  ;;  %v6274_v17 = vrot.slane %v2387_v37, 5  ;;  %v2393_v18 = vrot.slane %v2391_v42, 4  ;;  %v1226_v56 = vrot.slane %v1224_v57, 4 }
  0xc6   : > { %v346_v62 = vsel %vm5715_vm6, 0, %v345_v14  ;;  %v936_v23 = vld [vmem:[#allocation2 + $0x124] sm:$0xf]  ;;  %v1229_v7 = vrot.slane %v1227_v58, 5  ;;  %v775_v60 = vor.u32 %v773_v49, %v772_v15  ;;  %v2663_v2 = vrot.slane %v2661_v51, 5 }
  0xc7   : > { %3418 = vrot.lane.b32.xlu1 %v3350_v25, %s5547_s6  ;;  %v982_v47 = vpop.permute.xlu1 %981  ;;  %v980_v48 = vpop.permute.xlu0 %979  ;;  %2074 = vrot.lane.b32.xlu0 %v1777_v36, %s5547_s6  ;;  %v5114_v25 = vrot.slane %v756_v52, 11  ;;  %347 = vst [vmem:[#allocation2 + $0x68] sm:$0x8] %v346_v62  ;;  %v3175_v32 = vshrl.u32 %v6259_v34, 16  ;;  %v2026_v5 = vshrl.u32 %v6261_v3, 16  ;;  %v2035_v33 = vshrl.u32 %v6263_v9, 16 }
  0xc8   : > { %1073 = vst.msk [vmem:[#allocation3 + $0x3c] sm:$0xf] %vm1067_vm9, %v982_v47  ;;  %1072 = vst.msk [vmem:[#allocation3 + $0x30] sm:$0xf] %vm1067_vm9, %v980_v48  ;;  %v2218_v59 = vld [vmem:[#allocation2 + $0x110] sm:$0xf]  ;;  %v776_v61 = vsel %vm5760_vm8, %v768_v8, %v775_v60  ;;  %v2384_v47 = vor.u32 %v2383_v16, %v6270_v50  ;;  %v1230_v48 = vor.u32 %v1229_v7, %v1226_v56 }
  0xc9   : > { %v767_v29 = vsel %vm5760_vm8, %v5114_v25, %v766_v55  ;;  %v6287_v28 = vrot.slane %v1233_v12, 5  ;;  %v1239_v36 = vrot.slane %v1237_v46, 4  ;;  %2250 = vst.msk [vmem:[#allocation3 + $0x130] sm:$0xf] %vm232_vm0, %v2218_v59  ;;  %v6292_v39 = vrot.slane %v1504_v0, 4 }
  0xca   : > { %v3191_v35 = vrot.slane %v3189_v30, 7  ;;  %v2029_v37 = vshll.u32 %v6261_v3, 16  ;;  %899 = vst.msk [vmem:[#allocation3 + $0x120] sm:$0xf] %vm232_vm0, %v767_v29  ;;  %900 = vst.msk [vmem:[#allocation3 + $0x12c] sm:$0xf] %vm232_vm0, %v776_v61  ;;  %v2394_v30 = vor.u32 %v2393_v18, %v6274_v17  ;;  %v2664_v6 = vsel %vm5708_vm3, %v6213_v63, %v2663_v2 }
  0xcb   : > { %1027 = vrot.lane.b32.xlu1 %v935_v40, %s5545_s4  ;;  %v986_v43 = vpop.permute.xlu1 %985  ;;  %v984_v1 = vpop.permute.xlu0 %983  ;;  %3420 = vrot.lane.b32.xlu0 %v3351_v41, %s5547_s6  ;;  %v2021_v40 = vshrl.u32 %v1706_v53, 16  ;;  %v1111_v42 = vld [vmem:[#allocation2 + $0x4c] sm:$0x1]  ;;  %v5148_v41 = vrot.slane %v3175_v32, 11  ;;  %v2028_v0 = vrot.slane %v2026_v5, 7  ;;  %v2038_v34 = vshll.u32 %v6263_v9, 16 }
  0xcc   : > { %1075 = vst.msk [vmem:[#allocation3 + $0x54] sm:$0xf] %vm1067_vm9, %v986_v43  ;;  %1074 = vst.msk [vmem:[#allocation3 + $0x48] sm:$0xf] %vm1067_vm9, %v984_v1  ;;  %v2037_v27 = vrot.slane %v2035_v33, 7  ;;  %v1240_v13 = vor.u32 %v1239_v36, %v6287_v28  ;;  %v1243_v49 = vshll.u32 %v1111_v42, 16  ;;  %v3194_v19 = vor.u32 %v3192_v31, %v3191_v35 }
  0xcd   : > { %v2268_v3 = vld [vmem:[#allocation2 + $0x60] sm:$0x1]  ;;  %v6317_v51 = vld [vmem:[#allocation2 + $0x6c] sm:$0xf]  ;;  %v3187_v50 = vrot.slane %v6239_v45, 4  ;;  %vm2160_vm11 = vcmask 1044224   ;;  %v2031_v31 = vor.u32 %v2029_v37, %v2028_v0  ;;  %v1510_v15 = vsel %vm5708_vm3, %v6292_v39, %v6232_v26 }
  0xce   : > { %v2033_v10 = vrot.slane %v2028_v0, 4  ;;  %v6323_v12 = vrot.slane %v2384_v47, 4  ;;  %v6325_v63 = vrot.slane %v2394_v30, 4  ;;  %v6327_v46 = vrot.slane %v1230_v48, 4  ;;  %v2302_v53 = vld [vmem:[#allocation2 + $0x148] sm:$0xf] }
  0xcf   : > { %2745 = vrot.lane.b32.xlu1 %v2654_v44, %s5545_s4  ;;  %v2690_v57 = vpop.permute.xlu1 %2689  ;;  %v988_v58 = vpop.permute.xlu0 %987  ;;  %1029 = vrot.lane.b32.xlu0 %v936_v23, %s5545_s4  ;;  %v3185_v44 = vor.u32 %v3183_v22, %v6239_v45  ;;  %v5132_v22 = vrot.slane %v2021_v40, 11  ;;  %v2397_v45 = vshll.u32 %v2268_v3, 16  ;;  %v2938_v52 = vshrl.u32 %v6317_v51, 16  ;;  %v2303_v55 = vld [vmem:[#allocation2 + $0x14c] sm:$0xf] }
  0xd0   : > { %2785 = vst.msk [vmem:[#allocation3 + $0x4] sm:$0xf] %vm1067_vm9, %v2690_v57  ;;  %1076 = vst.msk [vmem:[#allocation3 + $0x60] sm:$0xf] %vm1067_vm9, %v988_v58  ;;  %v2195_v8 = vld [vmem:[#allocation2 + $0x30] sm:$0xf]  ;;  %v2040_v14 = vor.u32 %v2038_v34, %v2037_v27  ;;  %v3195_v33 = vsel %vm5760_vm8, %v3187_v50, %v3194_v19  ;;  %v2390_v37 = vsel %vm5708_vm3, %v6323_v12, %v6274_v17 }
  0xd1   : > { %v3186_v54 = vsel %vm5760_vm8, %v5148_v41, %v3185_v44  ;;  %v6338_v16 = vrot.slane %v1240_v13, 4  ;;  %v6340_v18 = vrot.slane %v1243_v49, 5  ;;  %v6342_v62 = vld [vmem:[#allocation2 + $0x70] sm:$0xf]  ;;  %2227 = vst.msk [vmem:[#allocation3 + $0x1c] sm:$0xf] %vm232_vm0, %v2195_v8  ;;  %v2032_v59 = vsel %vm5760_vm8, %v5132_v22, %v2031_v31 }
  0xd2   : > { %v435_v43 = vld [vmem:[#allocation2 + $0x150] sm:$0x1]  ;;  %v1673_v23 = vld [vmem:[#allocation2 + $0x54] sm:$0x8]  ;;  %v6345_v25 = vld [vmem:[#allocation2 + $0x58] sm:$0xf]  ;;  %v2041_v40 = vsel %vm5760_vm8, %v2033_v10, %v2040_v14 }
  0xd3   : > { %1591 = vrot.lane.b32.xlu1 %v1500_v20, %s5546_s18  ;;  %v1536_v9 = vpop.permute.xlu1 %1535  ;;  %2747 = vrot.lane.b32.xlu0 %v2664_v6, %s5545_s4  ;;  %v2666_v56 = vshrl.u32 %v2302_v53, 16  ;;  %v2669_v7 = vshll.u32 %v2302_v53, 16  ;;  %v2941_v26 = vshll.u32 %v6317_v51, 16  ;;  %v2675_v60 = vshll.u32 %v2303_v55, 16  ;;  %v2196_v5 = vld [vmem:[#allocation2 + $0x34] sm:$0xf] }
  0xd4   : > { %1632 = vst.msk [vmem:[#allocation3] sm:$0xf] %vm1631_vm10, %v1536_v9  ;;  %v2679_v2 = vshrl.u32 %v2303_v55, 16  ;;  %v436_v32 = vsel %vm5693_vm2, 0, %v435_v43  ;;  %v6357_v29 = vrot.slane %v2397_v45, 5  ;;  %v6359_v61 = vrot.slane %v2938_v52, 7 }
  0xd5   : > { %v2692_v1 = vpop.permute.xlu0 %2691  ;;  %v6361_v36 = vld [vmem:[#allocation2 + $0x5c] sm:$0xf]  ;;  %437 = vst [vmem:[#allocation2 + $0x150] sm:$0x1] %v436_v32  ;;  %2228 = vst.msk [vmem:[#allocation3 + $0x28] sm:$0xf] %vm232_vm0, %v2196_v5 }
  0xd6   : > { %2786 = vst.msk [vmem:[#allocation3 + $0x10] sm:$0xf] %vm1067_vm9, %v2692_v1  ;;  %v381_v39 = vld [vmem:[#allocation2 + $0x158] sm:$0x8]  ;;  %v2827_v42 = vld [vmem:[#allocation2 + $0x68] sm:$0x8]  ;;  %v6383_v50 = vor.u32 %v2941_v26, %v6359_v61 }
  0xd7   : > { %3274 = vrot.lane.b32.xlu1 %v3186_v54, %s5546_s18  ;;  %1593 = vrot.lane.b32.xlu0 %v1510_v15, %s5546_s18  ;;  %v2947_v57 = vshrl.u32 %v6342_v62, 16  ;;  %v1779_v58 = vshrl.u32 %v1673_v23, 16  ;;  %v1145_v20 = vld [vmem:[#allocation2 + $0x134] sm:$0xf]  ;;  %v1784_v30 = vshrl.u32 %v6345_v25, 16  ;;  %v2668_v48 = vrot.slane %v2666_v56, 4 }
  0xd8   : > { %v2671_v41 = vrot.slane %v2669_v7, 5  ;;  %v1146_v44 = vld [vmem:[#allocation2 + $0x138] sm:$0xf]  ;;  %v382_v0 = vsel %vm5715_vm6, 0, %v381_v39  ;;  %v2950_v34 = vshll.u32 %v6342_v62, 16  ;;  %v1793_v6 = vshrl.u32 %v6361_v36, 16 }
  0xd9   : > { %v3219_v35 = vpop.permute.xlu1 %3218  ;;  %v1538_v47 = vpop.permute.xlu0 %1537  ;;  %v6379_v27 = vrot.slane %v2675_v60, 5  ;;  %v2681_v3 = vrot.slane %v2679_v2, 4  ;;  %v1147_v13 = vld [vmem:[#allocation2 + $0x13c] sm:$0x1]  ;;  %383 = vst [vmem:[#allocation2 + $0x158] sm:$0x8] %v382_v0 }
  0xda   : > { %3314 = vst.msk [vmem:[#allocation3 + $0x4] sm:$0xf] %vm1631_vm10, %v3219_v35  ;;  %1633 = vst.msk [vmem:[#allocation3 + $0xc] sm:$0xf] %vm1631_vm10, %v1538_v47  ;;  %v3374_v49 = vld [vmem:[#allocation2 + $0x148] sm:$0xf]  ;;  %v2672_v8 = vor.u32 %v2671_v41, %v2668_v48 }
  0xdb   : > { %2120 = vrot.lane.b32.xlu1 %v2032_v59, %s5547_s6  ;;  %3276 = vrot.lane.b32.xlu0 %v3195_v33, %s5546_s18  ;;  %v2933_v51 = vshrl.u32 %v2827_v42, 16  ;;  %v1512_v19 = vshrl.u32 %v1145_v20, 16  ;;  %v1515_v22 = vshll.u32 %v1145_v20, 16  ;;  %v2945_v10 = vrot.slane %v6359_v61, 4  ;;  %v3375_v14 = vld [vmem:[#allocation2 + $0x14c] sm:$0xf] }
  0xdc   : > { %v2949_v53 = vrot.slane %v2947_v57, 7  ;;  %v1521_v54 = vshll.u32 %v1146_v44, 16  ;;  %v1525_v31 = vshrl.u32 %v1146_v44, 16  ;;  %v6387_v52 = vrot.slane %v1779_v58, 11  ;;  %v6398_v56 = vld [vmem:[#allocation2 + $0x15c] sm:$0xf] }
  0xdd   : > { %v2065_v9 = vpop.permute.xlu1 %2064  ;;  %v3221_v45 = vpop.permute.xlu0 %3220  ;;  %v6389_v55 = vrot.slane %v1784_v30, 7  ;;  %v1531_v15 = vshll.u32 %v1147_v13, 16  ;;  %v1787_v62 = vshll.u32 %v6345_v25, 16  ;;  %v6394_v43 = vrot.slane %v1793_v6, 7  ;;  %v6404_v32 = vld [vmem:[#allocation2 + $0x160] sm:$0xf] }
  0xde   : > { %2161 = vst.msk [vmem:[#allocation3] sm:$0xf] %vm2160_vm11, %v2065_v9  ;;  %v1796_v1 = vshll.u32 %v6361_v36, 16  ;;  %v2682_v23 = vor.u32 %v2681_v3, %v6379_v27  ;;  %v6401_v7 = vrot.slane %v2933_v51, 11  ;;  %v1514_v60 = vrot.slane %v1512_v19, 4 }
  0xdf   : > { %3315 = vst.msk [vmem:[#allocation3 + $0x10] sm:$0xf] %vm1631_vm10, %v3221_v45  ;;  %3466 = vrot.lane.b32.xlu1 %v3374_v49, %s5547_s6  ;;  %2122 = vrot.lane.b32.xlu0 %v2041_v40, %s5547_s6  ;;  %v1791_v26 = vrot.slane %v6389_v55, 4  ;;  %v1517_v2 = vrot.slane %v1515_v22, 5  ;;  %v1236_v25 = vsel %vm5708_vm3, %v6327_v46, %v6287_v28  ;;  %v1246_v33 = vsel %vm5708_vm3, %v6338_v16, %v6340_v18  ;;  %v480_v35 = vld [vmem:[#allocation2 + $0x108] sm:$0x8] }
  0xe0   : > { %v6414_v59 = vrot.slane %v1521_v54, 5  ;;  %v1527_v39 = vrot.slane %v1525_v31, 4  ;;  %v481_v40 = vld [vmem:[#allocation2 + $0x10c] sm:$0xf]  ;;  %v6417_v57 = vrot.slane %v2672_v8, 4  ;;  %v6419_v58 = vrot.slane %v1531_v15, 5 }
  0xe1   : > { %v3411_v5 = vpop.permute.xlu1 %3410  ;;  %v2067_v42 = vpop.permute.xlu0 %2066  ;;  %v3202_v20 = vshrl.u32 %v6398_v56, 16  ;;  %v778_v28 = vshrl.u32 %v480_v35, 16  ;;  %v2400_v46 = vsel %vm5708_vm3, %v6325_v63, %v6357_v29  ;;  %v2952_v47 = vor.u32 %v2950_v34, %v2949_v53  ;;  %v6436_v41 = vld [vmem:[#allocation2 + $0x144] sm:$0x8]  ;;  %v6438_v44 = vld [vmem:[#allocation2 + $0x148] sm:$0xf] }
  0xe2   : > { %3506 = vst.msk [vmem:[#allocation3 + $0x4] sm:$0xf] %vm2160_vm11, %v3411_v5  ;;  %2162 = vst.msk [vmem:[#allocation3 + $0xc] sm:$0xf] %vm2160_vm11, %v2067_v42  ;;  %v6433_v30 = vrot.slane %v2682_v23, 4  ;;  %v3205_v48 = vshll.u32 %v6398_v56, 16  ;;  %v2944_v17 = vsel %vm5760_vm8, %v6401_v7, %v6383_v50  ;;  %v6446_v12 = vor.u32 %v1787_v62, %v6389_v55 }
  0xe3   : > { %2701 = vrot.lane.b32.xlu1 %v2390_v37, %s5545_s4  ;;  %3468 = vrot.lane.b32.xlu0 %v3375_v14, %s5547_s6  ;;  %v3211_v63 = vshrl.u32 %v6404_v32, 16  ;;  %v783_v29 = vshrl.u32 %v481_v40, 16  ;;  %v2269_v37 = vld [vmem:[#allocation2 + $0x6c] sm:$0xf]  ;;  %v402_v0 = vld [vmem:[#allocation2 + $0x74] sm:$0x1]  ;;  %v1518_v6 = vor.u32 %v1517_v2, %v1514_v60  ;;  %v1528_v3 = vor.u32 %v1527_v39, %v6414_v59 }
  0xe4   : > { %v3214_v13 = vshll.u32 %v6404_v32, 16  ;;  %v786_v49 = vshll.u32 %v481_v40, 16  ;;  %v2270_v51 = vld [vmem:[#allocation2 + $0x70] sm:$0xf]  ;;  %v2219_v19 = vld [vmem:[#allocation2 + $0x120] sm:$0xf] }
  0xe5   : > { %v1020_v34 = vpop.permute.xlu1 %1019  ;;  %v3413_v22 = vpop.permute.xlu0 %3412  ;;  %v6452_v50 = vrot.slane %v3202_v20, 7  ;;  %v2043_v9 = vshrl.u32 %v6436_v41, 16  ;;  %v5115_v53 = vrot.slane %v778_v28, 11  ;;  %v6455_v54 = vrot.slane %v783_v29, 7  ;;  %v482_v31 = vld [vmem:[#allocation2 + $0x110] sm:$0xf] }
  0xe6   : > { %1092 = vst.msk [vmem:[#allocation3 + $0x120] sm:$0xf] %vm1067_vm9, %v1020_v34  ;;  %v2048_v45 = vshrl.u32 %v6438_v44, 16  ;;  %v2051_v8 = vshll.u32 %v6438_v44, 16  ;;  %v2402_v15 = vshrl.u32 %v2269_v37, 16  ;;  %v403_v14 = vsel %vm5693_vm2, 0, %v402_v0 }
  0xe7   : > { %2251 = vst.msk [vmem:[#allocation3 + $0x13c] sm:$0xf] %vm232_vm0, %v2219_v19  ;;  %1547 = vrot.lane.b32.xlu1 %v1236_v25, %s5546_s18  ;;  %2703 = vrot.lane.b32.xlu0 %v2400_v46, %s5545_s4  ;;  %v6465_v62 = vld [vmem:[#allocation2 + $0x14c] sm:$0xf]  ;;  %v788_v23 = vor.u32 %v786_v49, %v6455_v54  ;;  %v2405_v7 = vshll.u32 %v2269_v37, 16  ;;  %v2411_v60 = vshll.u32 %v2270_v51, 16  ;;  %v2953_v28 = vsel %vm5760_vm8, %v2945_v10, %v2952_v47 }
  0xe8   : > { %3507 = vst.msk [vmem:[#allocation3 + $0x10] sm:$0xf] %vm2160_vm11, %v3413_v22  ;;  %v2415_v2 = vshrl.u32 %v2270_v51, 16  ;;  %404 = vst [vmem:[#allocation2 + $0x74] sm:$0x1] %v403_v14  ;;  %v6470_v39 = vrot.slane %v1518_v6, 4  ;;  %v1790_v46 = vsel %vm5760_vm8, %v6387_v52, %v6446_v12  ;;  %v1798_v29 = vor.u32 %v1796_v1, %v6394_v43 }
  0xe9   : > { %v2738_v5 = vpop.permute.xlu1 %2737  ;;  %v6468_v25 = vld [vmem:[#allocation2 + $0x150] sm:$0x1]  ;;  %v6472_v35 = vrot.slane %v1528_v3, 4  ;;  %v792_v40 = vshrl.u32 %v482_v31, 16  ;;  %v795_v42 = vshll.u32 %v482_v31, 16  ;;  %v1022_v20 = vpop.permute.xlu0 %1021  ;;  %v789_v37 = vsel %vm5760_vm8, %v5115_v53, %v788_v23 }
  0xea   : > { %2809 = vst.msk [vmem:[#allocation3 + $0x124] sm:$0xf] %vm1067_vm9, %v2738_v5  ;;  %v1112_v0 = vld [vmem:[#allocation2 + $0x58] sm:$0xf]  ;;  %v2220_v34 = vld [vmem:[#allocation2 + $0x124] sm:$0xf]  ;;  %v1799_v16 = vsel %vm5760_vm8, %v1791_v26, %v1798_v29 }
  0xeb   : > { %v348_v6 = vld [vmem:[#allocation2 + $0x7c] sm:$0x8]  ;;  %1093 = vst.msk [vmem:[#allocation3 + $0x12c] sm:$0xf] %vm1067_vm9, %v1022_v20  ;;  %3230 = vrot.lane.b32.xlu1 %v2944_v17, %s5546_s18  ;;  %v2863_v61 = vld [vmem:[#allocation2 + $0x158] sm:$0x8]  ;;  %1549 = vrot.lane.b32.xlu0 %v1246_v33, %s5546_s18 }
  0xec   : > { %v3213_v10 = vrot.slane %v3211_v63, 7  ;;  %v2057_v47 = vshrl.u32 %v6465_v62, 16  ;;  %901 = vst.msk [vmem:[#allocation3 + $0x138] sm:$0xf] %vm232_vm0, %v789_v37  ;;  %v790_v52 = vrot.slane %v6455_v54, 4  ;;  %v794_v36 = vrot.slane %v792_v40, 7 }
  0xed   : > { %2252 = vst.msk [vmem:[#allocation3 + $0x148] sm:$0xf] %vm232_vm0, %v2220_v34  ;;  %v2404_v43 = vrot.slane %v2402_v15, 4  ;;  %v2407_v1 = vrot.slane %v2405_v7, 5  ;;  %v6500_v17 = vrot.slane %v2411_v60, 5  ;;  %v2417_v12 = vrot.slane %v2415_v2, 4  ;;  %v1584_v3 = vpop.permute.xlu1 %1583  ;;  %v2740_v53 = vpop.permute.xlu0 %2739 }
  0xee   : > { %v1113_v63 = vld [vmem:[#allocation2 + $0x5c] sm:$0xf]  ;;  %v797_v49 = vor.u32 %v795_v42, %v794_v36  ;;  %v1248_v51 = vshrl.u32 %v1112_v0, 16  ;;  %v1251_v19 = vshll.u32 %v1112_v0, 16  ;;  %v349_v22 = vsel %vm5715_vm6, 0, %v348_v6 }
  0xef   : > { %1656 = vst.msk [vmem:[#allocation3 + $0x120] sm:$0xf] %vm1631_vm10, %v1584_v3  ;;  %v5466_v54 = vld [vmem:[#allocation3] ss:$12 sps:$4 sm:$0xff]   ;;  %v5468_v31 = vld [vmem:[#allocation3 + $0x4] ss:$12 sps:$4 sm:$0xff]   ;;  %2076 = vrot.lane.b32.xlu1 %v1790_v46, %s5547_s6  ;;  %3232 = vrot.lane.b32.xlu0 %v2953_v28, %s5546_s18  ;;  %v3216_v26 = vor.u32 %v3214_v13, %v3213_v10  ;;  %v2408_v40 = vor.u32 %v2407_v1, %v2404_v43 }
  0xf0   : > { %v2685_v18 = vshll.u32 %v6468_v25, 16  ;;  %350 = vst [vmem:[#allocation2 + $0x7c] sm:$0x8] %v349_v22  ;;  %2810 = vst.msk [vmem:[#allocation3 + $0x130] sm:$0xf] %vm1067_vm9, %v2740_v53  ;;  %v3197_v15 = vshrl.u32 %v2863_v61, 16  ;;  %v798_v14 = vsel %vm5760_vm8, %v790_v52, %v797_v49  ;;  %4570 = vmatprep.mubr.bf16.mxu0 %v5468_v31  ;;  %v2418_v42 = vor.u32 %v2417_v12, %v6500_v17 }
  0xf1   : > { %v3352_v33 = vld [vmem:[#allocation2 + $0x6c] sm:$0xf]  ;;  %v1257_v23 = vshll.u32 %v1113_v63, 16  ;;  %v1261_v7 = vshrl.u32 %v1113_v63, 16  ;;  %v3209_v55 = vrot.slane %v6452_v50, 4  ;;  %v6520_v60 = vrot.slane %v2043_v9, 11  ;;  %v3267_v25 = vpop.permute.xlu1 %3266  ;;  %4571 = vmatmul.mubr.bf16.vlgmr.msra.gmra.mxu0 %v5466_v54  ;;  %v1586_v32 = vpop.permute.xlu0 %1585 }
  0xf2   : > { %v6524_v2 = vrot.slane %v2048_v45, 7  ;;  %902 = vst.msk [vmem:[#allocation3 + $0x144] sm:$0xf] %vm232_vm0, %v798_v14  ;;  %v1114_v5 = vld [vmem:[#allocation2 + $0x60] sm:$0x1]  ;;  %v1250_v20 = vrot.slane %v1248_v51, 4  ;;  %v1524_v61 = vsel %vm5708_vm3, %v6470_v39, %v6414_v59  ;;  %v6553_v10 = vor.u32 %v3205_v48, %v6452_v50 }
  0xf3   : > { %v1253_v28 = vrot.slane %v1251_v19, 5  ;;  %3338 = vst.msk [vmem:[#allocation3 + $0x124] sm:$0xf] %vm1631_vm10, %v3267_v25  ;;  %v6529_v41 = vrot.slane %v2685_v18, 5  ;;  %v2059_v9 = vrot.slane %v2057_v47, 7  ;;  %v2060_v45 = vshll.u32 %v6465_v62, 16  ;;  %3422 = vrot.lane.b32.xlu1 %v3352_v33, %s5547_s6  ;;  %2078 = vrot.lane.b32.xlu0 %v1799_v16, %s5547_s6 }
  0xf4   : > { %v2055_v13 = vrot.slane %v6524_v2, 4  ;;  %1657 = vst.msk [vmem:[#allocation3 + $0x12c] sm:$0xf] %vm1631_vm10, %v1586_v32  ;;  %v3353_v46 = vld [vmem:[#allocation2 + $0x70] sm:$0xf]  ;;  %v6535_v37 = vrot.slane %v3197_v15, 11  ;;  %v2678_v62 = vsel %vm5708_vm3, %v6417_v57, %v6379_v27  ;;  %v1534_v27 = vsel %vm5708_vm3, %v6472_v35, %v6419_v58 }
  0xf5   : > { %v937_v29 = vld [vmem:[#allocation2 + $0x134] sm:$0xf]  ;;  %v6537_v0 = vrot.slane %v1257_v23, 5  ;;  %v6539_v34 = vrot.slane %v1261_v7, 4  ;;  %v1267_v6 = vshll.u32 %v1114_v5, 16  ;;  %v2113_v43 = vpop.permute.xlu1 %2112  ;;  %v6561_v57 = vrot.slane %v2408_v40, 4  ;;  %v3269_v48 = vpop.permute.xlu0 %3268 }
  0xf6   : > { %v6555_v47 = vld [vmem:[#allocation2 + $0x80] sm:$0xf]  ;;  %v2197_v52 = vld [vmem:[#allocation2 + $0x44] sm:$0xf]  ;;  %v6563_v1 = vrot.slane %v2418_v42, 4  ;;  %v1254_v12 = vor.u32 %v1253_v28, %v1250_v20  ;;  %v2688_v50 = vsel %vm5708_vm3, %v6433_v30, %v6529_v41  ;;  %v6575_v3 = vsel %vm5760_vm8, %v3209_v55, %v3216_v26 }
  0xf7   : > { %v2272_v36 = vld [vmem:[#allocation2 + $0x80] sm:$0xf]  ;;  %v6565_v63 = vld [vmem:[#allocation2 + $0x84] sm:$0xf]  ;;  %2229 = vst.msk [vmem:[#allocation3 + $0x34] sm:$0xf] %vm232_vm0, %v2197_v52  ;;  %v6580_v49 = vor.u32 %v2051_v8, %v6524_v2  ;;  %v2062_v51 = vor.u32 %v2060_v45, %v2059_v9  ;;  %1031 = vrot.lane.b32.xlu1 %v937_v29, %s5545_s4  ;;  %v1264_v54 = vor.u32 %v6539_v34, %v6537_v0 }
  0xf8   : > { %v2273_v56 = vld [vmem:[#allocation2 + $0x84] sm:$0xf]  ;;  %2185 = vst.msk [vmem:[#allocation3 + $0x120] sm:$0xf] %vm2160_vm11, %v2113_v43  ;;  %v2271_v19 = vld [vmem:[#allocation2 + $0x74] sm:$0x1]  ;;  %3424 = vrot.lane.b32.xlu0 %v3353_v46, %s5547_s6  ;;  %v3208_v46 = vsel %vm5760_vm8, %v6535_v37, %v6553_v10 }
  0xf9   : > { %v405_v22 = vld [vmem:[#allocation2 + $0x88] sm:$0x1]  ;;  %3339 = vst.msk [vmem:[#allocation3 + $0x130] sm:$0xf] %vm1631_vm10, %v3269_v48  ;;  %v6586_v31 = vrot.slane %v1267_v6, 5  ;;  %v2960_v16 = vshrl.u32 %v6555_v47, 16  ;;  %v3459_v7 = vpop.permute.xlu1 %3458  ;;  %v2115_v40 = vpop.permute.xlu0 %2114  ;;  %v2054_v42 = vsel %vm5760_vm8, %v6520_v60, %v6580_v49  ;;  %v6606_v20 = vsel %vm5760_vm8, %v2055_v13, %v2062_v51 }
  0xfa   : > { %v2198_v53 = vld [vmem:[#allocation2 + $0x48] sm:$0xf]  ;;  %v6589_v18 = vld [vmem:[#allocation2 + $0x6c] sm:$0xf]  ;;  %v2426_v44 = vshrl.u32 %v2272_v36, 16  ;;  %v2429_v33 = vshll.u32 %v2272_v36, 16  ;;  %v2414_v13 = vsel %vm5708_vm3, %v6561_v57, %v6500_v17 }
  0xfb   : > { %2230 = vst.msk [vmem:[#allocation3 + $0x40] sm:$0xf] %vm232_vm0, %v2198_v53  ;;  %v1676_v8 = vld [vmem:[#allocation2 + $0x68] sm:$0x8]  ;;  %v2435_v15 = vshll.u32 %v2273_v56, 16  ;;  %v2439_v14 = vshrl.u32 %v2273_v56, 16  ;;  %2749 = vrot.lane.b32.xlu1 %v2678_v62, %s5545_s4 }
  0xfc   : > { %v406_v23 = vsel %vm5693_vm2, 0, %v405_v22  ;;  %v938_v55 = vld [vmem:[#allocation2 + $0x138] sm:$0xf]  ;;  %v2421_v26 = vshll.u32 %v2271_v19, 16  ;;  %v6595_v2 = vrot.slane %v1254_v12, 4  ;;  %v2963_v5 = vshll.u32 %v6555_v47, 16 }
  0xfd   : > { %v2969_v25 = vshrl.u32 %v6565_v63, 16  ;;  %407 = vst [vmem:[#allocation2 + $0x88] sm:$0x1] %v406_v23  ;;  %3530 = vst.msk [vmem:[#allocation3 + $0x124] sm:$0xf] %vm2160_vm11, %v3459_v7  ;;  %v2972_v28 = vshll.u32 %v6565_v63, 16  ;;  %1033 = vrot.lane.b32.xlu0 %v938_v55, %s5545_s4  ;;  %v2694_v37 = vpop.permute.xlu1 %2693  ;;  %v3461_v19 = vpop.permute.xlu0 %3460 }
  0xfe   : > { %v1806_v32 = vshrl.u32 %v6589_v18, 16  ;;  %v1115_v9 = vld [vmem:[#allocation2 + $0x6c] sm:$0xf]  ;;  %v351_v45 = vld [vmem:[#allocation2 + $0x90] sm:$0x8]  ;;  %v6620_v34 = vrot.slane %v2960_v16, 7 }
  0xff   : > { %2186 = vst.msk [vmem:[#allocation3 + $0x12c] sm:$0xf] %vm2160_vm11, %v2115_v40  ;;  %v2830_v29 = vld [vmem:[#allocation2 + $0x7c] sm:$0x8]  ;;  %v1801_v6 = vshrl.u32 %v1676_v8, 16  ;;  %v2428_v36 = vrot.slane %v2426_v44, 4  ;;  %1595 = vrot.lane.b32.xlu1 %v1524_v61, %s5546_s18 }
 0x100   : > { %v6622_v52 = vld [vmem:[#allocation2 + $0x70] sm:$0xf]  ;;  %v2431_v62 = vrot.slane %v2429_v33, 5  ;;  %v6625_v43 = vrot.slane %v2435_v15, 5  ;;  %v2441_v12 = vrot.slane %v2439_v14, 4  ;;  %v6627_v10 = vrot.slane %v1264_v54, 4 }
 0x101   : > { %v1116_v63 = vld [vmem:[#allocation2 + $0x70] sm:$0xf]  ;;  %v1272_v56 = vshrl.u32 %v1115_v9, 16  ;;  %v1275_v48 = vshll.u32 %v1115_v9, 16  ;;  %v352_v51 = vsel %vm5715_vm6, 0, %v351_v45  ;;  %v6632_v22 = vrot.slane %v2421_v26, 5  ;;  %2751 = vrot.lane.b32.xlu0 %v2688_v50, %s5545_s4  ;;  %v1540_v61 = vpop.permute.xlu1 %1539  ;;  %v2696_v9 = vpop.permute.xlu0 %2695 }
 0x102   : > { %2787 = vst.msk [vmem:[#allocation3 + $0x1c] sm:$0xf] %vm1067_vm9, %v2694_v37  ;;  %v2971_v53 = vrot.slane %v2969_v25, 7  ;;  %v6634_v16 = vrot.slane %v1806_v32, 7  ;;  %v1809_v44 = vshll.u32 %v6589_v18, 16  ;;  %v2955_v54 = vshrl.u32 %v2830_v29, 16 }
 0x103   : > { %v1117_v8 = vld [vmem:[#allocation2 + $0x74] sm:$0x1]  ;;  %353 = vst [vmem:[#allocation2 + $0x90] sm:$0x8] %v352_v51  ;;  %3531 = vst.msk [vmem:[#allocation3 + $0x130] sm:$0xf] %vm2160_vm11, %v3461_v19  ;;  %v2432_v7 = vor.u32 %v2431_v62, %v2428_v36  ;;  %v2442_v59 = vor.u32 %v2441_v12, %v6625_v43  ;;  %3278 = vrot.lane.b32.xlu1 %v3208_v46, %s5546_s18 }
 0x104   : > { %v2967_v33 = vrot.slane %v6620_v34, 4  ;;  %v1815_v15 = vshrl.u32 %v6622_v52, 16  ;;  %v1281_v14 = vshll.u32 %v1116_v63, 16  ;;  %v6646_v23 = vld [vmem:[#allocation2 + $0x94] sm:$0xf]  ;;  %v6654_v18 = vrot.slane %v1801_v6, 11 }
 0x105   : > { %v1285_v39 = vshrl.u32 %v1116_v63, 16  ;;  %v1274_v26 = vrot.slane %v1272_v56, 4  ;;  %v1277_v25 = vrot.slane %v1275_v48, 5  ;;  %v1291_v40 = vshll.u32 %v1117_v8, 16  ;;  %v483_v32 = vld [vmem:[#allocation2 + $0x11c] sm:$0x8]  ;;  %1597 = vrot.lane.b32.xlu0 %v1534_v27, %s5546_s18  ;;  %v3223_v56 = vpop.permute.xlu1 %3222  ;;  %v1542_v8 = vpop.permute.xlu0 %1541 }
 0x106   : > { %1634 = vst.msk [vmem:[#allocation3 + $0x18] sm:$0xf] %vm1631_vm10, %v1540_v61  ;;  %v2974_v30 = vor.u32 %v2972_v28, %v2971_v53  ;;  %v6663_v41 = vor.u32 %v1809_v44, %v6634_v16  ;;  %v1818_v50 = vshll.u32 %v6622_v52, 16  ;;  %v2982_v45 = vshrl.u32 %v6646_v23, 16  ;;  %v484_v29 = vld [vmem:[#allocation2 + $0x120] sm:$0xf] }
 0x107   : > { %2788 = vst.msk [vmem:[#allocation3 + $0x28] sm:$0xf] %vm1067_vm9, %v2696_v9  ;;  %v6669_v6 = vrot.slane %v2955_v54, 11  ;;  %v1813_v36 = vrot.slane %v6634_v16, 4  ;;  %v1817_v62 = vrot.slane %v1815_v15, 7  ;;  %v6672_v12 = vrot.slane %v1281_v14, 5  ;;  %2124 = vrot.lane.b32.xlu1 %v2054_v42, %s5547_s6 }
 0x108   : > { %v6680_v28 = vrot.slane %v2432_v7, 4  ;;  %v6682_v52 = vrot.slane %v2442_v59, 4  ;;  %v6684_v63 = vrot.slane %v1285_v39, 4  ;;  %v6686_v46 = vld [vmem:[#allocation2 + $0x98] sm:$0xf]  ;;  %v800_v37 = vshrl.u32 %v483_v32, 16 }
 0x109   : > { %v1278_v48 = vor.u32 %v1277_v25, %v1274_v26  ;;  %v6688_v51 = vrot.slane %v1291_v40, 5  ;;  %v2985_v19 = vshll.u32 %v6646_v23, 16  ;;  %v805_v53 = vshrl.u32 %v484_v29, 16  ;;  %v485_v44 = vld [vmem:[#allocation2 + $0x124] sm:$0xf]  ;;  %3280 = vrot.lane.b32.xlu0 %v6575_v3, %s5546_s18  ;;  %v2069_v9 = vpop.permute.xlu1 %2068 }
 0x10a   : > { %3316 = vst.msk [vmem:[#allocation3 + $0x1c] sm:$0xf] %vm1631_vm10, %v3223_v56  ;;  %v5469_v58 = vld [vmem:[#allocation3 + $0x120] ss:$12 sps:$4 sm:$0xff]   ;;  %v5471_v35 = vld [vmem:[#allocation3 + $0x124] ss:$12 sps:$4 sm:$0xff]   ;;  %v2424_v54 = vsel %vm5708_vm3, %v6563_v1, %v6632_v22  ;;  %v1270_v15 = vsel %vm5708_vm3, %v6627_v10, %v6586_v31  ;;  %v6703_v14 = vor.u32 %v2963_v5, %v6620_v34  ;;  %v6720_v47 = vsel %vm5760_vm8, %v2967_v33, %v2974_v30 }
 0x10b   : > { %v3376_v27 = vld [vmem:[#allocation2 + $0x15c] sm:$0xf]  ;;  %v6705_v7 = vrot.slane %v2982_v45, 7  ;;  %v6709_v39 = vld [vmem:[#allocation2 + $0x80] sm:$0xf]  ;;  %v2991_v34 = vshrl.u32 %v6686_v46, 16  ;;  %4666 = vmatprep.mubr.bf16.mxu1 %v5471_v35  ;;  %v1820_v30 = vor.u32 %v1818_v50, %v1817_v62  ;;  %v1288_v56 = vor.u32 %v6684_v63, %v6672_v12  ;;  %v3225_v35 = vpop.permute.xlu0 %3224 }
 0x10c   : > { %v6707_v59 = vld [vmem:[#allocation2 + $0x7c] sm:$0x8]  ;;  %1635 = vst.msk [vmem:[#allocation3 + $0x24] sm:$0xf] %vm1631_vm10, %v1542_v8  ;;  %v807_v61 = vrot.slane %v805_v53, 7  ;;  %v5116_v42 = vrot.slane %v800_v37, 11  ;;  %4667 = vmatmul.mubr.bf16.vlgmr.msra.gmra.mxu1 %v5469_v58  ;;  %3470 = vrot.lane.b32.xlu1 %v3376_v27, %s5547_s6 }
 0x10d   : > { %v2221_v26 = vld [vmem:[#allocation2 + $0x134] sm:$0xf]  ;;  %v6729_v60 = vld [vmem:[#allocation2 + $0x88] sm:$0x1]  ;;  %v6731_v49 = vld [vmem:[#allocation2 + $0x84] sm:$0xf]  ;;  %2126 = vrot.lane.b32.xlu0 %v6606_v20, %s5547_s6 }
 0x10e   : > { %v2275_v25 = vld [vmem:[#allocation2 + $0x94] sm:$0xf]  ;;  %v808_v33 = vshll.u32 %v484_v29, 16  ;;  %v814_v40 = vshrl.u32 %v485_v44, 16  ;;  %v817_v32 = vshll.u32 %v485_v44, 16  ;;  %v6734_v45 = vrot.slane %v1278_v48, 4 }
 0x10f   : > { %2253 = vst.msk [vmem:[#allocation3 + $0x154] sm:$0xf] %vm232_vm0, %v2221_v26  ;;  %v812_v3 = vrot.slane %v807_v61, 4  ;;  %v2276_v53 = vld [vmem:[#allocation2 + $0x98] sm:$0xf]  ;;  %v2450_v5 = vshrl.u32 %v2275_v25, 16 }
 0x110   : > { %v408_v8 = vld [vmem:[#allocation2 + $0x9c] sm:$0x1]  ;;  %2163 = vst.msk [vmem:[#allocation3 + $0x18] sm:$0xf] %vm2160_vm11, %v2069_v9  ;;  %v810_v37 = vor.u32 %v808_v33, %v807_v61  ;;  %v816_v29 = vrot.slane %v814_v40, 7  ;;  %v2453_v44 = vshll.u32 %v2275_v25, 16  ;;  %v3415_v40 = vpop.permute.xlu1 %3414 }
 0x111   : > { %v2222_v55 = vld [vmem:[#allocation2 + $0x138] sm:$0xf]  ;;  %3317 = vst.msk [vmem:[#allocation3 + $0x28] sm:$0xf] %vm1631_vm10, %v3225_v35  ;;  %v2994_v50 = vshll.u32 %v6686_v46, 16  ;;  %v1823_v62 = vshrl.u32 %v6707_v59, 16 }
 0x112   : > { %v1828_v63 = vshrl.u32 %v6709_v39, 16  ;;  %v409_v48 = vsel %vm5693_vm2, 0, %v408_v8  ;;  %2254 = vst.msk [vmem:[#allocation3 + $0x160] sm:$0xf] %vm232_vm0, %v2222_v55  ;;  %v3377_v58 = vld [vmem:[#allocation2 + $0x160] sm:$0xf]  ;;  %v811_v26 = vsel %vm5760_vm8, %v5116_v42, %v810_v37  ;;  %v819_v27 = vor.u32 %v817_v32, %v816_v29  ;;  %v2071_v32 = vpop.permute.xlu0 %2070 }
 0x113   : > { %v916_v61 = vld [vmem:[#allocation2 + $0x5c] sm:$0xf]  ;;  %v2459_v25 = vshll.u32 %v2276_v53, 16  ;;  %v2463_v33 = vshrl.u32 %v2276_v53, 16  ;;  %410 = vst [vmem:[#allocation2 + $0x9c] sm:$0x1] %v409_v48  ;;  %v6768_v53 = vsel %vm5760_vm8, %v1813_v36, %v1820_v30  ;;  %3472 = vrot.lane.b32.xlu0 %v3377_v58, %s5547_s6 }
 0x114   : > { %v2445_v55 = vshll.u32 %v6729_v60, 16  ;;  %v6756_v8 = vrot.slane %v1288_v56, 4  ;;  %v1837_v20 = vshrl.u32 %v6731_v49, 16  ;;  %903 = vst.msk [vmem:[#allocation3 + $0x150] sm:$0xf] %vm232_vm0, %v811_v26  ;;  %v5484_v42 = vld [vmem:[%s8354_s1 + $0x88] sm:$0xff]   ;;  %v820_v56 = vsel %vm5760_vm8, %v812_v3, %v819_v27  ;;  %989 = vrot.lane.b32.xlu1 %v916_v61, %s5545_s4 }
 0x115   : > { %v354_v35 = vld [vmem:[#allocation2 + $0xa4] sm:$0x8]  ;;  %3508 = vst.msk [vmem:[#allocation3 + $0x1c] sm:$0xf] %vm2160_vm11, %v3415_v40  ;;  %v2833_v60 = vld [vmem:[#allocation2 + $0x90] sm:$0x8]  ;;  %5369 = vmatprep.subr.bf16.mxu1 %v5484_v42 }
 0x116   : > { %v2452_v37 = vrot.slane %v2450_v5, 4  ;;  %v2455_v29 = vrot.slane %v2453_v44, 5  ;;  %v1118_v48 = vld [vmem:[#allocation2 + $0x80] sm:$0xf]  ;;  %2164 = vst.msk [vmem:[#allocation3 + $0x24] sm:$0xf] %vm2160_vm11, %v2071_v32  ;;  %5370 = vmatpush3.bf16.msra.mxu1 %v5484_v42  ;;  %v3417_v9 = vpop.permute.xlu0 %3416 }
 0x117   : > { %v2993_v36 = vrot.slane %v2991_v34, 7  ;;  %v6780_v30 = vrot.slane %v1828_v63, 7  ;;  %v1831_v26 = vshll.u32 %v6709_v39, 16  ;;  %904 = vst.msk [vmem:[#allocation3 + $0x15c] sm:$0xf] %vm232_vm0, %v820_v56  ;;  %v5485_v3 = vld [vmem:[%s8354_s1 + $0x80] sm:$0xff]   ;;  %v1024_v39 = vpop.permute.xlu1 %1023  ;;  %2705 = vrot.lane.b32.xlu0 %v2414_v13, %s5545_s4 }
 0x118   : > { %v1119_v5 = vld [vmem:[#allocation2 + $0x84] sm:$0xf]  ;;  %v1840_v44 = vshll.u32 %v6731_v49, 16  ;;  %v6789_v61 = vrot.slane %v2459_v25, 5  ;;  %v2465_v27 = vrot.slane %v2463_v33, 4  ;;  %v355_v34 = vsel %vm5715_vm6, 0, %v354_v35  ;;  %5371 = vmatprep.subr.bf16.mxu1 %v5485_v3  ;;  %2707 = vrot.lane.b32.xlu1 %v2424_v54, %s5545_s4 }
 0x119   : > { %v2977_v63 = vshrl.u32 %v2833_v60, 16  ;;  %v1839_v40 = vrot.slane %v1837_v20, 7  ;;  %v1296_v32 = vshrl.u32 %v1118_v48, 16  ;;  %v1299_v56 = vshll.u32 %v1118_v48, 16  ;;  %v1120_v16 = vld [vmem:[#allocation2 + $0x88] sm:$0x1] }
 0x11a   : > { %356 = vst [vmem:[#allocation2 + $0xa4] sm:$0x8] %v355_v34  ;;  %1094 = vst.msk [vmem:[#allocation3 + $0x138] sm:$0xf] %vm1067_vm9, %v1024_v39  ;;  %v6797_v49 = vor.u32 %v2985_v19, %v6705_v7  ;;  %v2456_v58 = vor.u32 %v2455_v29, %v2452_v37  ;;  %v1305_v25 = vshll.u32 %v1119_v5, 16  ;;  %v1309_v33 = vshrl.u32 %v1119_v5, 16  ;;  %5372 = vmatpush3.bf16.msra.mxu1 %v5485_v3  ;;  %v1026_v17 = vpop.permute.xlu0 %1025 }
 0x11b   : > { %3509 = vst.msk [vmem:[#allocation3 + $0x28] sm:$0xf] %vm2160_vm11, %v3417_v9  ;;  %v6806_v20 = vrot.slane %v2445_v55, 5  ;;  %v2989_v35 = vrot.slane %v6705_v7, 4  ;;  %v2996_v23 = vor.u32 %v2994_v50, %v2993_v36  ;;  %v6813_v19 = vrot.slane %v1823_v62, 11  ;;  %v2742_v59 = vpop.permute.xlu1 %2741 }
 0x11c   : > { %v6815_v42 = vld [vmem:[#allocation2 + $0xa8] sm:$0xf]  ;;  %v6824_v1 = vor.u32 %v1831_v26, %v6780_v30  ;;  %v1835_v22 = vrot.slane %v6780_v30, 4  ;;  %v2466_v46 = vor.u32 %v2465_v27, %v6789_v61  ;;  %v1315_v54 = vshll.u32 %v1120_v16, 16  ;;  %v2199_v7 = vld [vmem:[#allocation2 + $0x58] sm:$0xf]  ;;  %1553 = vrot.lane.b32.xlu1 %v1270_v15, %s5546_s18 }
 0x11d   : > { %v6828_v50 = vrot.slane %v2977_v63, 11  ;;  %v1842_v62 = vor.u32 %v1840_v44, %v1839_v40  ;;  %v1298_v9 = vrot.slane %v1296_v32, 4  ;;  %v1301_v55 = vrot.slane %v1299_v56, 5  ;;  %v6830_v60 = vld [vmem:[#allocation2 + $0xac] sm:$0xf] }
 0x11e   : > { %2231 = vst.msk [vmem:[#allocation3 + $0x4c] sm:$0xf] %vm232_vm0, %v2199_v7  ;;  %v6834_v57 = vrot.slane %v2456_v58, 4  ;;  %v6836_v13 = vrot.slane %v1305_v25, 5  ;;  %v6838_v37 = vrot.slane %v1309_v33, 4  ;;  %v3004_v29 = vshrl.u32 %v6815_v42, 16  ;;  %v2744_v33 = vpop.permute.xlu0 %2743 }
 0x11f   : > { %2811 = vst.msk [vmem:[#allocation3 + $0x13c] sm:$0xf] %vm1067_vm9, %v2742_v59  ;;  %v6841_v48 = vld [vmem:[#allocation2 + $0x90] sm:$0x8]  ;;  %1095 = vst.msk [vmem:[#allocation3 + $0x144] sm:$0xf] %vm1067_vm9, %v1026_v17  ;;  %v2448_v16 = vsel %vm5708_vm3, %v6682_v52, %v6806_v20  ;;  %v6864_v26 = vsel %vm5760_vm8, %v2989_v35, %v2996_v23  ;;  %v8371_v5 = vsel %vm5708_vm3, %v6595_v2, %v6537_v0  ;;  %v1588_v63 = vpop.permute.xlu1 %1587 }
 0x120   : > { %v6866_v31 = vld [vmem:[#allocation2 + $0x94] sm:$0xf]  ;;  %v6868_v10 = vld [vmem:[#allocation2 + $0x98] sm:$0xf]  ;;  %v2200_v15 = vld [vmem:[#allocation2 + $0x5c] sm:$0xf]  ;;  %1551 = vrot.lane.b32.xlu0 %v8371_v5, %s5546_s18  ;;  %v6895_v2 = vsel %vm5760_vm8, %v1835_v22, %v1842_v62  ;;  %v1302_v32 = vor.u32 %v1301_v55, %v1298_v9  ;;  %v1312_v7 = vor.u32 %v6838_v37, %v6836_v13  ;;  %3236 = vrot.lane.b32.xlu1 %v6720_v47, %s5546_s18 }
 0x121   : > { %v6876_v3 = vld [vmem:[#allocation2 + $0x9c] sm:$0x1]  ;;  %v6878_v44 = vrot.slane %v2466_v46, 4  ;;  %v6880_v27 = vrot.slane %v1315_v54, 5  ;;  %v3007_v34 = vshll.u32 %v6815_v42, 16  ;;  %v3013_v39 = vshrl.u32 %v6830_v60, 16 }
 0x122   : > { %2232 = vst.msk [vmem:[#allocation3 + $0x58] sm:$0xf] %vm232_vm0, %v2200_v15  ;;  %v2278_v56 = vld [vmem:[#allocation2 + $0xa8] sm:$0xf]  ;;  %v2279_v58 = vld [vmem:[#allocation2 + $0xac] sm:$0xf]  ;;  %v8372_v37 = vsel %vm5760_vm8, %v6669_v6, %v6703_v14  ;;  %v1590_v54 = vpop.permute.xlu0 %1589  ;;  %v8375_v52 = vsel %vm5708_vm3, %v6680_v28, %v6625_v43 }
 0x123   : > { %v411_v25 = vld [vmem:[#allocation2 + $0xb0] sm:$0x1]  ;;  %1658 = vst.msk [vmem:[#allocation3 + $0x138] sm:$0xf] %vm1631_vm10, %v1588_v63  ;;  %v4038_v35 = vld [vmem:[#allocation3 + $0x18] sm:$0xff]  ;;  %v1850_v22 = vshrl.u32 %v6866_v31, 16 }
 0x124   : > { %v4040_v23 = vld [vmem:[#allocation3 + $0x24] sm:$0xff]  ;;  %v1859_v59 = vshrl.u32 %v6868_v10, 16  ;;  %2812 = vst.msk [vmem:[#allocation3 + $0x148] sm:$0xf] %vm1067_vm9, %v2744_v33  ;;  %v6909_v9 = vrot.slane %v3004_v29, 7  ;;  %v1845_v55 = vshrl.u32 %v6841_v48, 16  ;;  %3234 = vrot.lane.b32.xlu0 %v8372_v37, %s5546_s18  ;;  %v3271_v29 = vpop.permute.xlu1 %3270  ;;  %2082 = vrot.lane.b32.xlu1 %v6768_v53, %s5547_s6 }
 0x125   : > { %v5472_v46 = vld [vmem:[#allocation3 + $0x1c] ss:$12 sps:$4 sm:$0xff]   ;;  %v5154_v62 = vcombine.low %v4038_v35, %v4040_v23  ;;  %v412_v17 = vsel %vm5693_vm2, 0, %v411_v25  ;;  %v2474_v15 = vshrl.u32 %v2278_v56, 16  ;;  %v2477_v5 = vshll.u32 %v2278_v56, 16 }
 0x126   : > { %4578 = vmatprep.mubr.bf16.mxu0 %v5472_v46  ;;  %v2483_v63 = vshll.u32 %v2279_v58, 16  ;;  %v2487_v47 = vshrl.u32 %v2279_v58, 16  ;;  %413 = vst [vmem:[#allocation2 + $0xb0] sm:$0x1] %v412_v17  ;;  %v2469_v48 = vshll.u32 %v6876_v3, 16  ;;  %v6921_v33 = vrot.slane %v1302_v32, 4  ;;  %v3273_v36 = vpop.permute.xlu0 %3272 }
 0x127   : > { %4579 = vmatmul.mubr.bf16.gmra.mxu0 %v5154_v62  ;;  %v3015_v25 = vrot.slane %v3013_v39, 7  ;;  %v3016_v35 = vshll.u32 %v6830_v60, 16  ;;  %v357_v23 = vld [vmem:[#allocation2 + $0xb8] sm:$0x8]  ;;  %3340 = vst.msk [vmem:[#allocation3 + $0x13c] sm:$0xf] %vm1631_vm10, %v3271_v29 }
 0x128   : > { %v3355_v6 = vld [vmem:[#allocation2 + $0x84] sm:$0xf]  ;;  %v1852_v14 = vrot.slane %v1850_v22, 7  ;;  %v1853_v56 = vshll.u32 %v6866_v31, 16  ;;  %v1861_v46 = vrot.slane %v1859_v59, 7  ;;  %v1862_v58 = vshll.u32 %v6868_v10, 16  ;;  %v2117_v37 = vpop.permute.xlu1 %2116 }
 0x129   : > { %v1121_v17 = vld [vmem:[#allocation2 + $0x94] sm:$0xf]  ;;  %1659 = vst.msk [vmem:[#allocation3 + $0x144] sm:$0xf] %vm1631_vm10, %v1590_v54  ;;  %v3354_v3 = vld [vmem:[#allocation2 + $0x80] sm:$0xf]  ;;  %v8373_v10 = vsel %vm5760_vm8, %v6654_v18, %v6663_v41  ;;  %v3018_v29 = vor.u32 %v3016_v35, %v3015_v25  ;;  %3428 = vrot.lane.b32.xlu1 %v3355_v6, %s5547_s6 }
 0x12a   : > { %v6930_v39 = vrot.slane %v1312_v7, 4  ;;  %v2836_v60 = vld [vmem:[#allocation2 + $0xa4] sm:$0x8]  ;;  %v3011_v32 = vrot.slane %v6909_v9, 4  ;;  %v6933_v62 = vrot.slane %v1845_v55, 11  ;;  %v358_v31 = vsel %vm5715_vm6, 0, %v357_v23  ;;  %2080 = vrot.lane.b32.xlu0 %v8373_v10, %s5547_s6 }
 0x12b   : > { %v2476_v54 = vrot.slane %v2474_v15, 4  ;;  %v2479_v53 = vrot.slane %v2477_v5, 5  ;;  %v6943_v22 = vrot.slane %v2483_v63, 5  ;;  %v2489_v7 = vrot.slane %v2487_v47, 4  ;;  %v1122_v59 = vld [vmem:[#allocation2 + $0x98] sm:$0xf] }
 0x12c   : > { %359 = vst [vmem:[#allocation2 + $0xb8] sm:$0x8] %v358_v31  ;;  %v6945_v55 = vrot.slane %v2469_v48, 5  ;;  %v1320_v0 = vshrl.u32 %v1121_v17, 16  ;;  %v1323_v23 = vshll.u32 %v1121_v17, 16  ;;  %v2999_v30 = vshrl.u32 %v2836_v60, 16  ;;  %v3463_v17 = vpop.permute.xlu1 %3462  ;;  %v2119_v31 = vpop.permute.xlu0 %2118 }
 0x12d   : > { %v1123_v40 = vld [vmem:[#allocation2 + $0x9c] sm:$0x1]  ;;  %2187 = vst.msk [vmem:[#allocation3 + $0x138] sm:$0xf] %vm2160_vm11, %v2117_v37  ;;  %v6948_v18 = vor.u32 %v1853_v56, %v1852_v14  ;;  %v1857_v41 = vrot.slane %v1852_v14, 4  ;;  %v1864_v15 = vor.u32 %v1862_v58, %v1861_v46  ;;  %v6959_v48 = vor.u32 %v3007_v34, %v6909_v9 }
 0x12e   : > { %3341 = vst.msk [vmem:[#allocation3 + $0x148] sm:$0xf] %vm1631_vm10, %v3273_v36  ;;  %v917_v5 = vld [vmem:[#allocation2 + $0x6c] sm:$0xf]  ;;  %v918_v63 = vld [vmem:[#allocation2 + $0x70] sm:$0xf]  ;;  %3426 = vrot.lane.b32.xlu0 %v3354_v3, %s5547_s6  ;;  %v2480_v6 = vor.u32 %v2479_v53, %v2476_v54  ;;  %v2490_v14 = vor.u32 %v2489_v7, %v6943_v22  ;;  %v8389_v24 = vsel %vm5708_vm3, %v6930_v39, %v6880_v27 }
 0x12f   : > { %8374 = vst [vmem:[#allocation4_spill] sm:$0xff] %v6948_v18  ;;  %v1329_v25 = vshll.u32 %v1122_v59, 16  ;;  %v1333_v35 = vshrl.u32 %v1122_v59, 16  ;;  %v1339_v56 = vshll.u32 %v1123_v40, 16  ;;  %v6967_v46 = vld [vmem:[#allocation2 + $0xbc] sm:$0xf]  ;;  %v6979_v40 = vsel %vm5760_vm8, %v3011_v32, %v3018_v29  ;;  %993 = vrot.lane.b32.xlu1 %v918_v63, %s5545_s4 }
 0x130   : > { %v486_v58 = vld [vmem:[#allocation2 + $0x130] sm:$0x8]  ;;  %v1322_v34 = vrot.slane %v1320_v0, 4  ;;  %v1325_v9 = vrot.slane %v1323_v23, 5  ;;  %v487_v3 = vld [vmem:[#allocation2 + $0x134] sm:$0xf]  ;;  %v6987_v0 = vsel %vm5760_vm8, %v1857_v41, %v1864_v15  ;;  %v3465_v36 = vpop.permute.xlu0 %3464 }
 0x131   : > { %3532 = vst.msk [vmem:[#allocation3 + $0x13c] sm:$0xf] %vm2160_vm11, %v3463_v17  ;;  %v6975_v10 = vrot.slane %v2999_v30, 11  ;;  %v488_v53 = vld [vmem:[#allocation2 + $0x138] sm:$0xf]  ;;  %v6991_v30 = vrot.slane %v1329_v25, 5 }
 0x132   : > { %v2223_v7 = vld [vmem:[#allocation2 + $0x148] sm:$0xf]  ;;  %2188 = vst.msk [vmem:[#allocation3 + $0x144] sm:$0xf] %vm2160_vm11, %v2119_v31  ;;  %v6993_v59 = vrot.slane %v1333_v35, 4  ;;  %v3026_v32 = vshrl.u32 %v6967_v46, 16  ;;  %991 = vrot.lane.b32.xlu0 %v917_v5, %s5545_s4  ;;  %v2698_v35 = vpop.permute.xlu1 %2697  ;;  %v1326_v17 = vor.u32 %v1325_v9, %v1322_v34 }
 0x133   : > { %v6996_v37 = vld [vmem:[#allocation2 + $0xc0] sm:$0xf]  ;;  %v822_v29 = vshrl.u32 %v486_v58, 16  ;;  %2255 = vst.msk [vmem:[#allocation3 + $0x16c] sm:$0xf] %vm232_vm0, %v2223_v7  ;;  %v7000_v23 = vrot.slane %v2480_v6, 4  ;;  %2711 = vrot.lane.b32.xlu1 %v2448_v16, %s5545_s4 }
 0x134   : > { %v7002_v41 = vrot.slane %v2490_v14, 4  ;;  %v7004_v15 = vrot.slane %v1339_v56, 5  ;;  %v7006_v63 = vld [vmem:[#allocation2 + $0xa4] sm:$0x8]  ;;  %v827_v25 = vshrl.u32 %v487_v3, 16  ;;  %v830_v54 = vshll.u32 %v487_v3, 16  ;;  %v2700_v18 = vpop.permute.xlu0 %2699 }
 0x135   : > { %v836_v47 = vshrl.u32 %v488_v53, 16  ;;  %v2224_v58 = vld [vmem:[#allocation2 + $0x14c] sm:$0xf]  ;;  %2789 = vst.msk [vmem:[#allocation3 + $0x34] sm:$0xf] %vm1067_vm9, %v2698_v35  ;;  %v3035_v5 = vshrl.u32 %v6996_v37, 16  ;;  %v1336_v9 = vor.u32 %v6993_v59, %v6991_v30 }
 0x136   : > { %v7011_v6 = vld [vmem:[#allocation2 + $0xa8] sm:$0xf]  ;;  %v5117_v14 = vrot.slane %v822_v29, 11  ;;  %v829_v56 = vrot.slane %v827_v25, 7  ;;  %v839_v7 = vshll.u32 %v488_v53, 16  ;;  %v7027_v3 = vrot.slane %v3026_v32, 7  ;;  %2709 = vrot.lane.b32.xlu0 %v8375_v52, %s5545_s4  ;;  %v1544_v32 = vpop.permute.xlu1 %1543 }
 0x137   : > { %2256 = vst.msk [vmem:[#allocation3 + $0x178] sm:$0xf] %vm232_vm0, %v2224_v58  ;;  %v2281_v42 = vld [vmem:[#allocation2 + $0xbc] sm:$0xf]  ;;  %v7029_v53 = vld [vmem:[#allocation2 + $0xac] sm:$0xf] }
 0x138   : > { %3533 = vst.msk [vmem:[#allocation3 + $0x148] sm:$0xf] %vm2160_vm11, %v3465_v36  ;;  %v838_v36 = vrot.slane %v836_v47, 7  ;;  %v2282_v29 = vld [vmem:[#allocation2 + $0xc0] sm:$0xf]  ;;  %v3038_v20 = vshll.u32 %v6996_v37, 16  ;;  %v832_v25 = vor.u32 %v830_v54, %v829_v56 }
 0x139   : > { %v1867_v16 = vshrl.u32 %v7006_v63, 16  ;;  %v834_v35 = vrot.slane %v829_v56, 4  ;;  %v414_v59 = vld [vmem:[#allocation2 + $0xc4] sm:$0x1]  ;;  %v2280_v58 = vld [vmem:[#allocation2 + $0xb0] sm:$0x1] }
 0x13a   : > { %v7039_v34 = vrot.slane %v1326_v17, 4  ;;  %v841_v47 = vor.u32 %v839_v7, %v838_v36  ;;  %v2498_v60 = vshrl.u32 %v2281_v42, 16  ;;  %v2501_v31 = vshll.u32 %v2281_v42, 16  ;;  %1636 = vst.msk [vmem:[#allocation3 + $0x30] sm:$0xf] %vm1631_vm10, %v1544_v32 }
 0x13b   : > { %v833_v43 = vsel %vm5760_vm8, %v5117_v14, %v832_v25  ;;  %v2507_v28 = vshll.u32 %v2282_v29, 16  ;;  %v2511_v37 = vshrl.u32 %v2282_v29, 16  ;;  %v415_v54 = vsel %vm5693_vm2, 0, %v414_v59  ;;  %v1124_v56 = vld [vmem:[#allocation2 + $0xa8] sm:$0xf] }
 0x13c   : > { %2790 = vst.msk [vmem:[#allocation3 + $0x40] sm:$0xf] %vm1067_vm9, %v2700_v18  ;;  %v8376_v42 = vsel %vm5708_vm3, %v6756_v8, %v6688_v51  ;;  %v3037_v17 = vrot.slane %v3035_v5, 7  ;;  %v1872_v7 = vshrl.u32 %v7011_v6, 16  ;;  %v1875_v14 = vshll.u32 %v7011_v6, 16  ;;  %v4086_v51 = vld [vmem:[#allocation3 + $0x138] sm:$0xff] }
 0x13d   : > { %1557 = vrot.lane.b32.xlu1 %v8376_v42, %s5546_s18  ;;  %905 = vst.msk [vmem:[#allocation3 + $0x168] sm:$0xf] %vm232_vm0, %v833_v43  ;;  %v842_v36 = vsel %vm5760_vm8, %v834_v35, %v841_v47  ;;  %416 = vst [vmem:[#allocation2 + $0xc4] sm:$0x1] %v415_v54  ;;  %v360_v29 = vld [vmem:[#allocation2 + $0xcc] sm:$0x8]  ;;  %v8377_v18 = vsel %vm5708_vm3, %v6734_v45, %v6672_v12  ;;  %v3227_v35 = vpop.permute.xlu1 %3226  ;;  %v1546_v43 = vpop.permute.xlu0 %1545 }
 0x13e   : > { %1555 = vrot.lane.b32.xlu0 %v8377_v18, %s5546_s18  ;;  %v2493_v5 = vshll.u32 %v2280_v58, 16  ;;  %v7068_v6 = vrot.slane %v1336_v9, 4  ;;  %v2839_v52 = vld [vmem:[#allocation2 + $0xb8] sm:$0x8]  ;;  %v1881_v25 = vshrl.u32 %v7029_v53, 16  ;;  %v2500_v59 = vrot.slane %v2498_v60, 4 }
 0x13f   : > { %906 = vst.msk [vmem:[#allocation3 + $0x174] sm:$0xf] %vm232_vm0, %v842_v36  ;;  %v2503_v32 = vrot.slane %v2501_v31, 5  ;;  %v1125_v47 = vld [vmem:[#allocation2 + $0xac] sm:$0xf]  ;;  %v1344_v12 = vshrl.u32 %v1124_v56, 16 }
 0x140   : > { %v361_v45 = vsel %vm5715_vm6, 0, %v360_v29  ;;  %3318 = vst.msk [vmem:[#allocation3 + $0x34] sm:$0xf] %vm1631_vm10, %v3227_v35  ;;  %v4088_v54 = vld [vmem:[#allocation3 + $0x144] sm:$0xff]  ;;  %v8378_v9 = vshll.u32 %v6967_v46, 16  ;;  %v7080_v18 = vrot.slane %v2507_v28, 5 }
 0x141   : > { %v5474_v58 = vld [vmem:[#allocation3 + $0x13c] ss:$12 sps:$4 sm:$0xff]   ;;  %v2513_v36 = vrot.slane %v2511_v37, 4  ;;  %v1347_v60 = vshll.u32 %v1124_v56, 16  ;;  %362 = vst [vmem:[#allocation2 + $0xcc] sm:$0x8] %v361_v45  ;;  %3240 = vrot.lane.b32.xlu1 %v6864_v26, %s5546_s18  ;;  %v5190_v31 = vcombine.low %v4086_v51, %v4088_v54  ;;  %v8379_v37 = vsel %vm5760_vm8, %v6828_v50, %v6797_v49  ;;  %v2073_v54 = vpop.permute.xlu1 %2072  ;;  %v3229_v8 = vpop.permute.xlu0 %3228 }
 0x142   : > { %v7078_v42 = vor.u32 %v8378_v9, %v7027_v3  ;;  %1637 = vst.msk [vmem:[#allocation3 + $0x3c] sm:$0xf] %vm1631_vm10, %v1546_v43  ;;  %v3033_v46 = vrot.slane %v7027_v3, 4  ;;  %v7090_v35 = vrot.slane %v1872_v7, 7  ;;  %v1126_v28 = vld [vmem:[#allocation2 + $0xb0] sm:$0x1]  ;;  %3238 = vrot.lane.b32.xlu0 %v8379_v37, %s5546_s18  ;;  %4674 = vmatprep.mubr.bf16.mxu1 %v5474_v58  ;;  %v3040_v56 = vor.u32 %v3038_v20, %v3037_v17 }
 0x143   : > { %v3021_v26 = vshrl.u32 %v2839_v52, 16  ;;  %v1353_v51 = vshll.u32 %v1125_v47, 16  ;;  %v1357_v45 = vshrl.u32 %v1125_v47, 16  ;;  %v7098_v43 = vld [vmem:[#allocation2 + $0xd0] sm:$0xf]  ;;  %4675 = vmatmul.mubr.bf16.gmra.mxu1 %v5190_v31  ;;  %v7100_v3 = vrot.slane %v2493_v5, 5 }
 0x144   : > { %v1883_v7 = vrot.slane %v1881_v25, 7  ;;  %v1884_v9 = vshll.u32 %v7029_v53, 16  ;;  %v2504_v29 = vor.u32 %v2503_v32, %v2500_v59  ;;  %2165 = vst.msk [vmem:[#allocation3 + $0x30] sm:$0xf] %vm2160_vm11, %v2073_v54  ;;  %v2514_v49 = vor.u32 %v2513_v36, %v7080_v18  ;;  %v455_v52 = vld [vmem:[#allocation2 + $0x5c] sm:$0xf] }
 0x145   : > { %v7105_v50 = vrot.slane %v1344_v12, 4  ;;  %v7107_v20 = vrot.slane %v1347_v60, 5  ;;  %v1363_v17 = vshll.u32 %v1126_v28, 16  ;;  %3319 = vst.msk [vmem:[#allocation3 + $0x40] sm:$0xf] %vm1631_vm10, %v3229_v8  ;;  %2086 = vrot.lane.b32.xlu1 %v6895_v2, %s5547_s6  ;;  %v7118_v59 = vrot.slane %v1867_v16, 11  ;;  %v3419_v36 = vpop.permute.xlu1 %3418  ;;  %v2075_v28 = vpop.permute.xlu0 %2074 }
 0x146   : > { %v3356_v5 = vld [vmem:[#allocation2 + $0x94] sm:$0xf]  ;;  %v3357_v25 = vld [vmem:[#allocation2 + $0x98] sm:$0xf]  ;;  %v7121_v32 = vor.u32 %v1875_v14, %v7090_v35  ;;  %v3048_v47 = vshrl.u32 %v7098_v43, 16  ;;  %v8382_v2 = vsel %vm5760_vm8, %v6813_v19, %v6824_v1  ;;  %v7130_v8 = vrot.slane %v3021_v26, 11 }
 0x147   : > { %8380 = vst [vmem:[#allocation5_spill] sm:$0xff] %v7118_v59  ;;  %2084 = vrot.lane.b32.xlu0 %v8382_v2, %s5547_s6  ;;  %v1879_v12 = vrot.slane %v7090_v35, 4  ;;  %v7133_v58 = vrot.slane %v1353_v51, 5  ;;  %v1359_v63 = vrot.slane %v1357_v45, 4  ;;  %v2201_v16 = vld [vmem:[#allocation2 + $0x6c] sm:$0xf]  ;;  %v7141_v60 = vsel %vm5760_vm8, %v3033_v46, %v3040_v56 }
 0x148   : > { %8381 = vst [vmem:[#allocation6_spill] sm:$0xff] %v7121_v32  ;;  %v7143_v19 = vrot.slane %v2504_v29, 4  ;;  %v7145_v1 = vld [vmem:[#allocation2 + $0xd4] sm:$0xf]  ;;  %v7147_v31 = vld [vmem:[#allocation2 + $0xbc] sm:$0xf]  ;;  %v1886_v26 = vor.u32 %v1884_v9, %v1883_v7  ;;  %v1350_v46 = vor.u32 %v7107_v20, %v7105_v50 }
 0x149   : > { %8383 = vst [vmem:[#allocation7_spill] sm:$0xff] %v7133_v58  ;;  %v594_v35 = vshrl.u32 %v455_v52, 16  ;;  %2233 = vst.msk [vmem:[#allocation3 + $0x64] sm:$0xf] %vm232_vm0, %v2201_v16  ;;  %v920_v37 = vld [vmem:[#allocation2 + $0x84] sm:$0xf]  ;;  %3432 = vrot.lane.b32.xlu1 %v3357_v25, %s5547_s6  ;;  %v1360_v50 = vor.u32 %v1359_v63, %v7133_v58 }
 0x14a   : > { %3510 = vst.msk [vmem:[#allocation3 + $0x34] sm:$0xf] %vm2160_vm11, %v3419_v36  ;;  %v7151_v51 = vrot.slane %v2514_v49, 4  ;;  %v7155_v56 = vrot.slane %v1363_v17, 5  ;;  %v1688_v29 = vld [vmem:[#allocation2 + $0xb8] sm:$0x8]  ;;  %v7178_v49 = vsel %vm5760_vm8, %v1879_v12, %v1886_v26 }
 0x14b   : > { %v2202_v45 = vld [vmem:[#allocation2 + $0x70] sm:$0xf]  ;;  %2166 = vst.msk [vmem:[#allocation3 + $0x3c] sm:$0xf] %vm2160_vm11, %v2075_v28  ;;  %v919_v54 = vld [vmem:[#allocation2 + $0x80] sm:$0xf]  ;;  %3430 = vrot.lane.b32.xlu0 %v3356_v5, %s5547_s6  ;;  %v3421_v5 = vpop.permute.xlu0 %3420 }
 0x14c   : > { %8384 = vst [vmem:[#allocation8_spill] sm:$0xff] %v7155_v56  ;;  %v2283_v2 = vld [vmem:[#allocation2 + $0xc4] sm:$0x1]  ;;  %v7159_v16 = vrot.slane %v3048_v47, 7  ;;  %v3051_v36 = vshll.u32 %v7098_v43, 16  ;;  %v596_v7 = vrot.slane %v594_v35, 7  ;;  %v1028_v43 = vpop.permute.xlu1 %1027 }
 0x14d   : > { %v597_v9 = vshll.u32 %v455_v52, 16  ;;  %2234 = vst.msk [vmem:[#allocation3 + $0x70] sm:$0xf] %vm232_vm0, %v2202_v45  ;;  %v3057_v20 = vshrl.u32 %v7145_v1, 16  ;;  %v1894_v17 = vshrl.u32 %v7147_v31, 16  ;;  %997 = vrot.lane.b32.xlu1 %v920_v37, %s5545_s4  ;;  %v8386_v63 = vrot.slane %v6150_v38, 4 }
 0x14e   : > { %v2284_v25 = vld [vmem:[#allocation2 + $0xd0] sm:$0xf]  ;;  %v2285_v47 = vld [vmem:[#allocation2 + $0xd4] sm:$0xf]  ;;  %v417_v53 = vld [vmem:[#allocation2 + $0xd8] sm:$0x1] }
 0x14f   : > { %v599_v35 = vor.u32 %v597_v9, %v596_v7  ;;  %v2522_v52 = vshrl.u32 %v2284_v25, 16  ;;  %v2525_v28 = vshll.u32 %v2284_v25, 16  ;;  %v2531_v45 = vshll.u32 %v2285_v47, 16  ;;  %1096 = vst.msk [vmem:[#allocation3 + $0x150] sm:$0xf] %vm1067_vm9, %v1028_v43  ;;  %995 = vrot.lane.b32.xlu0 %v919_v54, %s5545_s4 }
 0x150   : > { %v2535_v14 = vshrl.u32 %v2285_v47, 16  ;;  %v418_v7 = vsel %vm5693_vm2, 0, %v417_v53  ;;  %3511 = vst.msk [vmem:[#allocation3 + $0x40] sm:$0xf] %vm2160_vm11, %v3421_v5  ;;  %v7184_v9 = vrot.slane %v1350_v46, 4  ;;  %v3060_v25 = vshll.u32 %v7145_v1, 16 }
 0x151   : > { %v1889_v43 = vshrl.u32 %v1688_v29, 16  ;;  %v7187_v32 = vld [vmem:[#allocation2 + $0xc0] sm:$0xf]  ;;  %v600_v12 = vsel %vm5760_vm8, %v8386_v63, %v599_v35  ;;  %419 = vst [vmem:[#allocation2 + $0xd8] sm:$0x1] %v418_v7  ;;  %v2517_v53 = vshll.u32 %v2283_v2, 16  ;;  %v2746_v29 = vpop.permute.xlu1 %2745  ;;  %v1030_v63 = vpop.permute.xlu0 %1029  ;;  %v7207_v2 = vor.u32 %v3051_v36, %v7159_v16 }
 0x152   : > { %8385 = vst [vmem:[#allocation9_spill] sm:$0xff] %v7184_v9  ;;  %v7194_v26 = vrot.slane %v1360_v50, 4  ;;  %v3055_v37 = vrot.slane %v7159_v16, 4  ;;  %v3059_v46 = vrot.slane %v3057_v20, 7  ;;  %884 = vst.msk [vmem:[#allocation3 + $0x6c] sm:$0xf] %vm232_vm0, %v600_v12 }
 0x153   : > { %v1127_v1 = vld [vmem:[#allocation2 + $0xbc] sm:$0xf]  ;;  %v2842_v47 = vld [vmem:[#allocation2 + $0xcc] sm:$0x8]  ;;  %v7198_v5 = vrot.slane %v1894_v17, 7  ;;  %v1897_v38 = vshll.u32 %v7147_v31, 16  ;;  %v8387_v31 = vsel %vm5708_vm3, %v6878_v44, %v6945_v55 }
 0x154   : > { %v2524_v59 = vrot.slane %v2522_v52, 4  ;;  %v2527_v35 = vrot.slane %v2525_v28, 5  ;;  %2813 = vst.msk [vmem:[#allocation3 + $0x154] sm:$0xf] %vm1067_vm9, %v2746_v29  ;;  %v7209_v50 = vrot.slane %v2531_v45, 5  ;;  %v2537_v20 = vrot.slane %v2535_v14, 4  ;;  %2715 = vrot.lane.b32.xlu1 %v8387_v31, %s5545_s4 }
 0x155   : > { %v1128_v17 = vld [vmem:[#allocation2 + $0xc0] sm:$0xf]  ;;  %1097 = vst.msk [vmem:[#allocation3 + $0x15c] sm:$0xf] %vm1067_vm9, %v1030_v63  ;;  %v7222_v16 = vrot.slane %v1889_v43, 11  ;;  %v1368_v36 = vshrl.u32 %v1127_v1, 16  ;;  %v8388_v14 = vsel %vm5708_vm3, %v6834_v57, %v6789_v61  ;;  %v3062_v55 = vor.u32 %v3060_v25, %v3059_v46  ;;  %v1592_v29 = vpop.permute.xlu1 %1591  ;;  %v2748_v57 = vpop.permute.xlu0 %2747 }
 0x156   : > { %v1371_v28 = vshll.u32 %v1127_v1, 16  ;;  %2713 = vrot.lane.b32.xlu0 %v8388_v14, %s5545_s4  ;;  %v7230_v45 = vrot.slane %v2517_v53, 5  ;;  %v3043_v44 = vshrl.u32 %v2842_v47, 16  ;;  %v1903_v7 = vshrl.u32 %v7187_v32, 16  ;;  %v363_v12 = vld [vmem:[#allocation2 + $0xe0] sm:$0x8] }
 0x157   : > { %v4042_v63 = vld [vmem:[#allocation3 + $0x30] sm:$0xff]  ;;  %v1377_v1 = vshll.u32 %v1128_v17, 16  ;;  %v1381_v31 = vshrl.u32 %v1128_v17, 16  ;;  %v1129_v52 = vld [vmem:[#allocation2 + $0xc4] sm:$0x1]  ;;  %v364_v61 = vsel %vm5715_vm6, 0, %v363_v12  ;;  %v7241_v46 = vor.u32 %v1897_v38, %v7198_v5 }
 0x158   : > { %1660 = vst.msk [vmem:[#allocation3 + $0x150] sm:$0xf] %vm1631_vm10, %v1592_v29  ;;  %v4044_v25 = vld [vmem:[#allocation3 + $0x3c] sm:$0xff]  ;;  %v2528_v14 = vor.u32 %v2527_v35, %v2524_v59  ;;  %v2538_v54 = vor.u32 %v2537_v20, %v7209_v50  ;;  %365 = vst [vmem:[#allocation2 + $0xe0] sm:$0x8] %v364_v61  ;;  %1561 = vrot.lane.b32.xlu1 %v8389_v24, %s5546_s18  ;;  %v1370_v12 = vrot.slane %v1368_v36, 4 }
 0x159   : > { %v5476_v53 = vld [vmem:[#allocation3 + $0x34] ss:$12 sps:$4 sm:$0xff]   ;;  %v3538_v43 = vld [vmem:[#allocation2 + $0x30] sm:$0xf]  ;;  %2814 = vst.msk [vmem:[#allocation3 + $0x160] sm:$0xf] %vm1067_vm9, %v2748_v57  ;;  %v5157_v17 = vcombine.low %v4042_v63, %v4044_v25  ;;  %v8390_v59 = vsel %vm5708_vm3, %v6921_v33, %v6836_v13  ;;  %v7265_v39 = vsel %vm5760_vm8, %v3055_v37, %v3062_v55  ;;  %v1594_v25 = vpop.permute.xlu0 %1593 }
 0x15a   : > { %v1373_v29 = vrot.slane %v1371_v28, 5  ;;  %v3539_v47 = vld [vmem:[#allocation2 + $0x34] sm:$0xf]  ;;  %1559 = vrot.lane.b32.xlu0 %v8390_v59, %s5546_s18  ;;  %4586 = vmatprep.mubr.bf16.mxu0 %v5476_v53  ;;  %8391 = vst [vmem:[#allocation10_spill] sm:$0xff] %v7265_v39  ;;  %v7267_v35 = vrot.slane %v1903_v7, 7  ;;  %v1387_v20 = vshll.u32 %v1129_v52, 16  ;;  %v3275_v28 = vpop.permute.xlu1 %3274 }
 0x15b   : > { %v3540_v36 = vld [vmem:[#allocation2 + $0x38] sm:$0x1]  ;;  %4587 = vmatmul.mubr.bf16.gmra.mxu0 %v5157_v17  ;;  %v7269_v63 = vrot.slane %v3043_v44, 11  ;;  %v7271_v13 = vrot.slane %v1377_v1, 5  ;;  %v1383_v33 = vrot.slane %v1381_v31, 4  ;;  %v3587_v61 = vshrl.u32 %v3538_v43, 16 }
 0x15c   : > { %v3541_v57 = vld [vmem:[#allocation2 + $0x44] sm:$0xf]  ;;  %3342 = vst.msk [vmem:[#allocation3 + $0x154] sm:$0xf] %vm1631_vm10, %v3275_v28  ;;  %v7274_v53 = vrot.slane %v2528_v14, 4  ;;  %v7276_v37 = vrot.slane %v2538_v54, 4  ;;  %3244 = vrot.lane.b32.xlu1 %v6979_v40, %s5546_s18  ;;  %v1374_v44 = vor.u32 %v1373_v29, %v1370_v12  ;;  %v8392_v54 = vsel %vm5760_vm8, %v6975_v10, %v6959_v48 }
 0x15d   : > { %v3590_v55 = vshll.u32 %v3538_v43, 16  ;;  %v3596_v7 = vshll.u32 %v3539_v47, 16  ;;  %v3542_v52 = vld [vmem:[#allocation2 + $0x48] sm:$0xf]  ;;  %1661 = vst.msk [vmem:[#allocation3 + $0x15c] sm:$0xf] %vm1631_vm10, %v1594_v25  ;;  %v1384_v29 = vor.u32 %v1383_v33, %v7271_v13  ;;  %v3277_v27 = vpop.permute.xlu0 %3276 }
 0x15e   : > { %v7281_v1 = vld [vmem:[#allocation2 + $0xe4] sm:$0xf]  ;;  %v3589_v31 = vrot.slane %v3587_v61, 4  ;;  %v3600_v24 = vshrl.u32 %v3539_v47, 16  ;;  %v3606_v17 = vshll.u32 %v3540_v36, 16  ;;  %3242 = vrot.lane.b32.xlu0 %v8392_v54, %s5546_s18  ;;  %v7291_v14 = vrot.slane %v1387_v20, 5  ;;  %v2121_v12 = vpop.permute.xlu1 %2120 }
 0x15f   : > { %v7289_v43 = vld [vmem:[#allocation2 + $0xd8] sm:$0x1]  ;;  %v3592_v59 = vrot.slane %v3590_v55, 5  ;;  %v3598_v28 = vrot.slane %v3596_v7, 5  ;;  %v3611_v40 = vshrl.u32 %v3541_v57, 16  ;;  %v3614_v36 = vshll.u32 %v3541_v57, 16 }
 0x160   : > { %v3602_v61 = vrot.slane %v3600_v24, 4  ;;  %v3543_v47 = vld [vmem:[#allocation2 + $0x4c] sm:$0x1]  ;;  %v3620_v25 = vshll.u32 %v3542_v52, 16  ;;  %2189 = vst.msk [vmem:[#allocation3 + $0x150] sm:$0xf] %vm2160_vm11, %v2121_v12  ;;  %2090 = vrot.lane.b32.xlu1 %v6987_v0, %s5547_s6 }
 0x161   : > { %v3070_v48 = vshrl.u32 %v7281_v1, 16  ;;  %v3593_v10 = vor.u32 %v3592_v59, %v3589_v31  ;;  %v3608_v54 = vrot.slane %v3606_v17, 5  ;;  %v3613_v38 = vrot.slane %v3611_v40, 4  ;;  %3343 = vst.msk [vmem:[#allocation3 + $0x160] sm:$0xf] %vm1631_vm10, %v3277_v27  ;;  %v8393_v12 = vld [vmem:[#allocation4_spill] sm:$0xff]  ;;  %v2123_v9 = vpop.permute.xlu0 %2122 }
 0x162   : > { %v3358_v20 = vld [vmem:[#allocation2 + $0xa8] sm:$0xf]  ;;  %v3603_v33 = vor.u32 %v3602_v61, %v3598_v28  ;;  %v3616_v7 = vrot.slane %v3614_v36, 5  ;;  %v3622_v57 = vrot.slane %v3620_v25, 5  ;;  %v3624_v24 = vshrl.u32 %v3542_v52, 16  ;;  %v3467_v39 = vpop.permute.xlu1 %3466 }
 0x163   : > { %v7299_v55 = vld [vmem:[#allocation2 + $0xe8] sm:$0xf]  ;;  %v8394_v31 = vsel %vm5760_vm8, %v6933_v62, %v8393_v12  ;;  %v3359_v17 = vld [vmem:[#allocation2 + $0xac] sm:$0xf]  ;;  %v2541_v27 = vshll.u32 %v7289_v43, 16  ;;  %v7308_v59 = vrot.slane %v1374_v44, 4 }
 0x164   : > { %2088 = vrot.lane.b32.xlu0 %v8394_v31, %s5547_s6  ;;  %v3594_v0 = vrot.slane %v3593_v10, 4  ;;  %v3630_v40 = vshll.u32 %v3543_v47, 16  ;;  %v7310_v58 = vrot.slane %v1384_v29, 4  ;;  %v3604_v61 = vrot.slane %v3603_v33, 4  ;;  %v457_v25 = vld [vmem:[#allocation2 + $0x6c] sm:$0xf]  ;;  %3436 = vrot.lane.b32.xlu1 %v3359_v17, %s5547_s6 }
 0x165   : > { %v3617_v36 = vor.u32 %v3616_v7, %v3613_v38  ;;  %v3626_v52 = vrot.slane %v3624_v24, 4  ;;  %3534 = vst.msk [vmem:[#allocation3 + $0x154] sm:$0xf] %vm2160_vm11, %v3467_v39  ;;  %v7313_v56 = vrot.slane %v3070_v48, 7  ;;  %v3073_v62 = vshll.u32 %v7281_v1, 16 }
 0x166   : > { %v3079_v43 = vshrl.u32 %v7299_v55, 16  ;;  %v3599_v44 = vsel %vm5708_vm3, %v3594_v0, %v3598_v28  ;;  %2190 = vst.msk [vmem:[#allocation3 + $0x15c] sm:$0xf] %vm2160_vm11, %v2123_v9  ;;  %v921_v29 = vld [vmem:[#allocation2 + $0x94] sm:$0xf]  ;;  %v3609_v47 = vsel %vm5708_vm3, %v3604_v61, %v3608_v54  ;;  %v3632_v10 = vrot.slane %v3630_v40, 5  ;;  %v2702_v17 = vpop.permute.xlu1 %2701 }
 0x167   : > { %v922_v38 = vld [vmem:[#allocation2 + $0x98] sm:$0xf]  ;;  %4002 = vst.msk [vmem:[#allocation3 + $0x8] sm:$0xf] %vm232_vm0, %v3599_v44  ;;  %v3618_v39 = vrot.slane %v3617_v36, 4  ;;  %v3627_v48 = vor.u32 %v3626_v52, %v3622_v57  ;;  %v8395_v28 = vshll.u32 %v7187_v32, 16  ;;  %v3469_v36 = vpop.permute.xlu0 %3468 }
 0x168   : > { %v456_v33 = vld [vmem:[#allocation2 + $0x68] sm:$0x8]  ;;  %3434 = vrot.lane.b32.xlu0 %v3358_v20, %s5547_s6  ;;  %v3082_v24 = vshll.u32 %v7299_v55, 16  ;;  %4003 = vst.msk [vmem:[#allocation3 + $0x14] sm:$0xf] %vm232_vm0, %v3609_v47  ;;  %v607_v54 = vshrl.u32 %v457_v25, 16  ;;  %1001 = vrot.lane.b32.xlu1 %v922_v38, %s5545_s4 }
 0x169   : > { %v1908_v7 = vor.u32 %v8395_v28, %v7267_v35  ;;  %v458_v12 = vld [vmem:[#allocation2 + $0x70] sm:$0xf]  ;;  %v3544_v31 = vld [vmem:[#allocation2 + $0x58] sm:$0xf]  ;;  %v7338_v0 = vld [vmem:[#allocation2 + $0xe0] sm:$0x8]  ;;  %v3623_v40 = vsel %vm5708_vm3, %v3618_v39, %v3622_v57 }
 0x16a   : > { %v3628_v32 = vrot.slane %v3627_v48, 4  ;;  %v610_v35 = vshll.u32 %v457_v25, 16  ;;  %v2203_v61 = vld [vmem:[#allocation2 + $0x80] sm:$0xf]  ;;  %2791 = vst.msk [vmem:[#allocation3 + $0x4c] sm:$0xf] %vm1067_vm9, %v2702_v17 }
 0x16b   : > { %v7343_v52 = vrot.slane %v2541_v27, 5  ;;  %4004 = vst.msk [vmem:[#allocation3 + $0x20] sm:$0xf] %vm232_vm0, %v3623_v40  ;;  %v609_v47 = vrot.slane %v607_v54, 7  ;;  %v602_v28 = vshrl.u32 %v456_v33, 16  ;;  %v616_v25 = vshrl.u32 %v458_v12, 16 }
 0x16c   : > { %2235 = vst.msk [vmem:[#allocation3 + $0x7c] sm:$0xf] %vm232_vm0, %v2203_v61  ;;  %v3633_v57 = vsel %vm5708_vm3, %v3628_v32, %v3632_v10  ;;  %v619_v39 = vshll.u32 %v458_v12, 16  ;;  %v3545_v48 = vld [vmem:[#allocation2 + $0x5c] sm:$0xf]  ;;  %v3635_v27 = vshrl.u32 %v3544_v31, 16  ;;  %999 = vrot.lane.b32.xlu0 %v921_v29, %s5545_s4  ;;  %v1548_v32 = vpop.permute.xlu1 %1547 }
 0x16d   : > { %3535 = vst.msk [vmem:[#allocation3 + $0x160] sm:$0xf] %vm2160_vm11, %v3469_v36  ;;  %v8396_v17 = vrot.slane %v7198_v5, 4  ;;  %v3065_v54 = vshrl.u32 %v7338_v0, 16  ;;  %v612_v38 = vor.u32 %v610_v35, %v609_v47  ;;  %v5107_v40 = vrot.slane %v602_v28, 11  ;;  %v2704_v5 = vpop.permute.xlu0 %2703 }
 0x16e   : > { %4005 = vst.msk [vmem:[#allocation3 + $0x2c] sm:$0xf] %vm232_vm0, %v3633_v57  ;;  %v3546_v61 = vld [vmem:[#allocation2 + $0x60] sm:$0x1]  ;;  %v2204_v10 = vld [vmem:[#allocation2 + $0x84] sm:$0xf] }
 0x16f   : > { %v7357_v33 = vsel %vm5760_vm8, %v8396_v17, %v1908_v7  ;;  %v614_v12 = vrot.slane %v609_v47, 4  ;;  %v618_v36 = vrot.slane %v616_v25, 7  ;;  %v3637_v9 = vrot.slane %v3635_v27, 4  ;;  %v3547_v29 = vld [vmem:[#allocation2 + $0x6c] sm:$0xf]  ;;  %v4090_v25 = vld [vmem:[#allocation3 + $0x150] sm:$0xff] }
 0x170   : > { %v3638_v20 = vshll.u32 %v3544_v31, 16  ;;  %2236 = vst.msk [vmem:[#allocation3 + $0x88] sm:$0xf] %vm232_vm0, %v2204_v10  ;;  %v613_v35 = vsel %vm5760_vm8, %v5107_v40, %v612_v38  ;;  %v3644_v28 = vshll.u32 %v3545_v48, 16  ;;  %v3648_v57 = vshrl.u32 %v3545_v48, 16 }
 0x171   : > { %1638 = vst.msk [vmem:[#allocation3 + $0x48] sm:$0xf] %vm1631_vm10, %v1548_v32  ;;  %v3548_v47 = vld [vmem:[#allocation2 + $0x70] sm:$0xf]  ;;  %v8397_v31 = vsel %vm5708_vm3, %v7002_v41, %v7100_v3  ;;  %v621_v48 = vor.u32 %v619_v39, %v618_v36  ;;  %v3654_v38 = vshll.u32 %v3546_v61, 16  ;;  %v8398_v40 = vsel %vm5708_vm3, %v7000_v23, %v6943_v22  ;;  %v1550_v36 = vpop.permute.xlu0 %1549 }
 0x172   : > { %2792 = vst.msk [vmem:[#allocation3 + $0x58] sm:$0xf] %vm1067_vm9, %v2704_v5  ;;  %2719 = vrot.lane.b32.xlu1 %v8397_v31, %s5545_s4  ;;  %v7380_v27 = vld [vmem:[#allocation2 + $0xd0] sm:$0xf]  ;;  %v3640_v17 = vrot.slane %v3638_v20, 5  ;;  %2717 = vrot.lane.b32.xlu0 %v8398_v40, %s5545_s4  ;;  %v3646_v41 = vrot.slane %v3644_v28, 5  ;;  %v3231_v31 = vpop.permute.xlu1 %3230 }
 0x173   : > { %885 = vst.msk [vmem:[#allocation3 + $0x78] sm:$0xf] %vm232_vm0, %v613_v35  ;;  %v3650_v3 = vrot.slane %v3648_v57, 4  ;;  %v3549_v10 = vld [vmem:[#allocation2 + $0x74] sm:$0x1]  ;;  %v3659_v32 = vshrl.u32 %v3547_v29, 16  ;;  %v622_v35 = vsel %vm5760_vm8, %v614_v12, %v621_v48 }
 0x174   : > { %v3662_v5 = vshll.u32 %v3547_v29, 16  ;;  %v3641_v39 = vor.u32 %v3640_v17, %v3637_v9  ;;  %v3656_v20 = vrot.slane %v3654_v38, 5  ;;  %v3668_v61 = vshll.u32 %v3548_v47, 16  ;;  %3320 = vst.msk [vmem:[#allocation3 + $0x4c] sm:$0xf] %vm1631_vm10, %v3231_v31  ;;  %v4092_v7 = vld [vmem:[#allocation3 + $0x15c] sm:$0xff] }
 0x175   : > { %v5478_v44 = vld [vmem:[#allocation3 + $0x154] ss:$12 sps:$4 sm:$0xff]   ;;  %v7392_v22 = vld [vmem:[#allocation2 + $0xcc] sm:$0x8]  ;;  %886 = vst.msk [vmem:[#allocation3 + $0x84] sm:$0xf] %vm232_vm0, %v622_v35  ;;  %v3651_v23 = vor.u32 %v3650_v3, %v3646_v41  ;;  %v8399_v9 = vsel %vm5708_vm3, %v7068_v6, %v7004_v15  ;;  %v5193_v12 = vcombine.low %v4090_v25, %v4092_v7 }
 0x176   : > { %v3661_v28 = vrot.slane %v3659_v32, 4  ;;  %v3664_v29 = vrot.slane %v3662_v5, 5  ;;  %v3672_v57 = vshrl.u32 %v3548_v47, 16  ;;  %1639 = vst.msk [vmem:[#allocation3 + $0x54] sm:$0xf] %vm1631_vm10, %v1550_v36  ;;  %1565 = vrot.lane.b32.xlu1 %v8399_v9, %s5546_s18  ;;  %v1916_v48 = vshrl.u32 %v7380_v27, 16  ;;  %4682 = vmatprep.mubr.bf16.mxu1 %v5478_v44  ;;  %v2077_v15 = vpop.permute.xlu1 %2076 }
 0x177   : > { %v3642_v17 = vrot.slane %v3641_v39, 4  ;;  %v3670_v38 = vrot.slane %v3668_v61, 5  ;;  %v8400_v47 = vsel %vm5708_vm3, %v7039_v34, %v6991_v30  ;;  %v3652_v40 = vrot.slane %v3651_v23, 4  ;;  %v7409_v31 = vld [vmem:[#allocation2 + $0xe4] sm:$0xf]  ;;  %4683 = vmatmul.mubr.bf16.gmra.mxu1 %v5193_v12 }
 0x178   : > { %1563 = vrot.lane.b32.xlu0 %v8400_v47, %s5546_s18  ;;  %v3665_v3 = vor.u32 %v3664_v29, %v3661_v28  ;;  %v3674_v32 = vrot.slane %v3672_v57, 4  ;;  %v3678_v5 = vshll.u32 %v3549_v10, 16  ;;  %v7417_v7 = vrot.slane %v3065_v54, 11  ;;  %v7423_v34 = vld [vmem:[#allocation2 + $0xd4] sm:$0xf]  ;;  %v3233_v10 = vpop.permute.xlu0 %3232 }
 0x179   : > { %v7421_v30 = vrot.slane %v3079_v43, 7  ;;  %v3647_v44 = vsel %vm5708_vm3, %v3642_v17, %v3646_v41  ;;  %v420_v25 = vld [vmem:[#allocation2 + $0xec] sm:$0x1]  ;;  %2167 = vst.msk [vmem:[#allocation3 + $0x48] sm:$0xf] %vm2160_vm11, %v2077_v15  ;;  %v3657_v35 = vsel %vm5708_vm3, %v3652_v40, %v3656_v20  ;;  %v1911_v41 = vshrl.u32 %v7392_v22, 16 }
 0x17a   : > { %4006 = vst.msk [vmem:[#allocation3 + $0x38] sm:$0xf] %vm232_vm0, %v3647_v44  ;;  %v3666_v0 = vrot.slane %v3665_v3, 4  ;;  %v3675_v54 = vor.u32 %v3674_v32, %v3670_v38  ;;  %v3680_v39 = vrot.slane %v3678_v5, 5  ;;  %v3550_v61 = vld [vmem:[#allocation2 + $0x80] sm:$0xf]  ;;  %3248 = vrot.lane.b32.xlu1 %v7141_v60, %s5546_s18  ;;  %v8401_v29 = vsel %vm5760_vm8, %v7130_v8, %v7078_v42  ;;  %v3423_v17 = vpop.permute.xlu1 %3422 }
 0x17b   : > { %v3551_v43 = vld [vmem:[#allocation2 + $0x84] sm:$0xf]  ;;  %3321 = vst.msk [vmem:[#allocation3 + $0x58] sm:$0xf] %vm1631_vm10, %v3233_v10  ;;  %v7435_v36 = vrot.slane %v1916_v48, 7  ;;  %v1919_v23 = vshll.u32 %v7380_v27, 16 }
 0x17c   : > { %4007 = vst.msk [vmem:[#allocation3 + $0x44] sm:$0xf] %vm232_vm0, %v3657_v35  ;;  %v2546_v20 = vshrl.u32 %v7409_v31, 16  ;;  %v3552_v28 = vld [vmem:[#allocation2 + $0x88] sm:$0x1]  ;;  %3246 = vrot.lane.b32.xlu0 %v8401_v29, %s5546_s18  ;;  %v3671_v60 = vsel %vm5708_vm3, %v3666_v0, %v3670_v38  ;;  %v3676_v57 = vrot.slane %v3675_v54, 4  ;;  %v2079_v32 = vpop.permute.xlu0 %2078 }
 0x17d   : > { %v2288_v9 = vld [vmem:[#allocation2 + $0xe8] sm:$0xf]  ;;  %v421_v12 = vsel %vm5693_vm2, 0, %v420_v25  ;;  %v3683_v48 = vshrl.u32 %v3550_v61, 16  ;;  %v1925_v47 = vshrl.u32 %v7423_v34, 16  ;;  %v2549_v40 = vshll.u32 %v7409_v31, 16 }
 0x17e   : > { %4008 = vst.msk [vmem:[#allocation3 + $0x50] sm:$0xf] %vm232_vm0, %v3671_v60  ;;  %422 = vst [vmem:[#allocation2 + $0xec] sm:$0x1] %v421_v12  ;;  %v3686_v3 = vshll.u32 %v3550_v61, 16  ;;  %v3692_v42 = vshll.u32 %v3551_v43, 16  ;;  %v3681_v38 = vsel %vm5708_vm3, %v3676_v57, %v3680_v39  ;;  %2094 = vrot.lane.b32.xlu1 %v7178_v49, %s5547_s6  ;;  %v7513_v55 = vor.u32 %v1919_v23, %v7435_v36 }
 0x17f   : > { %v3553_v8 = vld [vmem:[#allocation2 + $0x94] sm:$0xf]  ;;  %3512 = vst.msk [vmem:[#allocation3 + $0x4c] sm:$0xf] %vm2160_vm11, %v3423_v17  ;;  %v3685_v5 = vrot.slane %v3683_v48, 4  ;;  %v3696_v15 = vshrl.u32 %v3551_v43, 16  ;;  %v1032_v48 = vpop.permute.xlu1 %1031  ;;  %v8406_v23 = vsel %vm5708_vm3, %v7143_v19, %v7080_v18 }
 0x180   : > { %v3702_v44 = vshll.u32 %v3552_v28, 16  ;;  %v3554_v25 = vld [vmem:[#allocation2 + $0x98] sm:$0xf]  ;;  %2168 = vst.msk [vmem:[#allocation3 + $0x54] sm:$0xf] %vm2160_vm11, %v2079_v32  ;;  %v7460_v35 = vrot.slane %v2546_v20, 4  ;;  %v7471_v20 = vor.u32 %v3073_v62, %v7313_v56 }
 0x181   : > { %v3360_v31 = vld [vmem:[#allocation2 + $0xbc] sm:$0xf]  ;;  %v3361_v10 = vld [vmem:[#allocation2 + $0xc0] sm:$0xf]  ;;  %4009 = vst.msk [vmem:[#allocation3 + $0x5c] sm:$0xf] %vm232_vm0, %v3681_v38  ;;  %v3425_v38 = vpop.permute.xlu0 %3424 }
 0x182   : > { %v2555_v0 = vshll.u32 %v2288_v9, 16  ;;  %v3688_v54 = vrot.slane %v3686_v3, 5  ;;  %v3694_v61 = vrot.slane %v3692_v42, 5  ;;  %v8402_v39 = vld [vmem:[#allocation5_spill] sm:$0xff]  ;;  %v8403_v43 = vld [vmem:[#allocation6_spill] sm:$0xff]  ;;  %v2559_v29 = vshrl.u32 %v2288_v9, 16  ;;  %3440 = vrot.lane.b32.xlu1 %v3361_v10, %s5547_s6 }
 0x183   : > { %v8404_v28 = vsel %vm5760_vm8, %v8402_v39, %v8403_v43  ;;  %v3698_v60 = vrot.slane %v3696_v15, 4  ;;  %v3555_v57 = vld [vmem:[#allocation2 + $0x9c] sm:$0x1]  ;;  %v3707_v49 = vshrl.u32 %v3553_v8, 16  ;;  %v3710_v12 = vshll.u32 %v3553_v8, 16 }
 0x184   : > { %2092 = vrot.lane.b32.xlu0 %v8404_v28, %s5547_s6  ;;  %v2551_v17 = vrot.slane %v2549_v40, 5  ;;  %v3689_v3 = vor.u32 %v3688_v54, %v3685_v5  ;;  %v3716_v42 = vshll.u32 %v3554_v25, 16  ;;  %v1130_v32 = vld [vmem:[#allocation2 + $0xd0] sm:$0xf]  ;;  %1098 = vst.msk [vmem:[#allocation3 + $0x168] sm:$0xf] %vm1067_vm9, %v1032_v48 }
 0x185   : > { %v3699_v39 = vor.u32 %v3698_v60, %v3694_v61  ;;  %v3704_v43 = vrot.slane %v3702_v44, 5  ;;  %v3709_v9 = vrot.slane %v3707_v49, 4  ;;  %v3712_v15 = vrot.slane %v3710_v12, 5  ;;  %3513 = vst.msk [vmem:[#allocation3 + $0x58] sm:$0xf] %vm2160_vm11, %v3425_v38  ;;  %v2750_v60 = vpop.permute.xlu1 %2749 }
 0x186   : > { %v924_v8 = vld [vmem:[#allocation2 + $0xac] sm:$0xf]  ;;  %v3690_v28 = vrot.slane %v3689_v3, 4  ;;  %v3718_v1 = vrot.slane %v3716_v42, 5  ;;  %v3720_v62 = vshrl.u32 %v3554_v25, 16  ;;  %v3726_v6 = vshll.u32 %v3555_v57, 16  ;;  %v1034_v42 = vpop.permute.xlu0 %1033 }
 0x187   : > { %v7477_v40 = vrot.slane %v2555_v0, 5  ;;  %v2561_v5 = vrot.slane %v2559_v29, 4  ;;  %v3700_v54 = vrot.slane %v3699_v39, 4  ;;  %v3713_v48 = vor.u32 %v3712_v15, %v3709_v9  ;;  %v923_v44 = vld [vmem:[#allocation2 + $0xa8] sm:$0xf]  ;;  %1005 = vrot.lane.b32.xlu1 %v924_v8, %s5545_s4 }
 0x188   : > { %3438 = vrot.lane.b32.xlu0 %v3360_v31, %s5547_s6  ;;  %v2552_v49 = vor.u32 %v2551_v17, %v7460_v35  ;;  %v2289_v12 = vld [vmem:[#allocation2 + $0xec] sm:$0x1]  ;;  %v3695_v10 = vsel %vm5708_vm3, %v3690_v28, %v3694_v61  ;;  %v3722_v38 = vrot.slane %v3720_v62, 4  ;;  %v1392_v3 = vshrl.u32 %v1130_v32, 16  ;;  %2815 = vst.msk [vmem:[#allocation3 + $0x16c] sm:$0xf] %vm1067_vm9, %v2750_v60 }
 0x189   : > { %v1927_v25 = vrot.slane %v1925_v47, 7  ;;  %v1928_v31 = vshll.u32 %v7423_v34, 16  ;;  %v3705_v0 = vsel %vm5708_vm3, %v3700_v54, %v3704_v43  ;;  %4010 = vst.msk [vmem:[#allocation3 + $0x68] sm:$0xf] %vm232_vm0, %v3695_v10  ;;  %v3714_v29 = vrot.slane %v3713_v48, 4  ;;  %v1596_v22 = vpop.permute.xlu1 %1595 }
 0x18a   : > { %1099 = vst.msk [vmem:[#allocation3 + $0x174] sm:$0xf] %vm1067_vm9, %v1034_v42  ;;  %v7491_v35 = vrot.slane %v1911_v41, 11  ;;  %v3723_v61 = vor.u32 %v3722_v38, %v3718_v1  ;;  %v3728_v47 = vrot.slane %v3726_v6, 5  ;;  %v1395_v57 = vshll.u32 %v1130_v32, 16  ;;  %v4046_v41 = vld [vmem:[#allocation3 + $0x48] sm:$0xff] }
 0x18b   : > { %4011 = vst.msk [vmem:[#allocation3 + $0x74] sm:$0xf] %vm232_vm0, %v3705_v0  ;;  %v1923_v34 = vrot.slane %v7435_v36, 4  ;;  %v2562_v17 = vor.u32 %v2561_v5, %v7477_v40  ;;  %v2565_v39 = vshll.u32 %v2289_v12, 16  ;;  %v3719_v43 = vsel %vm5708_vm3, %v3714_v29, %v3718_v1  ;;  %v1131_v9 = vld [vmem:[#allocation2 + $0xd4] sm:$0xf]  ;;  %v2752_v5 = vpop.permute.xlu0 %2751 }
 0x18c   : > { %1003 = vrot.lane.b32.xlu0 %v923_v44, %s5545_s4  ;;  %v1132_v15 = vld [vmem:[#allocation2 + $0xd8] sm:$0x1]  ;;  %v3084_v8 = vor.u32 %v3082_v24, %v7421_v30  ;;  %v7502_v6 = vrot.slane %v2552_v49, 4  ;;  %v3724_v32 = vrot.slane %v3723_v61, 4  ;;  %4012 = vst.msk [vmem:[#allocation3 + $0x80] sm:$0xf] %vm232_vm0, %v3719_v43  ;;  %v2544_v48 = vsel %vm5708_vm3, %v7276_v37, %v7343_v52 }
 0x18d   : > { %v1394_v28 = vrot.slane %v1392_v3, 4  ;;  %v2848_v62 = vld [vmem:[#allocation2 + $0xf4] sm:$0x8]  ;;  %1662 = vst.msk [vmem:[#allocation3 + $0x168] sm:$0xf] %vm1631_vm10, %v1596_v22  ;;  %v4048_v54 = vld [vmem:[#allocation3 + $0x54] sm:$0xff]  ;;  %v1930_v24 = vor.u32 %v1928_v31, %v1927_v25  ;;  %v8405_v44 = vsel %vm5708_vm3, %v7151_v51, %v7230_v45  ;;  %v3279_v25 = vpop.permute.xlu1 %3278 }
 0x18e   : > { %v5480_v1 = vld [vmem:[#allocation3 + $0x4c] ss:$12 sps:$4 sm:$0xff]   ;;  %v1397_v30 = vrot.slane %v1395_v57, 5  ;;  %v3556_v60 = vld [vmem:[#allocation2 + $0xa8] sm:$0xf]  ;;  %2723 = vrot.lane.b32.xlu1 %v8405_v44, %s5545_s4  ;;  %v5160_v49 = vcombine.low %v4046_v41, %v4048_v54  ;;  %v3729_v12 = vsel %vm5708_vm3, %v3724_v32, %v3728_v47  ;;  %v1401_v10 = vshll.u32 %v1131_v9, 16 }
 0x18f   : > { %2816 = vst.msk [vmem:[#allocation3 + $0x178] sm:$0xf] %vm1067_vm9, %v2752_v5  ;;  %v1405_v27 = vshrl.u32 %v1131_v9, 16  ;;  %v7524_v36 = vld [vmem:[#allocation2 + $0xf8] sm:$0xf]  ;;  %4594 = vmatprep.mubr.bf16.mxu0 %v5480_v1  ;;  %v7532_v38 = vrot.slane %v2562_v17, 4  ;;  %v1598_v47 = vpop.permute.xlu0 %1597  ;;  %v7556_v17 = vsel %vm5760_vm8, %v1923_v34, %v1930_v24 }
 0x190   : > { %2721 = vrot.lane.b32.xlu0 %v8406_v23, %s5545_s4  ;;  %v7534_v51 = vrot.slane %v2565_v39, 5  ;;  %4013 = vst.msk [vmem:[#allocation3 + $0x8c] sm:$0xf] %vm232_vm0, %v3729_v12  ;;  %v1411_v45 = vshll.u32 %v1132_v15, 16  ;;  %v3087_v3 = vshrl.u32 %v2848_v62, 16  ;;  %4595 = vmatmul.mubr.bf16.gmra.mxu0 %v5160_v49  ;;  %v8407_v18 = vrot.slane %v7313_v56, 4 }
 0x191   : > { %v7537_v42 = vld [vmem:[#allocation2 + $0xfc] sm:$0xf]  ;;  %v3557_v0 = vld [vmem:[#allocation2 + $0xac] sm:$0xf]  ;;  %v3731_v29 = vshrl.u32 %v3556_v60, 16  ;;  %v3734_v61 = vshll.u32 %v3556_v60, 16  ;;  %v1398_v39 = vor.u32 %v1397_v30, %v1394_v28  ;;  %v2125_v30 = vpop.permute.xlu1 %2124 }
 0x192   : > { %v7547_v19 = vsel %vm5760_vm8, %v8407_v18, %v3084_v8  ;;  %3344 = vst.msk [vmem:[#allocation3 + $0x16c] sm:$0xf] %vm1631_vm10, %v3279_v25  ;;  %v3558_v43 = vld [vmem:[#allocation2 + $0xb0] sm:$0x1]  ;;  %v3559_v9 = vld [vmem:[#allocation2 + $0xbc] sm:$0xf] }
 0x193   : > { %1663 = vst.msk [vmem:[#allocation3 + $0x174] sm:$0xf] %vm1631_vm10, %v1598_v47  ;;  %v8408_v15 = vld [vmem:[#allocation8_spill] sm:$0xff]  ;;  %v7569_v41 = vrot.slane %v1401_v10, 5  ;;  %v1407_v34 = vrot.slane %v1405_v27, 4  ;;  %v3092_v8 = vshrl.u32 %v7524_v36, 16  ;;  %v3281_v27 = vpop.permute.xlu0 %3280 }
 0x194   : > { %v8409_v22 = vsel %vm5708_vm3, %v7194_v26, %v8408_v15  ;;  %v3733_v32 = vrot.slane %v3731_v29, 4  ;;  %v8410_v28 = vld [vmem:[#allocation9_spill] sm:$0xff]  ;;  %v8411_v62 = vld [vmem:[#allocation7_spill] sm:$0xff]  ;;  %v7578_v54 = vrot.slane %v1411_v45, 5  ;;  %v7580_v1 = vrot.slane %v3087_v3, 11  ;;  %v8413_v3 = vld [vmem:[#allocation10_spill] sm:$0xff] }
 0x195   : > { %1569 = vrot.lane.b32.xlu1 %v8409_v22, %s5546_s18  ;;  %v8412_v5 = vsel %vm5708_vm3, %v8410_v28, %v8411_v62  ;;  %v3736_v24 = vrot.slane %v3734_v61, 5  ;;  %v3740_v26 = vshll.u32 %v3557_v0, 16  ;;  %v3101_v60 = vshrl.u32 %v7537_v42, 16  ;;  %v3560_v12 = vld [vmem:[#allocation2 + $0xc0] sm:$0xf] }
 0x196   : > { %1567 = vrot.lane.b32.xlu0 %v8412_v5, %s5546_s18  ;;  %v3744_v44 = vshrl.u32 %v3557_v0, 16  ;;  %v3750_v49 = vshll.u32 %v3558_v43, 16  ;;  %v3755_v10 = vshrl.u32 %v3559_v9, 16  ;;  %2191 = vst.msk [vmem:[#allocation3 + $0x168] sm:$0xf] %vm2160_vm11, %v2125_v30  ;;  %v7584_v23 = vrot.slane %v1398_v39, 4  ;;  %v3471_v5 = vpop.permute.xlu1 %3470 }
 0x197   : > { %v3737_v25 = vor.u32 %v3736_v24, %v3733_v32  ;;  %v3742_v18 = vrot.slane %v3740_v26, 5  ;;  %v3561_v45 = vld [vmem:[#allocation2 + $0xc4] sm:$0x1]  ;;  %v3758_v29 = vshll.u32 %v3559_v9, 16  ;;  %3345 = vst.msk [vmem:[#allocation3 + $0x178] sm:$0xf] %vm1631_vm10, %v3281_v27  ;;  %v1408_v61 = vor.u32 %v1407_v34, %v7569_v41  ;;  %v2127_v30 = vpop.permute.xlu0 %2126 }
 0x198   : > { %v7594_v47 = vrot.slane %v3092_v8, 7  ;;  %v3746_v39 = vrot.slane %v3744_v44, 4  ;;  %v1694_v43 = vld [vmem:[#allocation2 + $0xe0] sm:$0x8]  ;;  %v8414_v9 = vsel %vm5760_vm8, %v7269_v63, %v7207_v2  ;;  %v3757_v22 = vrot.slane %v3755_v10, 4 }
 0x199   : > { %3252 = vrot.lane.b32.xlu1 %v8413_v3, %s5546_s18  ;;  %v3738_v15 = vrot.slane %v3737_v25, 4  ;;  %v3760_v32 = vrot.slane %v3758_v29, 5  ;;  %v3764_v28 = vshll.u32 %v3560_v12, 16  ;;  %v7602_v62 = vld [vmem:[#allocation2 + $0xe4] sm:$0xf]  ;;  %v3752_v34 = vrot.slane %v3750_v49, 5 }
 0x19a   : > { %3250 = vrot.lane.b32.xlu0 %v8414_v9, %s5546_s18  ;;  %v3747_v24 = vor.u32 %v3746_v39, %v3742_v18  ;;  %v3768_v8 = vshrl.u32 %v3560_v12, 16  ;;  %v3774_v26 = vshll.u32 %v3561_v45, 16  ;;  %3536 = vst.msk [vmem:[#allocation3 + $0x16c] sm:$0xf] %vm2160_vm11, %v3471_v5  ;;  %v1933_v63 = vshrl.u32 %v1694_v43, 16 }
 0x19b   : > { %v3743_v44 = vsel %vm5708_vm3, %v3738_v15, %v3742_v18  ;;  %v3761_v27 = vor.u32 %v3760_v32, %v3757_v22  ;;  %v3766_v2 = vrot.slane %v3764_v28, 5  ;;  %v459_v25 = vld [vmem:[#allocation2 + $0x7c] sm:$0x8]  ;;  %2192 = vst.msk [vmem:[#allocation3 + $0x174] sm:$0xf] %vm2160_vm11, %v2127_v30  ;;  %v3095_v49 = vshll.u32 %v7524_v36, 16  ;;  %v990_v22 = vpop.permute.xlu1 %989 }
 0x19c   : > { %v3362_v10 = vld [vmem:[#allocation2 + $0xd0] sm:$0xf]  ;;  %v3363_v29 = vld [vmem:[#allocation2 + $0xd4] sm:$0xf]  ;;  %v3748_v12 = vrot.slane %v3747_v24, 4  ;;  %v3770_v45 = vrot.slane %v3768_v8, 4  ;;  %v8415_v18 = vsel %vm5760_vm8, %v7222_v16, %v7241_v46  ;;  %v3473_v46 = vpop.permute.xlu0 %3472 }
 0x19d   : > { %2098 = vrot.lane.b32.xlu1 %v7357_v33, %s5547_s6  ;;  %4014 = vst.msk [vmem:[#allocation3 + $0x98] sm:$0xf] %vm232_vm0, %v3743_v44  ;;  %v1938_v3 = vshrl.u32 %v7602_v62, 16  ;;  %v7619_v39 = vrot.slane %v1408_v61, 4  ;;  %v7621_v33 = vrot.slane %v3101_v60, 7  ;;  %v3762_v9 = vrot.slane %v3761_v27, 4 }
 0x19e   : > { %2096 = vrot.lane.b32.xlu0 %v8415_v18, %s5547_s6  ;;  %v460_v15 = vld [vmem:[#allocation2 + $0x80] sm:$0xf]  ;;  %v3753_v32 = vsel %vm5708_vm3, %v3748_v12, %v3752_v34  ;;  %v3771_v28 = vor.u32 %v3770_v45, %v3766_v2  ;;  %v3776_v5 = vrot.slane %v3774_v26, 5  ;;  %v7626_v24 = vld [vmem:[#allocation2 + $0xe8] sm:$0xf]  ;;  %v624_v8 = vshrl.u32 %v459_v25, 16 }
 0x19f   : > { %v461_v30 = vld [vmem:[#allocation2 + $0x84] sm:$0xf]  ;;  %v2205_v16 = vld [vmem:[#allocation2 + $0x94] sm:$0xf]  ;;  %1077 = vst.msk [vmem:[#allocation3 + $0x6c] sm:$0xf] %vm1067_vm9, %v990_v22  ;;  %v3767_v34 = vsel %vm5708_vm3, %v3762_v9, %v3766_v2 }
 0x1a0   : > { %v926_v60 = vld [vmem:[#allocation2 + $0xc0] sm:$0xf]  ;;  %4015 = vst.msk [vmem:[#allocation3 + $0xa4] sm:$0xf] %vm232_vm0, %v3753_v32  ;;  %v7637_v26 = vrot.slane %v1933_v63, 11  ;;  %vm4489_vm12 = vcmask 261120  }
 0x1a1   : > { %v3562_v27 = vld [vmem:[#allocation2 + $0xd0] sm:$0xf]  ;;  %v3563_v25 = vld [vmem:[#allocation2 + $0xd4] sm:$0xf]  ;;  %2237 = vst.msk [vmem:[#allocation3 + $0x94] sm:$0xf] %vm232_vm0, %v2205_v16  ;;  %3444 = vrot.lane.b32.xlu1 %v3363_v29, %s5547_s6  ;;  %v2708_v29 = vpop.permute.xlu1 %2707 }
 0x1a2   : > { %3537 = vst.msk [vmem:[#allocation3 + $0x178] sm:$0xf] %vm2160_vm11, %v3473_v46  ;;  %v925_v12 = vld [vmem:[#allocation2 + $0xbc] sm:$0xf]  ;;  %v3772_v45 = vrot.slane %v3771_v28, 4  ;;  %v7643_v18 = vrot.slane %v1938_v3, 7  ;;  %3442 = vrot.lane.b32.xlu0 %v3362_v10, %s5547_s6 }
 0x1a3   : > { %4016 = vst.msk [vmem:[#allocation3 + $0xb0] sm:$0xf] %vm232_vm0, %v3767_v34  ;;  %v629_v22 = vshrl.u32 %v460_v15, 16  ;;  %v632_v32 = vshll.u32 %v460_v15, 16  ;;  %v2206_v2 = vld [vmem:[#allocation2 + $0x98] sm:$0xf]  ;;  %v2706_v15 = vpop.permute.xlu0 %2705 }
 0x1a4   : > { %v5108_v9 = vrot.slane %v624_v8, 11  ;;  %v638_v16 = vshrl.u32 %v461_v30, 16  ;;  %v641_v61 = vshll.u32 %v461_v30, 16  ;;  %v3564_v46 = vld [vmem:[#allocation2 + $0xd8] sm:$0x1]  ;;  %v3777_v28 = vsel %vm5708_vm3, %v3772_v45, %v3776_v5  ;;  %v4094_v57 = vld [vmem:[#allocation3 + $0x168] sm:$0xff] }
 0x1a5   : > { %2238 = vst.msk [vmem:[#allocation3 + $0xa0] sm:$0xf] %vm232_vm0, %v2206_v2  ;;  %v631_v34 = vrot.slane %v629_v22, 7  ;;  %v3779_v3 = vshrl.u32 %v3562_v27, 16  ;;  %v3782_v56 = vshll.u32 %v3562_v27, 16  ;;  %v3788_v30 = vshll.u32 %v3563_v25, 16  ;;  %1009 = vrot.lane.b32.xlu1 %v926_v60, %s5545_s4  ;;  %v1554_v10 = vpop.permute.xlu1 %1553 }
 0x1a6   : > { %v3565_v0 = vld [vmem:[#allocation2 + $0xe4] sm:$0xf]  ;;  %2794 = vst.msk [vmem:[#allocation3 + $0x70] sm:$0xf] %vm1067_vm9, %v2708_v29  ;;  %v640_v8 = vrot.slane %v638_v16, 7  ;;  %v3792_v44 = vshrl.u32 %v3563_v25, 16  ;;  %1007 = vrot.lane.b32.xlu0 %v925_v12, %s5545_s4 }
 0x1a7   : > { %4017 = vst.msk [vmem:[#allocation3 + $0xbc] sm:$0xf] %vm232_vm0, %v3777_v28  ;;  %v634_v2 = vor.u32 %v632_v32, %v631_v34  ;;  %v636_v5 = vrot.slane %v631_v34, 4  ;;  %v3781_v45 = vrot.slane %v3779_v3, 4  ;;  %v3784_v22 = vrot.slane %v3782_v56, 5  ;;  %v1552_v56 = vpop.permute.xlu0 %1551 }
 0x1a8   : > { %2793 = vst.msk [vmem:[#allocation3 + $0x64] sm:$0xf] %vm1067_vm9, %v2706_v15  ;;  %v3566_v27 = vld [vmem:[#allocation2 + $0xe8] sm:$0xf]  ;;  %v5486_v29 = vld [vmem:[#allocation3 + $0x8] ss:$12 sps:$4 sm:$0xff]   ;;  %v643_v63 = vor.u32 %v641_v61, %v640_v8  ;;  %v7664_v61 = vor.u32 %v3095_v49, %v7594_v47 }
 0x1a9   : > { %v3790_v28 = vrot.slane %v3788_v30, 5  ;;  %v3794_v43 = vrot.slane %v3792_v44, 4  ;;  %v3798_v31 = vshll.u32 %v3564_v46, 16  ;;  %v3567_v16 = vld [vmem:[#allocation2 + $0xec] sm:$0x1]  ;;  %v635_v25 = vsel %vm5760_vm8, %v5108_v9, %v634_v2  ;;  %v4096_v12 = vld [vmem:[#allocation3 + $0x174] sm:$0xff]  ;;  %2727 = vrot.lane.b32.xlu1 %v2544_v48, %s5545_s4  ;;  %v3237_v52 = vpop.permute.xlu1 %3236 }
 0x1aa   : > { %v3785_v15 = vor.u32 %v3784_v22, %v3781_v45  ;;  %v3803_v60 = vshrl.u32 %v3565_v0, 16  ;;  %v3806_v32 = vshll.u32 %v3565_v0, 16  ;;  %v7658_v34 = vld [vmem:[#allocation2 + $0xf8] sm:$0xf]  ;;  %1641 = vst.msk [vmem:[#allocation3 + $0x6c] sm:$0xf] %vm1631_vm10, %v1554_v10  ;;  %v644_v44 = vsel %vm5760_vm8, %v636_v5, %v643_v63 }
 0x1ab   : > { %v5482_v3 = vld [vmem:[#allocation3 + $0x16c] ss:$12 sps:$4 sm:$0xff]   ;;  %887 = vst.msk [vmem:[#allocation3 + $0x90] sm:$0xf] %vm232_vm0, %v635_v25  ;;  %v3795_v9 = vor.u32 %v3794_v43, %v3790_v28  ;;  %v3800_v46 = vrot.slane %v3798_v31, 5  ;;  %v5196_v0 = vcombine.low %v4094_v57, %v4096_v12  ;;  %v8416_v31 = vsel %vm5708_vm3, %v7274_v53, %v7209_v50  ;;  %v3235_v22 = vpop.permute.xlu0 %3234 }
 0x1ac   : > { %1640 = vst.msk [vmem:[#allocation3 + $0x60] sm:$0xf] %vm1631_vm10, %v1552_v56  ;;  %v3786_v36 = vrot.slane %v3785_v15, 4  ;;  %v3805_v49 = vrot.slane %v3803_v60, 4  ;;  %v3808_v10 = vrot.slane %v3806_v32, 5  ;;  %2725 = vrot.lane.b32.xlu0 %v8416_v31, %s5545_s4  ;;  %4690 = vmatprep.mubr.bf16.mxu1 %v5482_v3  ;;  %v3812_v63 = vshll.u32 %v3566_v27, 16 }
 0x1ad   : > { %888 = vst.msk [vmem:[#allocation3 + $0x9c] sm:$0xf] %vm232_vm0, %v644_v44  ;;  %v3796_v43 = vrot.slane %v3795_v9, 4  ;;  %v3816_v8 = vshrl.u32 %v3566_v27, 16  ;;  %v3822_v30 = vshll.u32 %v3567_v16, 16  ;;  %4691 = vmatmul.mubr.bf16.gmra.mxu1 %v5196_v0  ;;  %v1950_v48 = vshll.u32 %v7626_v24, 16 }
 0x1ae   : > { %v2291_v37 = vld [vmem:[#allocation2 + $0xfc] sm:$0xf]  ;;  %v3791_v57 = vsel %vm5708_vm3, %v3786_v36, %v3790_v28  ;;  %v3809_v2 = vor.u32 %v3808_v10, %v3805_v49  ;;  %v2570_v5 = vshrl.u32 %v7658_v34, 16  ;;  %v3568_v45 = vld [vmem:[#allocation2 + $0xf8] sm:$0xf]  ;;  %5373 = vmatprep.mubr.msk.bf16.mxu1 %vm4489_vm12, %v5486_v29  ;;  %v3814_v53 = vrot.slane %v3812_v63, 5 }
 0x1af   : > { %3323 = vst.msk [vmem:[#allocation3 + $0x70] sm:$0xf] %vm1631_vm10, %v3237_v52  ;;  %v3801_v50 = vsel %vm5708_vm3, %v3796_v43, %v3800_v46  ;;  %v3818_v27 = vrot.slane %v3816_v8, 4  ;;  %v2573_v16 = vshll.u32 %v7658_v34, 16  ;;  %3322 = vst.msk [vmem:[#allocation3 + $0x64] sm:$0xf] %vm1631_vm10, %v3235_v22  ;;  %v8417_v28 = vsel %vm5708_vm3, %v7310_v58, %v7291_v14  ;;  %v2083_v46 = vpop.permute.xlu1 %2082 }
 0x1b0   : > { %4018 = vst.msk [vmem:[#allocation3 + $0xc8] sm:$0xf] %vm232_vm0, %v3791_v57  ;;  %1573 = vrot.lane.b32.xlu1 %v8417_v28, %s5546_s18  ;;  %v5487_v25 = vld [vmem:[#allocation3 + $0x20] ss:$12 sps:$4 sm:$0xff]   ;;  %v1945_v29 = vrot.slane %v7643_v18, 4  ;;  %v8418_v15 = vshrl.u32 %v7626_v24, 16  ;;  %v8419_v12 = vsel %vm5708_vm3, %v7308_v59, %v7271_v13  ;;  %v1414_v0 = vsel %vm5708_vm3, %v7619_v39, %v7578_v54  ;;  %v2081_v59 = vpop.permute.xlu0 %2080 }
 0x1b1   : > { %4019 = vst.msk [vmem:[#allocation3 + $0xd4] sm:$0xf] %vm232_vm0, %v3801_v50  ;;  %v3810_v32 = vrot.slane %v3809_v2, 4  ;;  %v2579_v34 = vshll.u32 %v2291_v37, 16  ;;  %v2292_v56 = vld [vmem:[#allocation2 + $0x100] sm:$0x1]  ;;  %1571 = vrot.lane.b32.xlu0 %v8419_v12, %s5546_s18  ;;  %v3819_v58 = vor.u32 %v3818_v27, %v3814_v53 }
 0x1b2   : > { %v7703_v60 = vrot.slane %v8418_v15, 7  ;;  %v3824_v14 = vrot.slane %v3822_v30, 5  ;;  %v2583_v3 = vshrl.u32 %v2291_v37, 16  ;;  %v3569_v44 = vld [vmem:[#allocation2 + $0xfc] sm:$0xf]  ;;  %v3827_v9 = vshrl.u32 %v3568_v45, 16 }
 0x1b3   : > { %v3815_v36 = vsel %vm5708_vm3, %v3810_v32, %v3814_v53  ;;  %v7718_v49 = vrot.slane %v2570_v5, 4  ;;  %v3570_v10 = vld [vmem:[#allocation2 + $0x100] sm:$0x1]  ;;  %v3830_v31 = vshll.u32 %v3568_v45, 16  ;;  %v3571_v13 = vld [vmem:[#allocation2 + $0x10c] sm:$0xf]  ;;  %v8420_v45 = vsel %vm5760_vm8, %v7417_v7, %v7471_v20 }
 0x1b4   : > { %2170 = vst.msk [vmem:[#allocation3 + $0x6c] sm:$0xf] %vm2160_vm11, %v2083_v46  ;;  %v5488_v43 = vld [vmem:[#allocation3 + $0x38] ss:$12 sps:$4 sm:$0xff]   ;;  %v3820_v63 = vrot.slane %v3819_v58, 4  ;;  %v2575_v8 = vrot.slane %v2573_v16, 5  ;;  %3256 = vrot.lane.b32.xlu1 %v7547_v19, %s5546_s18  ;;  %v3429_v16 = vpop.permute.xlu1 %3428 }
 0x1b5   : > { %4020 = vst.msk [vmem:[#allocation3 + $0xe0] sm:$0xf] %vm232_vm0, %v3815_v36  ;;  %v2589_v30 = vshll.u32 %v2292_v56, 16  ;;  %v3829_v37 = vrot.slane %v3827_v9, 4  ;;  %v7725_v52 = vrot.slane %v2579_v34, 5  ;;  %v3832_v57 = vrot.slane %v3830_v31, 5  ;;  %3254 = vrot.lane.b32.xlu0 %v8420_v45, %s5546_s18  ;;  %5374 = vmatmul.mubr.msk.bf16.vlgmr.msra.gmra.mxu1 %vm4489_vm12, %v5487_v25  ;;  %v3427_v56 = vpop.permute.xlu0 %3426 }
 0x1b6   : > { %2169 = vst.msk [vmem:[#allocation3 + $0x60] sm:$0xf] %vm2160_vm11, %v2081_v59  ;;  %v3836_v2 = vshll.u32 %v3569_v44, 16  ;;  %v3840_v5 = vshrl.u32 %v3569_v44, 16  ;;  %v3825_v22 = vsel %vm5708_vm3, %v3820_v63, %v3824_v14  ;;  %v7735_v50 = vrot.slane %v2583_v3, 4  ;;  %5377 = vmatprep.mubr.msk.bf16.mxu1 %vm4489_vm12, %v5488_v43 }
 0x1b7   : > { %v3846_v53 = vshll.u32 %v3570_v10, 16  ;;  %v3572_v27 = vld [vmem:[#allocation2 + $0x110] sm:$0xf]  ;;  %v3851_v19 = vshrl.u32 %v3571_v13, 16  ;;  %v8421_v28 = vshll.u32 %v7537_v42, 16  ;;  %v3833_v7 = vor.u32 %v3832_v57, %v3829_v37 }
 0x1b8   : > { %4021 = vst.msk [vmem:[#allocation3 + $0xec] sm:$0xf] %vm232_vm0, %v3825_v22  ;;  %v3838_v20 = vrot.slane %v3836_v2, 5  ;;  %v3842_v32 = vrot.slane %v3840_v5, 4  ;;  %v3573_v34 = vld [vmem:[#allocation2 + $0x114] sm:$0x1]  ;;  %v2576_v42 = vor.u32 %v2575_v8, %v7718_v49  ;;  %2102 = vrot.lane.b32.xlu1 %v7556_v17, %s5547_s6  ;;  %v2586_v59 = vor.u32 %v7735_v50, %v7725_v52 }
 0x1b9   : > { %v7741_v15 = vor.u32 %v8421_v28, %v7621_v33  ;;  %3515 = vst.msk [vmem:[#allocation3 + $0x70] sm:$0xf] %vm2160_vm11, %v3429_v16  ;;  %v3365_v12 = vld [vmem:[#allocation2 + $0xe8] sm:$0xf]  ;;  %v8422_v25 = vshll.u32 %v7602_v62, 16  ;;  %v7752_v33 = vrot.slane %v2589_v30, 5  ;;  %v8423_v62 = vsel %vm5760_vm8, %v7491_v35, %v7513_v55  ;;  %v994_v30 = vpop.permute.xlu1 %993  ;;  %v992_v5 = vpop.permute.xlu0 %991 }
 0x1ba   : > { %v3848_v14 = vrot.slane %v3846_v53, 5  ;;  %v1133_v3 = vld [vmem:[#allocation2 + $0xe4] sm:$0xf]  ;;  %3514 = vst.msk [vmem:[#allocation3 + $0x64] sm:$0xf] %vm2160_vm11, %v3427_v56  ;;  %v3834_v46 = vrot.slane %v3833_v7, 4  ;;  %v3843_v36 = vor.u32 %v3842_v32, %v3838_v20  ;;  %2100 = vrot.lane.b32.xlu0 %v8423_v62, %s5547_s6 }
 0x1bb   : > { %v7749_v58 = vor.u32 %v8422_v25, %v7643_v18  ;;  %v3364_v44 = vld [vmem:[#allocation2 + $0xe4] sm:$0xf]  ;;  %v3853_v10 = vrot.slane %v3851_v19, 4  ;;  %v3854_v31 = vshll.u32 %v3571_v13, 16  ;;  %v5492_v49 = vld [vmem:[#allocation3 + $0x68] ss:$12 sps:$4 sm:$0xff]  }
 0x1bc   : > { %v5489_v9 = vld [vmem:[#allocation3 + $0x50] ss:$12 sps:$4 sm:$0xff]   ;;  %v3860_v43 = vshll.u32 %v3572_v27, 16  ;;  %v3864_v63 = vshrl.u32 %v3572_v27, 16  ;;  %v3870_v17 = vshll.u32 %v3573_v34, 16  ;;  %v3839_v37 = vsel %vm5708_vm3, %v3834_v46, %v3838_v20  ;;  %3448 = vrot.lane.b32.xlu1 %v3365_v12, %s5547_s6 }
 0x1bd   : > { %v1134_v8 = vld [vmem:[#allocation2 + $0xe8] sm:$0xf]  ;;  %v3844_v13 = vrot.slane %v3843_v36, 4  ;;  %v3856_v57 = vrot.slane %v3854_v31, 5  ;;  %v1416_v2 = vshrl.u32 %v1133_v3, 16  ;;  %v7768_v55 = vrot.slane %v2576_v42, 4  ;;  %5378 = vmatmul.mubr.msk.bf16.gmra.mxu1 %vm4489_vm12, %v5489_v9  ;;  %v2712_v12 = vpop.permute.xlu1 %2711  ;;  %v2710_v31 = vpop.permute.xlu0 %2709 }
 0x1be   : > { %1079 = vst.msk [vmem:[#allocation3 + $0x84] sm:$0xf] %vm1067_vm9, %v994_v30  ;;  %v928_v35 = vld [vmem:[#allocation2 + $0xd4] sm:$0xf]  ;;  %v3862_v45 = vrot.slane %v3860_v43, 5  ;;  %v3866_v22 = vrot.slane %v3864_v63, 4  ;;  %3446 = vrot.lane.b32.xlu0 %v3364_v44, %s5547_s6  ;;  %5381 = vmatprep.mubr.msk.bf16.mxu1 %vm4489_vm12, %v5492_v49  ;;  %v3098_v49 = vsel %vm5760_vm8, %v7580_v1, %v7664_v61 }
 0x1bf   : > { %4022 = vst.msk [vmem:[#allocation3 + $0xf8] sm:$0xf] %vm232_vm0, %v3839_v37  ;;  %v1419_v50 = vshll.u32 %v1133_v3, 16  ;;  %v1135_v53 = vld [vmem:[#allocation2 + $0xec] sm:$0x1]  ;;  %v3849_v19 = vsel %vm5708_vm3, %v3844_v13, %v3848_v14  ;;  %v3857_v16 = vor.u32 %v3856_v57, %v3853_v10  ;;  %v1418_v28 = vrot.slane %v1416_v2, 4 }
 0x1c0   : > { %1078 = vst.msk [vmem:[#allocation3 + $0x78] sm:$0xf] %vm1067_vm9, %v992_v5  ;;  %v927_v27 = vld [vmem:[#allocation2 + $0xd0] sm:$0xf]  ;;  %v1425_v7 = vshll.u32 %v1134_v8, 16  ;;  %v3867_v34 = vor.u32 %v3866_v22, %v3862_v45  ;;  %v3872_v56 = vrot.slane %v3870_v17, 5  ;;  %v1952_v14 = vor.u32 %v1950_v48, %v7703_v60  ;;  %1013 = vrot.lane.b32.xlu1 %v928_v35, %s5545_s4 }
 0x1c1   : > { %v2851_v20 = vld [vmem:[#allocation2 + $0x108] sm:$0x8]  ;;  %v7775_v32 = vld [vmem:[#allocation2 + $0x10c] sm:$0xf]  ;;  %4023 = vst.msk [vmem:[#allocation3 + $0x104] sm:$0xf] %vm232_vm0, %v3849_v19  ;;  %v2582_v22 = vsel %vm5708_vm3, %v7768_v55, %v7725_v52 }
 0x1c2   : > { %v1421_v25 = vrot.slane %v1419_v50, 5  ;;  %v1429_v42 = vshrl.u32 %v1134_v8, 16  ;;  %v4052_v3 = vld [vmem:[#allocation3 + $0x6c] sm:$0xff]  ;;  %v7783_v46 = vrot.slane %v2586_v59, 4  ;;  %v3858_v36 = vrot.slane %v3857_v16, 4  ;;  %v4050_v62 = vld [vmem:[#allocation3 + $0x60] sm:$0xff]  ;;  %1011 = vrot.lane.b32.xlu0 %v927_v27, %s5545_s4  ;;  %v1556_v27 = vpop.permute.xlu0 %1555 }
 0x1c3   : > { %v7785_v10 = vrot.slane %v1425_v7, 5  ;;  %v3574_v44 = vld [vmem:[#allocation2 + $0x120] sm:$0xf]  ;;  %2796 = vst.msk [vmem:[#allocation3 + $0x88] sm:$0xf] %vm1067_vm9, %v2712_v12  ;;  %v3868_v9 = vrot.slane %v3867_v34, 4  ;;  %v5163_v24 = vcombine.low %v4050_v62, %v4052_v3  ;;  %v8425_v7 = vsel %vm5708_vm3, %v7532_v38, %v7534_v51 }
 0x1c4   : > { %v5490_v43 = vld [vmem:[#allocation3 + $0x64] ss:$12 sps:$4 sm:$0xff]   ;;  %v1422_v63 = vor.u32 %v1421_v25, %v1418_v28  ;;  %v1435_v17 = vshll.u32 %v1135_v53, 16  ;;  %v3109_v8 = vshrl.u32 %v2851_v20, 16  ;;  %2795 = vst.msk [vmem:[#allocation3 + $0x7c] sm:$0xf] %vm1067_vm9, %v2710_v31  ;;  %v3863_v60 = vsel %vm5708_vm3, %v3858_v36, %v3862_v45  ;;  %v1558_v45 = vpop.permute.xlu1 %1557  ;;  %2731 = vrot.lane.b32.xlu1 %v8425_v7, %s5545_s4 }
 0x1c5   : > { %v5493_v48 = vld [vmem:[#allocation3 + $0x80] ss:$12 sps:$4 sm:$0xff]   ;;  %v1431_v59 = vrot.slane %v1429_v42, 4  ;;  %v3114_v30 = vshrl.u32 %v7775_v32, 16  ;;  %4602 = vmatprep.mubr.bf16.mxu0 %v5490_v43  ;;  %v8424_v37 = vrot.slane %v7594_v47, 4  ;;  %v3873_v2 = vsel %vm5708_vm3, %v3868_v9, %v3872_v56 }
 0x1c6   : > { %v5494_v57 = vld [vmem:[#allocation3 + $0x98] ss:$12 sps:$4 sm:$0xff]   ;;  %4024 = vst.msk [vmem:[#allocation3 + $0x110] sm:$0xf] %vm232_vm0, %v3863_v60  ;;  %v7809_v5 = vld [vmem:[#allocation2 + $0x110] sm:$0xf]  ;;  %4603 = vmatmul.mubr.bf16.gmra.mxu0 %v5163_v24  ;;  %v1944_v47 = vsel %vm5760_vm8, %v7637_v26, %v7749_v58  ;;  %v2592_v18 = vsel %vm5708_vm3, %v7783_v46, %v7752_v33  ;;  %v8426_v42 = vsel %vm5708_vm3, %v7502_v6, %v7477_v40 }
 0x1c7   : > { %v7804_v13 = vsel %vm5760_vm8, %v8424_v37, %v7741_v15  ;;  %v3575_v35 = vld [vmem:[#allocation2 + $0x124] sm:$0xf]  ;;  %v7819_v15 = vsel %vm5760_vm8, %v1945_v29, %v1952_v14  ;;  %4025 = vst.msk [vmem:[#allocation3 + $0x11c] sm:$0xf] %vm232_vm0, %v3873_v2  ;;  %v3576_v50 = vld [vmem:[#allocation2 + $0x128] sm:$0x1]  ;;  %v1432_v34 = vor.u32 %v1431_v59, %v7785_v10  ;;  %2729 = vrot.lane.b32.xlu0 %v8426_v42, %s5545_s4 }
 0x1c8   : > { %v3875_v53 = vshrl.u32 %v3574_v44, 16  ;;  %1643 = vst.msk [vmem:[#allocation3 + $0x84] sm:$0xf] %vm1631_vm10, %v1558_v45  ;;  %v7831_v19 = vrot.slane %v1435_v17, 5  ;;  %v7833_v29 = vrot.slane %v3109_v8, 11  ;;  %v3878_v16 = vshll.u32 %v3574_v44, 16  ;;  %5382 = vmatmul.mubr.msk.bf16.gmra.mxu1 %vm4489_vm12, %v5493_v48  ;;  %v3241_v36 = vpop.permute.xlu1 %3240  ;;  %1577 = vrot.lane.b32.xlu1 %v1414_v0, %s5546_s18 }
 0x1c9   : > { %v3577_v28 = vld [vmem:[#allocation2 + $0x134] sm:$0xf]  ;;  %1642 = vst.msk [vmem:[#allocation3 + $0x78] sm:$0xf] %vm1631_vm10, %v1556_v27  ;;  %v7842_v20 = vrot.slane %v1422_v63, 4  ;;  %v7845_v56 = vrot.slane %v3114_v30, 7  ;;  %v3239_v63 = vpop.permute.xlu0 %3238  ;;  %5385 = vmatprep.mubr.msk.bf16.mxu1 %vm4489_vm12, %v5494_v57  ;;  %v8427_v57 = vsel %vm5708_vm3, %v7584_v23, %v7569_v41 }
 0x1ca   : > { %v3877_v25 = vrot.slane %v3875_v53, 4  ;;  %v3117_v12 = vshll.u32 %v7775_v32, 16  ;;  %v3880_v3 = vrot.slane %v3878_v16, 5  ;;  %v3884_v14 = vshll.u32 %v3575_v35, 16  ;;  %v3578_v51 = vld [vmem:[#allocation2 + $0x138] sm:$0xf] }
 0x1cb   : > { %v3888_v38 = vshrl.u32 %v3575_v35, 16  ;;  %v3123_v44 = vshrl.u32 %v7809_v5, 16  ;;  %v3126_v31 = vshll.u32 %v7809_v5, 16  ;;  %v3894_v62 = vshll.u32 %v3576_v50, 16  ;;  %v3579_v43 = vld [vmem:[#allocation2 + $0x13c] sm:$0x1]  ;;  %1575 = vrot.lane.b32.xlu0 %v8427_v57, %s5546_s18 }
 0x1cc   : > { %v3899_v9 = vshrl.u32 %v3577_v28, 16  ;;  %3325 = vst.msk [vmem:[#allocation3 + $0x88] sm:$0xf] %vm1631_vm10, %v3241_v36  ;;  %v3881_v40 = vor.u32 %v3880_v3, %v3877_v25  ;;  %v3886_v6 = vrot.slane %v3884_v14, 5  ;;  %v3902_v17 = vshll.u32 %v3577_v28, 16  ;;  %v2087_v45 = vpop.permute.xlu1 %2086  ;;  %3260 = vrot.lane.b32.xlu1 %v7804_v13, %s5546_s18 }
 0x1cd   : > { %v3890_v32 = vrot.slane %v3888_v38, 4  ;;  %v1697_v8 = vld [vmem:[#allocation2 + $0xf4] sm:$0x8]  ;;  %3324 = vst.msk [vmem:[#allocation3 + $0x7c] sm:$0xf] %vm1631_vm10, %v3239_v63  ;;  %v1428_v48 = vsel %vm5708_vm3, %v7842_v20, %v7785_v10  ;;  %v7870_v60 = vrot.slane %v1432_v34, 4  ;;  %v2085_v7 = vpop.permute.xlu0 %2084  ;;  %v7893_v38 = vor.u32 %v3117_v12, %v7845_v56 }
 0x1ce   : > { %v5495_v24 = vld [vmem:[#allocation3 + $0xb0] ss:$12 sps:$4 sm:$0xff]   ;;  %v3901_v59 = vrot.slane %v3899_v9, 4  ;;  %v3908_v30 = vshll.u32 %v3578_v51, 16  ;;  %v5496_v54 = vld [vmem:[#allocation3 + $0xc8] ss:$12 sps:$4 sm:$0xff]  }
 0x1cf   : > { %v7872_v37 = vld [vmem:[#allocation2 + $0xf8] sm:$0xf]  ;;  %v3882_v39 = vrot.slane %v3881_v40, 4  ;;  %v3891_v0 = vor.u32 %v3890_v32, %v3886_v6  ;;  %v3896_v2 = vrot.slane %v3894_v62, 5  ;;  %v3904_v35 = vrot.slane %v3902_v17, 5  ;;  %3258 = vrot.lane.b32.xlu0 %v3098_v49, %s5546_s18 }
 0x1d0   : > { %v3125_v50 = vrot.slane %v3123_v44, 7  ;;  %v3910_v53 = vrot.slane %v3908_v30, 5  ;;  %v3912_v27 = vshrl.u32 %v3578_v51, 16  ;;  %v3918_v16 = vshll.u32 %v3579_v43, 16  ;;  %v7880_v28 = vld [vmem:[#allocation2 + $0xfc] sm:$0xf]  ;;  %5386 = vmatmul.mubr.msk.bf16.gmra.mxu1 %vm4489_vm12, %v5495_v24  ;;  %v3433_v63 = vpop.permute.xlu1 %3432  ;;  %2106 = vrot.lane.b32.xlu1 %v7819_v15, %s5547_s6 }
 0x1d1   : > { %2172 = vst.msk [vmem:[#allocation3 + $0x84] sm:$0xf] %vm2160_vm11, %v2087_v45  ;;  %v3887_v34 = vsel %vm5708_vm3, %v3882_v39, %v3886_v6  ;;  %v3892_v41 = vrot.slane %v3891_v0, 4  ;;  %v3905_v23 = vor.u32 %v3904_v35, %v3901_v59  ;;  %v1955_v25 = vshrl.u32 %v1697_v8, 16  ;;  %v462_v42 = vld [vmem:[#allocation2 + $0x90] sm:$0x8]  ;;  %v3431_v32 = vpop.permute.xlu0 %3430  ;;  %5389 = vmatprep.mubr.msk.bf16.mxu1 %vm4489_vm12, %v5496_v54 }
 0x1d2   : > { %v463_v3 = vld [vmem:[#allocation2 + $0x94] sm:$0xf]  ;;  %2171 = vst.msk [vmem:[#allocation3 + $0x78] sm:$0xf] %vm2160_vm11, %v2085_v7  ;;  %v1438_v14 = vsel %vm5708_vm3, %v7870_v60, %v7831_v19  ;;  %v3121_v51 = vrot.slane %v7845_v56, 4  ;;  %v3914_v36 = vrot.slane %v3912_v27, 4  ;;  %v7916_v8 = vor.u32 %v3126_v31, %v3125_v50 }
 0x1d3   : > { %4026 = vst.msk [vmem:[#allocation3 + $0x128] sm:$0xf] %vm232_vm0, %v3887_v34  ;;  %v2207_v44 = vld [vmem:[#allocation2 + $0xa8] sm:$0xf]  ;;  %v3897_v13 = vsel %vm5708_vm3, %v3892_v41, %v3896_v2  ;;  %v3906_v62 = vrot.slane %v3905_v23, 4  ;;  %v3920_v43 = vrot.slane %v3918_v16, 5  ;;  %2104 = vrot.lane.b32.xlu0 %v1944_v47, %s5547_s6 }
 0x1d4   : > { %v1960_v12 = vshrl.u32 %v7872_v37, 16  ;;  %v7906_v9 = vld [vmem:[#allocation2 + $0x98] sm:$0xf]  ;;  %2239 = vst.msk [vmem:[#allocation3 + $0xac] sm:$0xf] %vm232_vm0, %v2207_v44  ;;  %v3915_v40 = vor.u32 %v3914_v36, %v3910_v53  ;;  %v1969_v1 = vshrl.u32 %v7880_v28, 16  ;;  %v998_v41 = vpop.permute.xlu1 %997 }
 0x1d5   : > { %4027 = vst.msk [vmem:[#allocation3 + $0x134] sm:$0xf] %vm232_vm0, %v3897_v13  ;;  %v646_v61 = vshrl.u32 %v462_v42, 16  ;;  %v651_v49 = vshrl.u32 %v463_v3, 16  ;;  %v3580_v6 = vld [vmem:[#allocation2 + $0x148] sm:$0xf]  ;;  %v3911_v24 = vsel %vm5708_vm3, %v3906_v62, %v3910_v53 }
 0x1d6   : > { %3517 = vst.msk [vmem:[#allocation3 + $0x88] sm:$0xf] %vm2160_vm11, %v3433_v63  ;;  %v3367_v17 = vld [vmem:[#allocation2 + $0xfc] sm:$0xf]  ;;  %v7920_v59 = vrot.slane %v1955_v25, 11  ;;  %v1963_v30 = vshll.u32 %v7872_v37, 16 }
 0x1d7   : > { %v3581_v57 = vld [vmem:[#allocation2 + $0x14c] sm:$0xf]  ;;  %3516 = vst.msk [vmem:[#allocation3 + $0x7c] sm:$0xf] %vm2160_vm11, %v3431_v32  ;;  %v3366_v0 = vld [vmem:[#allocation2 + $0xf8] sm:$0xf]  ;;  %3452 = vrot.lane.b32.xlu1 %v3367_v17, %s5547_s6 }
 0x1d8   : > { %v2208_v39 = vld [vmem:[#allocation2 + $0xac] sm:$0xf]  ;;  %v5497_v54 = vld [vmem:[#allocation3 + $0xe0] ss:$12 sps:$4 sm:$0xff]   ;;  %v3916_v2 = vrot.slane %v3915_v40, 4  ;;  %v5109_v5 = vrot.slane %v646_v61, 11  ;;  %3450 = vrot.lane.b32.xlu0 %v3366_v0, %s5547_s6  ;;  %v3120_v61 = vsel %vm5760_vm8, %v7833_v29, %v7893_v38 }
 0x1d9   : > { %4028 = vst.msk [vmem:[#allocation3 + $0x140] sm:$0xf] %vm232_vm0, %v3911_v24  ;;  %v653_v31 = vrot.slane %v651_v49, 7  ;;  %v654_v35 = vshll.u32 %v463_v3, 16  ;;  %v3582_v45 = vld [vmem:[#allocation2 + $0x150] sm:$0x1]  ;;  %v996_v3 = vpop.permute.xlu0 %995  ;;  %5390 = vmatmul.mubr.msk.bf16.gmra.mxu1 %vm4489_vm12, %v5497_v54  ;;  %v2716_v24 = vpop.permute.xlu1 %2715  ;;  %v7970_v54 = vsel %vm5760_vm8, %v3121_v51, %v7916_v8 }
 0x1da   : > { %2240 = vst.msk [vmem:[#allocation3 + $0xb8] sm:$0xf] %vm232_vm0, %v2208_v39  ;;  %v5500_v50 = vld [vmem:[#allocation3 + $0xf8] ss:$12 sps:$4 sm:$0xff]   ;;  %v7934_v15 = vrot.slane %v1960_v12, 7  ;;  %v1972_v53 = vshll.u32 %v7880_v28, 16  ;;  %v3921_v23 = vsel %vm5708_vm3, %v3916_v2, %v3920_v43 }
 0x1db   : > { %v660_v27 = vshrl.u32 %v7906_v9, 16  ;;  %v663_v16 = vshll.u32 %v7906_v9, 16  ;;  %v438_v7 = vld [vmem:[#allocation2 + $0x164] sm:$0x1]  ;;  %v7939_v34 = vld [vmem:[#allocation2 + $0x15c] sm:$0xf]  ;;  %v656_v26 = vor.u32 %v654_v35, %v653_v31  ;;  %5393 = vmatprep.mubr.msk.bf16.mxu1 %vm4489_vm12, %v5500_v50 }
 0x1dc   : > { %v7943_v25 = vrot.slane %v1969_v1, 7  ;;  %v3923_v58 = vshrl.u32 %v3580_v6, 16  ;;  %v2209_v47 = vld [vmem:[#allocation2 + $0xbc] sm:$0xf]  ;;  %v2210_v42 = vld [vmem:[#allocation2 + $0xc0] sm:$0xf] }
 0x1dd   : > { %1081 = vst.msk [vmem:[#allocation3 + $0x9c] sm:$0xf] %vm1067_vm9, %v998_v41  ;;  %v658_v36 = vrot.slane %v653_v31, 4  ;;  %v662_v44 = vrot.slane %v660_v27, 7  ;;  %v3926_v13 = vshll.u32 %v3580_v6, 16  ;;  %v3932_v62 = vshll.u32 %v3581_v57, 16  ;;  %v2714_v35 = vpop.permute.xlu0 %2713 }
 0x1de   : > { %4029 = vst.msk [vmem:[#allocation3 + $0x14c] sm:$0xf] %vm232_vm0, %v3921_v23  ;;  %2241 = vst.msk [vmem:[#allocation3 + $0xc4] sm:$0xf] %vm232_vm0, %v2209_v47  ;;  %v929_v43 = vld [vmem:[#allocation2 + $0xe4] sm:$0xf]  ;;  %v657_v9 = vsel %vm5760_vm8, %v5109_v5, %v656_v26 }
 0x1df   : > { %2242 = vst.msk [vmem:[#allocation3 + $0xd0] sm:$0xf] %vm232_vm0, %v2210_v42  ;;  %v930_v12 = vld [vmem:[#allocation2 + $0xe8] sm:$0xf]  ;;  %v3925_v63 = vrot.slane %v3923_v58, 4  ;;  %v3936_v40 = vshrl.u32 %v3581_v57, 16  ;;  %v665_v49 = vor.u32 %v663_v16, %v662_v44  ;;  %1015 = vrot.lane.b32.xlu0 %v929_v43, %s5545_s4  ;;  %v1562_v44 = vpop.permute.xlu1 %1561  ;;  %v7992_v43 = vor.u32 %v1972_v53, %v7943_v25 }
 0x1e0   : > { %1080 = vst.msk [vmem:[#allocation3 + $0x90] sm:$0xf] %vm1067_vm9, %v996_v3  ;;  %v3942_v1 = vshll.u32 %v3582_v45, 16  ;;  %v3928_v6 = vrot.slane %v3926_v13, 5  ;;  %v3934_v32 = vrot.slane %v3932_v62, 5  ;;  %v4056_v39 = vld [vmem:[#allocation3 + $0x84] sm:$0xff]  ;;  %1017 = vrot.lane.b32.xlu1 %v930_v12, %s5545_s4  ;;  %v7987_v62 = vor.u32 %v1963_v30, %v7934_v15 }
 0x1e1   : > { %889 = vst.msk [vmem:[#allocation3 + $0xa8] sm:$0xf] %vm232_vm0, %v657_v9  ;;  %v3584_v17 = vld [vmem:[#allocation2 + $0x160] sm:$0xf]  ;;  %v3938_v2 = vrot.slane %v3936_v40, 4  ;;  %v439_v0 = vsel %vm5693_vm2, 0, %v438_v7  ;;  %v666_v11 = vsel %vm5760_vm8, %v658_v36, %v665_v49 }
 0x1e2   : > { %v3944_v57 = vrot.slane %v3942_v1, 5  ;;  %v3947_v5 = vshrl.u32 %v7939_v34, 16  ;;  %v465_v31 = vld [vmem:[#allocation2 + $0xa4] sm:$0x8]  ;;  %2798 = vst.msk [vmem:[#allocation3 + $0xa0] sm:$0xf] %vm1067_vm9, %v2716_v24  ;;  %v3929_v16 = vor.u32 %v3928_v6, %v3925_v63  ;;  %v1560_v63 = vpop.permute.xlu0 %1559  ;;  %v1966_v21 = vsel %vm5760_vm8, %v7920_v59, %v7987_v62 }
 0x1e3   : > { %v4054_v45 = vld [vmem:[#allocation3 + $0x78] sm:$0xff]  ;;  %440 = vst [vmem:[#allocation2 + $0x164] sm:$0x1] %v439_v0  ;;  %v3950_v7 = vshll.u32 %v7939_v34, 16  ;;  %2797 = vst.msk [vmem:[#allocation3 + $0x94] sm:$0xf] %vm1067_vm9, %v2714_v35  ;;  %v3939_v56 = vor.u32 %v3938_v2, %v3934_v32  ;;  %2733 = vrot.lane.b32.xlu0 %v2582_v22, %s5545_s4 }
 0x1e4   : > { %v5498_v27 = vld [vmem:[#allocation3 + $0x7c] ss:$12 sps:$4 sm:$0xff]   ;;  %v5166_v41 = vcombine.low %v4054_v45, %v4056_v39  ;;  %890 = vst.msk [vmem:[#allocation3 + $0xb4] sm:$0xf] %vm232_vm0, %v666_v11  ;;  %v3949_v23 = vrot.slane %v3947_v5, 4  ;;  %v3956_v26 = vshll.u32 %v3584_v17, 16  ;;  %2735 = vrot.lane.b32.xlu1 %v2592_v18, %s5545_s4 }
 0x1e5   : > { %v5501_v50 = vld [vmem:[#allocation3 + $0x110] ss:$12 sps:$4 sm:$0xff]   ;;  %v7978_v51 = vld [vmem:[#allocation2 + $0xa8] sm:$0xf]  ;;  %v7980_v8 = vld [vmem:[#allocation2 + $0xac] sm:$0xf]  ;;  %4610 = vmatprep.mubr.bf16.mxu0 %v5498_v27 }
 0x1e6   : > { %v1967_v34 = vrot.slane %v7934_v15, 4  ;;  %v3930_v58 = vrot.slane %v3929_v16, 4  ;;  %v3952_v47 = vrot.slane %v3950_v7, 5  ;;  %v3960_v42 = vshrl.u32 %v3584_v17, 16  ;;  %v468_v3 = vld [vmem:[#allocation2 + $0xb8] sm:$0x8]  ;;  %4611 = vmatmul.mubr.bf16.gmra.mxu0 %v5166_v41  ;;  %5394 = vmatmul.mubr.msk.bf16.gmra.mxu1 %vm4489_vm12, %v5501_v50  ;;  %v3243_v55 = vpop.permute.xlu0 %3242 }
 0x1e7   : > { %v2211_v36 = vld [vmem:[#allocation2 + $0xd0] sm:$0xf]  ;;  %v3940_v12 = vrot.slane %v3939_v56, 4  ;;  %v3958_v9 = vrot.slane %v3956_v26, 5  ;;  %1645 = vst.msk [vmem:[#allocation3 + $0x9c] sm:$0xf] %vm1631_vm10, %v1562_v44  ;;  %1579 = vrot.lane.b32.xlu0 %v1428_v48, %s5546_s18 }
 0x1e8   : > { %v5502_v13 = vld [vmem:[#allocation3 + $0x128] ss:$12 sps:$4 sm:$0xff]   ;;  %2243 = vst.msk [vmem:[#allocation3 + $0xdc] sm:$0xf] %vm232_vm0, %v2211_v36  ;;  %v3935_v40 = vsel %vm5708_vm3, %v3930_v58, %v3934_v32  ;;  %v3953_v1 = vor.u32 %v3952_v47, %v3949_v23  ;;  %v3962_v49 = vrot.slane %v3960_v42, 4  ;;  %v668_v37 = vshrl.u32 %v465_v31, 16  ;;  %1581 = vrot.lane.b32.xlu1 %v1438_v14, %s5546_s18 }
 0x1e9   : > { %v7998_v30 = vld [vmem:[#allocation2 + $0xbc] sm:$0xf]  ;;  %v2212_v6 = vld [vmem:[#allocation2 + $0xd4] sm:$0xf]  ;;  %1644 = vst.msk [vmem:[#allocation3 + $0x90] sm:$0xf] %vm1631_vm10, %v1560_v63  ;;  %v3945_v28 = vsel %vm5708_vm3, %v3940_v12, %v3944_v57  ;;  %v3245_v57 = vpop.permute.xlu1 %3244  ;;  %5397 = vmatprep.mubr.msk.bf16.mxu1 %vm4489_vm12, %v5502_v13 }
 0x1ea   : > { %4030 = vst.msk [vmem:[#allocation3 + $0x158] sm:$0xf] %vm232_vm0, %v3935_v40  ;;  %v673_v53 = vshrl.u32 %v7978_v51, 16  ;;  %v676_v25 = vshll.u32 %v7978_v51, 16  ;;  %v682_v32 = vshrl.u32 %v7980_v8, 16  ;;  %v3954_v33 = vrot.slane %v3953_v1, 4  ;;  %v2089_v44 = vpop.permute.xlu0 %2088 }
 0x1eb   : > { %v8013_v17 = vld [vmem:[#allocation2 + $0xc0] sm:$0xf]  ;;  %2244 = vst.msk [vmem:[#allocation3 + $0xe8] sm:$0xf] %vm232_vm0, %v2212_v6  ;;  %4031 = vst.msk [vmem:[#allocation3 + $0x164] sm:$0xf] %vm232_vm0, %v3945_v28  ;;  %v3963_v46 = vor.u32 %v3962_v49, %v3958_v9  ;;  %v1975_v1 = vsel %vm5760_vm8, %v1967_v34, %v7992_v43  ;;  %3262 = vrot.lane.b32.xlu0 %v3120_v61, %s5546_s18 }
 0x1ec   : > { %v5110_v18 = vrot.slane %v668_v37, 11  ;;  %v685_v24 = vshll.u32 %v7980_v8, 16  ;;  %v471_v39 = vld [vmem:[#allocation2 + $0xcc] sm:$0x8]  ;;  %v8024_v2 = vld [vmem:[#allocation2 + $0xd0] sm:$0xf]  ;;  %v3959_v22 = vsel %vm5708_vm3, %v3954_v33, %v3958_v9  ;;  %3264 = vrot.lane.b32.xlu1 %v7970_v54, %s5546_s18 }
 0x1ed   : > { %v3585_v0 = vld [vmem:[#allocation2 + $0x164] sm:$0x1]  ;;  %v675_v5 = vrot.slane %v673_v53, 7  ;;  %v684_v31 = vrot.slane %v682_v32, 7  ;;  %v690_v35 = vshrl.u32 %v468_v3, 16  ;;  %v695_v52 = vshrl.u32 %v7998_v30, 16  ;;  %v2091_v47 = vpop.permute.xlu1 %2090 }
 0x1ee   : > { %3327 = vst.msk [vmem:[#allocation3 + $0xa0] sm:$0xf] %vm1631_vm10, %v3245_v57  ;;  %v3964_v45 = vrot.slane %v3963_v46, 4  ;;  %v3966_v27 = vshll.u32 %v3585_v0, 16  ;;  %v698_v11 = vshll.u32 %v7998_v30, 16  ;;  %v704_v14 = vshrl.u32 %v8013_v17, 16  ;;  %v3435_v38 = vpop.permute.xlu0 %3434  ;;  %v5327_v0 = vpop.f32.mrf.mxu1 }
 0x1ef   : > { %v2213_v16 = vld [vmem:[#allocation2 + $0xe4] sm:$0xf]  ;;  %3326 = vst.msk [vmem:[#allocation3 + $0x94] sm:$0xf] %vm1631_vm10, %v3243_v55  ;;  %v5503_v7 = vld [vmem:[#allocation3 + $0x140] ss:$12 sps:$4 sm:$0xff]   ;;  %v678_v41 = vor.u32 %v676_v25, %v675_v5  ;;  %v687_v56 = vor.u32 %v685_v24, %v684_v31  ;;  %2108 = vrot.lane.b32.xlu0 %v1966_v21, %s5547_s6 }
 0x1f0   : > { %4032 = vst.msk [vmem:[#allocation3 + $0x170] sm:$0xf] %vm232_vm0, %v3959_v22  ;;  %v680_v50 = vrot.slane %v675_v5, 4  ;;  %v5111_v23 = vrot.slane %v690_v35, 11  ;;  %v8041_v26 = vld [vmem:[#allocation2 + $0xd4] sm:$0xf]  ;;  %5398 = vmatmul.mubr.msk.bf16.gmra.mxu1 %vm4489_vm12, %v5503_v7  ;;  %2110 = vrot.lane.b32.xlu1 %v1975_v1, %s5547_s6 }
 0x1f1   : > { %2245 = vst.msk [vmem:[#allocation3 + $0xf4] sm:$0xf] %vm232_vm0, %v2213_v16  ;;  %v2214_v51 = vld [vmem:[#allocation2 + $0xe8] sm:$0xf]  ;;  %v3968_v19 = vrot.slane %v3966_v27, 5  ;;  %v697_v60 = vrot.slane %v695_v52, 7  ;;  %v679_v42 = vsel %vm5760_vm8, %v5110_v18, %v678_v41  ;;  %v3437_v43 = vpop.permute.xlu1 %3436 }
 0x1f2   : > { %v707_v8 = vshll.u32 %v8013_v17, 16  ;;  %2246 = vst.msk [vmem:[#allocation3 + $0x100] sm:$0xf] %vm232_vm0, %v2214_v51  ;;  %v474_v58 = vld [vmem:[#allocation2 + $0xe0] sm:$0x8]  ;;  %v688_v3 = vsel %vm5760_vm8, %v680_v50, %v687_v56  ;;  %v712_v36 = vshrl.u32 %v471_v39, 16  ;;  %v1000_v22 = vpop.permute.xlu0 %999 }
 0x1f3   : > { %v717_v10 = vshrl.u32 %v8024_v2, 16  ;;  %v475_v20 = vld [vmem:[#allocation2 + $0xe4] sm:$0xf]  ;;  %v2215_v48 = vld [vmem:[#allocation2 + $0xf8] sm:$0xf]  ;;  %v3969_v13 = vsel %vm5708_vm3, %v3964_v45, %v3968_v19  ;;  %v700_v12 = vor.u32 %v698_v11, %v697_v60  ;;  %v702_v9 = vrot.slane %v697_v60, 4  ;;  %v5328_v11 = vpop.f32.mrf.mxu1 }
 0x1f4   : > { %2174 = vst.msk [vmem:[#allocation3 + $0x9c] sm:$0xf] %vm2160_vm11, %v2091_v47  ;;  %v706_v63 = vrot.slane %v704_v14, 7  ;;  %v2216_v40 = vld [vmem:[#allocation2 + $0xfc] sm:$0xf]  ;;  %v5112_v37 = vrot.slane %v712_v36, 11  ;;  %v8111_v41 = vadd.f32 %v5328_v11, %v5327_v0 }
 0x1f5   : > { %891 = vst.msk [vmem:[#allocation3 + $0xc0] sm:$0xf] %vm232_vm0, %v679_v42  ;;  %892 = vst.msk [vmem:[#allocation3 + $0xcc] sm:$0xf] %vm232_vm0, %v688_v3  ;;  %v5504_v49 = vld [vmem:[#allocation3 + $0x158] ss:$12 sps:$4 sm:$0xff]   ;;  %v701_v59 = vsel %vm5760_vm8, %v5111_v23, %v700_v12  ;;  %v1002_v5 = vpop.permute.xlu1 %1001  ;;  %v5330_v50 = vpop.f32.mrf.mxu1 }
 0x1f6   : > { %2247 = vst.msk [vmem:[#allocation3 + $0x10c] sm:$0xf] %vm232_vm0, %v2215_v48  ;;  %4033 = vst.msk [vmem:[#allocation3 + $0x17c] sm:$0xf] %vm232_vm0, %v3969_v13  ;;  %v719_v30 = vrot.slane %v717_v10, 7  ;;  %v709_v15 = vor.u32 %v707_v8, %v706_v63  ;;  %v720_v54 = vshll.u32 %v8024_v2, 16  ;;  %5401 = vmatprep.mubr.msk.bf16.mxu1 %vm4489_vm12, %v5504_v49  ;;  %v2718_v51 = vpop.permute.xlu0 %2717 }
 0x1f7   : > { %2173 = vst.msk [vmem:[#allocation3 + $0x90] sm:$0xf] %vm2160_vm11, %v2089_v44  ;;  %v726_v34 = vshrl.u32 %v8041_v26, 16  ;;  %v476_v62 = vld [vmem:[#allocation2 + $0xe8] sm:$0xf]  ;;  %v729_v28 = vshll.u32 %v8041_v26, 16  ;;  %v5331_v14 = vpop.f32.mrf.mxu1 }
 0x1f8   : > { %2248 = vst.msk [vmem:[#allocation3 + $0x118] sm:$0xf] %vm232_vm0, %v2216_v40  ;;  %893 = vst.msk [vmem:[#allocation3 + $0xd8] sm:$0xf] %vm232_vm0, %v701_v59  ;;  %v724_v6 = vrot.slane %v719_v30, 4  ;;  %v734_v53 = vshrl.u32 %v474_v58, 16  ;;  %v710_v61 = vsel %vm5760_vm8, %v702_v9, %v709_v15  ;;  %v722_v25 = vor.u32 %v720_v54, %v719_v30 }
 0x1f9   : > { %v739_v29 = vshrl.u32 %v475_v20, 16  ;;  %3519 = vst.msk [vmem:[#allocation3 + $0xa0] sm:$0xf] %vm2160_vm11, %v3437_v43  ;;  %v728_v32 = vrot.slane %v726_v34, 7  ;;  %v742_v17 = vshll.u32 %v475_v20, 16  ;;  %v748_v18 = vshrl.u32 %v476_v62, 16  ;;  %v2720_v56 = vpop.permute.xlu1 %2719 }
 0x1fa   : > { %3518 = vst.msk [vmem:[#allocation3 + $0x94] sm:$0xf] %vm2160_vm11, %v3435_v38  ;;  %v5113_v33 = vrot.slane %v734_v53, 11  ;;  %v751_v24 = vshll.u32 %v476_v62, 16  ;;  %v3369_v39 = vld [vmem:[#allocation2 + $0x110] sm:$0xf]  ;;  %v723_v2 = vsel %vm5760_vm8, %v5112_v37, %v722_v25  ;;  %v8120_v58 = vadd.f32 %v5331_v14, %v5330_v50  ;;  %v1564_v42 = vpop.permute.xlu0 %1563  ;;  %v8166_v14 = vpop.f32.mrf.mxu0 }
 0x1fb   : > { %894 = vst.msk [vmem:[#allocation3 + $0xe4] sm:$0xf] %vm232_vm0, %v710_v61  ;;  %v741_v46 = vrot.slane %v739_v29, 7  ;;  %v731_v57 = vor.u32 %v729_v28, %v728_v32  ;;  %v3368_v31 = vld [vmem:[#allocation2 + $0x10c] sm:$0xf]  ;;  %v750_v55 = vrot.slane %v748_v18, 7  ;;  %3456 = vrot.lane.b32.xlu1 %v3369_v39, %s5547_s6 }
 0x1fc   : > { %895 = vst.msk [vmem:[#allocation3 + $0xf0] sm:$0xf] %vm232_vm0, %v723_v2  ;;  %3454 = vrot.lane.b32.xlu0 %v3368_v31, %s5547_s6 }
 0x1fd   : > { %v744_v35 = vor.u32 %v742_v17, %v741_v46  ;;  %v746_v52 = vrot.slane %v741_v46, 4  ;;  %1083 = vst.msk [vmem:[#allocation3 + $0xb4] sm:$0xf] %vm1067_vm9, %v1002_v5  ;;  %v5505_v45 = vld [vmem:[#allocation3 + $0x170] ss:$12 sps:$4 sm:$0xff]   ;;  %v732_v27 = vsel %vm5760_vm8, %v724_v6, %v731_v57  ;;  %v753_v7 = vor.u32 %v751_v24, %v750_v55  ;;  %v1566_v47 = vpop.permute.xlu1 %1565 }
 0x1fe   : > { %1082 = vst.msk [vmem:[#allocation3 + $0xa8] sm:$0xf] %vm1067_vm9, %v1000_v22  ;;  %5402 = vmatmul.mubr.msk.bf16.gmra.mxu1 %vm4489_vm12, %v5505_v45  ;;  %2800 = vst.msk [vmem:[#allocation3 + $0xb8] sm:$0xf] %vm1067_vm9, %v2720_v56  ;;  %v3247_v3 = vpop.permute.xlu0 %3246 }
 0x1ff   : > { %896 = vst.msk [vmem:[#allocation3 + $0xfc] sm:$0xf] %vm232_vm0, %v732_v27  ;;  %v745_v16 = vsel %vm5760_vm8, %v5113_v33, %v744_v35  ;;  %v754_v26 = vsel %vm5760_vm8, %v746_v52, %v753_v7 }
 0x200   : > { %897 = vst.msk [vmem:[#allocation3 + $0x108] sm:$0xf] %vm232_vm0, %v745_v16  ;;  %v4060_v23 = vld [vmem:[#allocation3 + $0x9c] sm:$0xff]  ;;  %898 = vst.msk [vmem:[#allocation3 + $0x114] sm:$0xf] %vm232_vm0, %v754_v26  ;;  %vm4956_vm0 = vcmask 523264  }
 0x201   : > { %v4058_v19 = vld [vmem:[#allocation3 + $0x90] sm:$0xff]  ;;  %2799 = vst.msk [vmem:[#allocation3 + $0xac] sm:$0xf] %vm1067_vm9, %v2718_v51  ;;  %v3249_v4 = vpop.permute.xlu1 %3248 }
 0x202   : > { %v5506_v60 = vld [vmem:[#allocation3 + $0x94] ss:$12 sps:$4 sm:$0xff]   ;;  %v5169_v8 = vcombine.low %v4058_v19, %v4060_v23  ;;  %1647 = vst.msk [vmem:[#allocation3 + $0xb4] sm:$0xf] %vm1631_vm10, %v1566_v47  ;;  %1646 = vst.msk [vmem:[#allocation3 + $0xa8] sm:$0xf] %vm1631_vm10, %v1564_v42  ;;  %v2093_v10 = vpop.permute.xlu0 %2092 }
 0x203   : > { %4618 = vmatprep.mubr.bf16.mxu0 %v5506_v60  ;;  %3329 = vst.msk [vmem:[#allocation3 + $0xb8] sm:$0xf] %vm1631_vm10, %v3249_v4  ;;  %3328 = vst.msk [vmem:[#allocation3 + $0xac] sm:$0xf] %vm1631_vm10, %v3247_v3  ;;  %v5333_v34 = vpop.f32.mrf.mxu1 }
 0x204   : > { %4619 = vmatmul.mubr.bf16.gmra.mxu0 %v5169_v8  ;;  %2175 = vst.msk [vmem:[#allocation3 + $0xa8] sm:$0xf] %vm2160_vm11, %v2093_v10 }
 0x205   : > { %v2095_v36 = vpop.permute.xlu1 %2094  ;;  %v5334_v6 = vpop.f32.mrf.mxu1 }
 0x206   : > { %2176 = vst.msk [vmem:[#allocation3 + $0xb4] sm:$0xf] %vm2160_vm11, %v2095_v36  ;;  %v3439_v48 = vpop.permute.xlu0 %3438  ;;  %v8142_v28 = vadd.f32 %v5334_v6, %v5333_v34  ;;  %v5256_v36 = vpop.f32.mrf.mxu0 }
 0x207   : > { %3520 = vst.msk [vmem:[#allocation3 + $0xac] sm:$0xf] %vm2160_vm11, %v3439_v48  ;;  %v5336_v53 = vpop.f32.mrf.mxu1 }
 0x209   : > { %v3441_v20 = vpop.permute.xlu1 %3440  ;;  %v5337_v61 = vpop.f32.mrf.mxu1 }
 0x20a   : > { %3521 = vst.msk [vmem:[#allocation3 + $0xb8] sm:$0xf] %vm2160_vm11, %v3441_v20  ;;  %v1004_v13 = vpop.permute.xlu0 %1003  ;;  %v8146_v25 = vadd.f32 %v5337_v61, %v5336_v53 }
 0x20b   : > { %1084 = vst.msk [vmem:[#allocation3 + $0xc0] sm:$0xf] %vm1067_vm9, %v1004_v13  ;;  %v5258_v13 = vpop.f32.mrf.mxu0 }
 0x20d   : > { %v1006_v44 = vpop.permute.xlu1 %1005 }
 0x20e   : > { %1085 = vst.msk [vmem:[#allocation3 + $0xcc] sm:$0xf] %vm1067_vm9, %v1006_v44  ;;  %v2722_v63 = vpop.permute.xlu0 %2721  ;;  %v4062_v40 = vld [vmem:[#allocation3 + $0xa8] sm:$0xff] }
 0x20f   : > { %2801 = vst.msk [vmem:[#allocation3 + $0xc4] sm:$0xf] %vm1067_vm9, %v2722_v63 }
 0x211   : > { %v2724_v12 = vpop.permute.xlu1 %2723  ;;  %v4064_v9 = vld [vmem:[#allocation3 + $0xb4] sm:$0xff] }
 0x212   : > { %2802 = vst.msk [vmem:[#allocation3 + $0xd0] sm:$0xf] %vm1067_vm9, %v2724_v12  ;;  %v5508_v21 = vld [vmem:[#allocation3 + $0xac] ss:$12 sps:$4 sm:$0xff]   ;;  %v5172_v1 = vcombine.low %v4062_v40, %v4064_v9  ;;  %v1568_v37 = vpop.permute.xlu0 %1567  ;;  %v5259_v40 = vpop.f32.mrf.mxu0 }
 0x213   : > { %4626 = vmatprep.mubr.bf16.mxu0 %v5508_v21  ;;  %1648 = vst.msk [vmem:[#allocation3 + $0xc0] sm:$0xf] %vm1631_vm10, %v1568_v37 }
 0x214   : > { %4627 = vmatmul.mubr.bf16.gmra.mxu0 %v5172_v1 }
 0x215   : > { %v1570_v49 = vpop.permute.xlu1 %1569 }
 0x216   : > { %1649 = vst.msk [vmem:[#allocation3 + $0xcc] sm:$0xf] %vm1631_vm10, %v1570_v49  ;;  %v3251_v59 = vpop.permute.xlu0 %3250 }
 0x217   : > { %3330 = vst.msk [vmem:[#allocation3 + $0xc4] sm:$0xf] %vm1631_vm10, %v3251_v59 }
 0x219   : > { %v3253_v30 = vpop.permute.xlu1 %3252 }
 0x21a   : > { %3331 = vst.msk [vmem:[#allocation3 + $0xd0] sm:$0xf] %vm1631_vm10, %v3253_v30  ;;  %v2097_v54 = vpop.permute.xlu0 %2096  ;;  %v5261_v30 = vpop.f32.mrf.mxu0 }
 0x21b   : > { %2177 = vst.msk [vmem:[#allocation3 + $0xc0] sm:$0xf] %vm2160_vm11, %v2097_v54 }
 0x21c   : > { %v5262_v54 = vpop.f32.mrf.mxu0 }
 0x21d   : > { %v2099_v15 = vpop.permute.xlu1 %2098 }
 0x21e   : > { %2178 = vst.msk [vmem:[#allocation3 + $0xcc] sm:$0xf] %vm2160_vm11, %v2099_v15  ;;  %v3443_v43 = vpop.permute.xlu0 %3442 }
 0x21f   : > { %3522 = vst.msk [vmem:[#allocation3 + $0xc4] sm:$0xf] %vm2160_vm11, %v3443_v43  ;;  %v5264_v43 = vpop.f32.mrf.mxu0 }
 0x221   : > { %v3445_v62 = vpop.permute.xlu1 %3444 }
 0x222   : > { %3523 = vst.msk [vmem:[#allocation3 + $0xd0] sm:$0xf] %vm2160_vm11, %v3445_v62  ;;  %v1008_v38 = vpop.permute.xlu0 %1007 }
 0x223   : > { %1086 = vst.msk [vmem:[#allocation3 + $0xd8] sm:$0xf] %vm1067_vm9, %v1008_v38 }
 0x225   : > { %v1010_v29 = vpop.permute.xlu1 %1009 }
 0x226   : > { %1087 = vst.msk [vmem:[#allocation3 + $0xe4] sm:$0xf] %vm1067_vm9, %v1010_v29  ;;  %v2726_v33 = vpop.permute.xlu0 %2725  ;;  %v4066_v46 = vld [vmem:[#allocation3 + $0xc0] sm:$0xff]  ;;  %v5265_v29 = vpop.f32.mrf.mxu0 }
 0x227   : > { %2803 = vst.msk [vmem:[#allocation3 + $0xdc] sm:$0xf] %vm1067_vm9, %v2726_v33 }
 0x228   : > { %v5267_v61 = vpop.f32.mrf.mxu0 }
 0x229   : > { %v2728_v32 = vpop.permute.xlu1 %2727  ;;  %v4068_v17 = vld [vmem:[#allocation3 + $0xcc] sm:$0xff] }
 0x22a   : > { %2804 = vst.msk [vmem:[#allocation3 + $0xe8] sm:$0xf] %vm1067_vm9, %v2728_v32  ;;  %v5510_v18 = vld [vmem:[#allocation3 + $0xc4] ss:$12 sps:$4 sm:$0xff]   ;;  %v5175_v24 = vcombine.low %v4066_v46, %v4068_v17  ;;  %v1572_v2 = vpop.permute.xlu0 %1571  ;;  %v5268_v17 = vpop.f32.mrf.mxu0 }
 0x22b   : > { %4634 = vmatprep.mubr.bf16.mxu0 %v5510_v18  ;;  %1650 = vst.msk [vmem:[#allocation3 + $0xd8] sm:$0xf] %vm1631_vm10, %v1572_v2 }
 0x22c   : > { %4635 = vmatmul.mubr.bf16.gmra.mxu0 %v5175_v24  ;;  %v5270_v33 = vpop.f32.mrf.mxu0 }
 0x22d   : > { %v1574_v39 = vpop.permute.xlu1 %1573 }
 0x22e   : > { %1651 = vst.msk [vmem:[#allocation3 + $0xe4] sm:$0xf] %vm1631_vm10, %v1574_v39  ;;  %v3255_v0 = vpop.permute.xlu0 %3254  ;;  %v5271_v24 = vpop.f32.mrf.mxu0 }
 0x22f   : > { %3332 = vst.msk [vmem:[#allocation3 + $0xdc] sm:$0xf] %vm1631_vm10, %v3255_v0  ;;  %v5263_v0 = vadd.f32 %v5262_v54, %v5261_v30 }
 0x231   : > { %v3257_v57 = vpop.permute.xlu1 %3256 }
 0x232   : > { %3333 = vst.msk [vmem:[#allocation3 + $0xe8] sm:$0xf] %vm1631_vm10, %v3257_v57  ;;  %v2101_v31 = vpop.permute.xlu0 %2100 }
 0x233   : > { %2179 = vst.msk [vmem:[#allocation3 + $0xd8] sm:$0xf] %vm2160_vm11, %v2101_v31 }
 0x235   : > { %v2103_v5 = vpop.permute.xlu1 %2102 }
 0x236   : > { %2180 = vst.msk [vmem:[#allocation3 + $0xe4] sm:$0xf] %vm2160_vm11, %v2103_v5  ;;  %v3447_v52 = vpop.permute.xlu0 %3446 }
 0x237   : > { %3524 = vst.msk [vmem:[#allocation3 + $0xdc] sm:$0xf] %vm2160_vm11, %v3447_v52  ;;  %v5339_v19 = vpop.f32.mrf.mxu1 }
 0x239   : > { %v3449_v35 = vpop.permute.xlu1 %3448  ;;  %v5340_v47 = vpop.f32.mrf.mxu1 }
 0x23a   : > { %3525 = vst.msk [vmem:[#allocation3 + $0xe8] sm:$0xf] %vm2160_vm11, %v3449_v35  ;;  %v1012_v22 = vpop.permute.xlu0 %1011  ;;  %v8170_v42 = vadd.f32 %v5340_v47, %v5339_v19  ;;  %v5257_v35 = vadd.f32 %v5256_v36, %v8166_v14  ;;  %v5269_v14 = vadd.f32 %v5268_v17, %v5267_v61 }
 0x23b   : > { %1088 = vst.msk [vmem:[#allocation3 + $0xf0] sm:$0xf] %vm1067_vm9, %v1012_v22  ;;  %v5342_v4 = vpop.f32.mrf.mxu1  ;;  %v5266_v22 = vadd.f32 %v5265_v29, %v5264_v43 }
 0x23d   : > { %v1014_v55 = vpop.permute.xlu1 %1013  ;;  %v5343_v20 = vpop.f32.mrf.mxu1 }
 0x23e   : > { %1089 = vst.msk [vmem:[#allocation3 + $0xfc] sm:$0xf] %vm1067_vm9, %v1014_v55  ;;  %v2730_v11 = vpop.permute.xlu0 %2729  ;;  %v4070_v16 = vld [vmem:[#allocation3 + $0xd8] sm:$0xff]  ;;  %v8174_v48 = vadd.f32 %v5343_v20, %v5342_v4 }
 0x23f   : > { %2805 = vst.msk [vmem:[#allocation3 + $0xf4] sm:$0xf] %vm1067_vm9, %v2730_v11  ;;  %v8200_v55 = vld [vmem:[%s8355_s2] ss:$0 sm:$0xff]  ;;  %v5260_v11 = vadd.f32 %v5259_v40, %v5258_v13 }
 0x240   : > { %v4589_v40 = vadd.f32 %v5269_v14, %v8200_v55 }
 0x241   : > { %v2732_v45 = vpop.permute.xlu1 %2731  ;;  %v4072_v27 = vld [vmem:[#allocation3 + $0xe4] sm:$0xff]  ;;  %v4576_v47 = vadd.f32 %v5260_v11, %v8200_v55 }
 0x242   : > { %2806 = vst.msk [vmem:[#allocation3 + $0x100] sm:$0xf] %vm1067_vm9, %v2732_v45  ;;  %v5512_v7 = vld [vmem:[#allocation3 + $0xdc] ss:$12 sps:$4 sm:$0xff]   ;;  %v5178_v50 = vcombine.low %v4070_v16, %v4072_v27  ;;  %v1576_v23 = vpop.permute.xlu0 %1575  ;;  %v4581_v27 = vadd.f32 %v5263_v0, %v8200_v55 }
 0x243   : > { %4642 = vmatprep.mubr.bf16.mxu0 %v5512_v7  ;;  %1652 = vst.msk [vmem:[#allocation3 + $0xf0] sm:$0xf] %vm1631_vm10, %v1576_v23 }
 0x244   : > { %4643 = vmatmul.mubr.bf16.gmra.mxu0 %v5178_v50  ;;  %v4573_v50 = vadd.f32 %v5257_v35, %v8200_v55 }
 0x245   : > { %v1578_v56 = vpop.permute.xlu1 %1577 }
 0x246   : > { %1653 = vst.msk [vmem:[#allocation3 + $0xfc] sm:$0xf] %vm1631_vm10, %v1578_v56  ;;  %v3259_v51 = vpop.permute.xlu0 %3258 }
 0x247   : > { %3334 = vst.msk [vmem:[#allocation3 + $0xf4] sm:$0xf] %vm1631_vm10, %v3259_v51 }
 0x249   : > { %v3261_v26 = vpop.permute.xlu1 %3260 }
 0x24a   : > { %3335 = vst.msk [vmem:[#allocation3 + $0x100] sm:$0xf] %vm1631_vm10, %v3261_v26  ;;  %v2105_v8 = vpop.permute.xlu0 %2104 }
 0x24b   : > { %2181 = vst.msk [vmem:[#allocation3 + $0xf0] sm:$0xf] %vm2160_vm11, %v2105_v8 }
 0x24d   : > { %v2107_v60 = vpop.permute.xlu1 %2106 }
 0x24e   : > { %2182 = vst.msk [vmem:[#allocation3 + $0xfc] sm:$0xf] %vm2160_vm11, %v2107_v60  ;;  %v3451_v10 = vpop.permute.xlu0 %3450  ;;  %v4584_v60 = vadd.f32 %v5266_v22, %v8200_v55 }
 0x24f   : > { %3526 = vst.msk [vmem:[#allocation3 + $0xf4] sm:$0xf] %vm2160_vm11, %v3451_v10 }
 0x250   : > { %v5273_v39 = vpop.f32.mrf.mxu0 }
 0x251   : > { %v3453_v3 = vpop.permute.xlu1 %3452 }
 0x252   : > { %3527 = vst.msk [vmem:[#allocation3 + $0x100] sm:$0xf] %vm2160_vm11, %v3453_v3  ;;  %v1016_v12 = vpop.permute.xlu0 %1015  ;;  %v5274_v5 = vpop.f32.mrf.mxu0 }
 0x253   : > { %1090 = vst.msk [vmem:[#allocation3 + $0x108] sm:$0xf] %vm1067_vm9, %v1016_v12  ;;  %v5275_v56 = vadd.f32 %v5274_v5, %v5273_v39 }
 0x254   : > { %v5276_v45 = vpop.f32.mrf.mxu0 }
 0x255   : > { %v1018_v44 = vpop.permute.xlu1 %1017 }
 0x256   : > { %1091 = vst.msk [vmem:[#allocation3 + $0x114] sm:$0xf] %vm1067_vm9, %v1018_v44  ;;  %v2734_v21 = vpop.permute.xlu0 %2733  ;;  %v4074_v1 = vld [vmem:[#allocation3 + $0xf0] sm:$0xff]  ;;  %v5277_v26 = vpop.f32.mrf.mxu0  ;;  %v4597_v44 = vadd.f32 %v5275_v56, %v8200_v55 }
 0x257   : > { %2807 = vst.msk [vmem:[#allocation3 + $0x10c] sm:$0xf] %vm1067_vm9, %v2734_v21  ;;  %v5278_v10 = vadd.f32 %v5277_v26, %v5276_v45 }
 0x259   : > { %v2736_v9 = vpop.permute.xlu1 %2735  ;;  %v4076_v63 = vld [vmem:[#allocation3 + $0xfc] sm:$0xff] }
 0x25a   : > { %2808 = vst.msk [vmem:[#allocation3 + $0x118] sm:$0xf] %vm1067_vm9, %v2736_v9  ;;  %v5514_v49 = vld [vmem:[#allocation3 + $0xf4] ss:$12 sps:$4 sm:$0xff]   ;;  %v5181_v37 = vcombine.low %v4074_v1, %v4076_v63  ;;  %v1580_v15 = vpop.permute.xlu0 %1579 }
 0x25b   : > { %4650 = vmatprep.mubr.bf16.mxu0 %v5514_v49  ;;  %1654 = vst.msk [vmem:[#allocation3 + $0x108] sm:$0xf] %vm1631_vm10, %v1580_v15 }
 0x25c   : > { %4651 = vmatmul.mubr.bf16.gmra.mxu0 %v5181_v37  ;;  %v5272_v37 = vadd.f32 %v5271_v24, %v5270_v33 }
 0x25d   : > { %v1582_v59 = vpop.permute.xlu1 %1581 }
 0x25e   : > { %1655 = vst.msk [vmem:[#allocation3 + $0x114] sm:$0xf] %vm1631_vm10, %v1582_v59  ;;  %v3263_v62 = vpop.permute.xlu0 %3262  ;;  %v4600_v59 = vadd.f32 %v5278_v10, %v8200_v55  ;;  %v4592_v61 = vadd.f32 %v5272_v37, %v8200_v55 }
 0x25f   : > { %3336 = vst.msk [vmem:[#allocation3 + $0x10c] sm:$0xf] %vm1631_vm10, %v3263_v62 }
 0x261   : > { %v3265_v34 = vpop.permute.xlu1 %3264 }
 0x262   : > { %3337 = vst.msk [vmem:[#allocation3 + $0x118] sm:$0xf] %vm1631_vm10, %v3265_v34  ;;  %v2109_v53 = vpop.permute.xlu0 %2108 }
 0x263   : > { %2183 = vst.msk [vmem:[#allocation3 + $0x108] sm:$0xf] %vm2160_vm11, %v2109_v53 }
 0x265   : > { %v2111_v6 = vpop.permute.xlu1 %2110 }
 0x266   : > { %2184 = vst.msk [vmem:[#allocation3 + $0x114] sm:$0xf] %vm2160_vm11, %v2111_v6 }
 0x26d   : > { %v3457_v38 = vpop.permute.xlu1 %3456  ;;  %v5518_v18 = vld [vmem:[#allocation3 + $0x108] ss:$12 sps:$4 sm:$0xff]   ;;  %v8188_v2 = vpop.f32.mrf.mxu1 }
 0x26e   : > { %v3455_v32 = vpop.permute.xlu0 %3454  ;;  %3529 = vst.msk [vmem:[#allocation3 + $0x118] sm:$0xf] %vm2160_vm11, %v3457_v38 }
 0x26f   : > { %3528 = vst.msk [vmem:[#allocation3 + $0x10c] sm:$0xf] %vm2160_vm11, %v3455_v32  ;;  %v8190_v57 = vpop.f32.mrf.mxu1 }
 0x271   : > { %v8192_v31 = vpop.f32.mrf.mxu1 }
 0x273   : > { %v8195_v52 = vpop.f32.mrf.mxu1 }
 0x275   : > { %v5375_v16 = vpop.f32.mrf.mxu1 }
 0x276   : > { %v5516_v46 = vld [vmem:[#allocation3 + $0x10c] ss:$12 sps:$4 sm:$0xff]   ;;  %v4742_v7 = vadd.f32 %v5375_v16, %v4581_v27 }
 0x277   : > { %4658 = vmatprep.mubr.bf16.mxu0 %v5516_v46  ;;  %v4733_v23 = vpop.f32.mrf.mxu1 }
 0x278   : > { %4659 = vmatmul.mubr.bf16.gmra.mxu0 %v5518_v18  ;;  %vm4862_vm13 = vcmp.ge.f32.partialorder %v4742_v7, 0.0  ;;  %v4894_v51 = vmul.f32 0.01, %v4742_v7  ;;  %v4734_v19 = vadd.f32 %v4733_v23, %v4573_v50 }
 0x279   : > { %v5376_v8 = vpop.f32.mrf.mxu1 }
 0x27a   : > { %v4926_v4 = vsel %vm4862_vm13, %v4742_v7, %v4894_v51  ;;  %vm4860_vm14 = vcmp.ge.f32.partialorder %v4734_v19, 0.0  ;;  %v4892_v3 = vmul.f32 0.01, %v4734_v19  ;;  %v4745_v36 = vadd.f32 %v5376_v8, %v4584_v60 }
 0x27b   : > { %4959 = vst.msk [vmem:[%s5611_s25 + $0x10] sm:$0xff] %vm4956_vm0, %v4926_v4  ;;  %v4736_v20 = vpop.f32.mrf.mxu1 }
 0x27c   : > { %v4924_v13 = vsel %vm4860_vm14, %v4734_v19, %v4892_v3  ;;  %vm4863_vm15 = vcmp.ge.f32.partialorder %v4745_v36, 0.0  ;;  %v4895_v12 = vmul.f32 0.01, %v4745_v36  ;;  %v4737_v9 = vadd.f32 %v4736_v20, %v4576_v47 }
 0x27d   : > { %4957 = vst.msk [vmem:[%s5611_s25] sm:$0xff] %vm4956_vm0, %v4924_v13  ;;  %v5379_v63 = vpop.f32.mrf.mxu1 }
 0x27e   : > { %v4927_v21 = vsel %vm4863_vm15, %v4745_v36, %v4895_v12  ;;  %vm4861_vm1 = vcmp.ge.f32.partialorder %v4737_v9, 0.0  ;;  %v4893_v1 = vmul.f32 0.01, %v4737_v9  ;;  %v4758_v49 = vadd.f32 %v5379_v63, %v4597_v44 }
 0x27f   : > { %4960 = vst.msk [vmem:[%s5611_s25 + $0x18] sm:$0xff] %vm4956_vm0, %v4927_v21  ;;  %v4749_v30 = vpop.f32.mrf.mxu1 }
 0x280   : > { %v4925_v15 = vsel %vm4861_vm1, %v4737_v9, %v4893_v1  ;;  %vm4866_vm2 = vcmp.ge.f32.partialorder %v4758_v49, 0.0  ;;  %v4898_v54 = vmul.f32 0.01, %v4758_v49  ;;  %v4750_v34 = vadd.f32 %v4749_v30, %v4589_v40 }
 0x281   : > { %4958 = vst.msk [vmem:[%s5611_s25 + $0x8] sm:$0xff] %vm4956_vm0, %v4925_v15  ;;  %v5380_v43 = vpop.f32.mrf.mxu1 }
 0x282   : > { %v4930_v6 = vsel %vm4866_vm2, %v4758_v49, %v4898_v54  ;;  %vm4864_vm3 = vcmp.ge.f32.partialorder %v4750_v34, 0.0  ;;  %v4896_v53 = vmul.f32 0.01, %v4750_v34  ;;  %v4761_v29 = vadd.f32 %v5380_v43, %v4600_v59 }
 0x283   : > { %4963 = vst.msk [vmem:[%s5611_s25 + $0x30] sm:$0xff] %vm4956_vm0, %v4930_v6  ;;  %v4752_v32 = vpop.f32.mrf.mxu1  ;;  %v4677_v43 = vadd.f32 %v8142_v28, %v8200_v55 }
 0x284   : > { %v4928_v17 = vsel %vm4864_vm3, %v4750_v34, %v4896_v53  ;;  %vm4867_vm4 = vcmp.ge.f32.partialorder %v4761_v29, 0.0  ;;  %v4899_v33 = vmul.f32 0.01, %v4761_v29  ;;  %v4753_v18 = vadd.f32 %v4752_v32, %v4592_v61 }
 0x285   : > { %4961 = vst.msk [vmem:[%s5611_s25 + $0x20] sm:$0xff] %vm4956_vm0, %v4928_v17  ;;  %v5347_v61 = vadd.f32 %v8190_v57, %v8188_v2  ;;  %v4680_v17 = vadd.f32 %v8146_v25, %v8200_v55  ;;  %v5350_v2 = vadd.f32 %v8195_v52, %v8192_v31 }
 0x286   : > { %v5279_v62 = vpop.f32.mrf.mxu0  ;;  %v4931_v0 = vsel %vm4867_vm4, %v4761_v29, %v4899_v33  ;;  %vm4865_vm5 = vcmp.ge.f32.partialorder %v4753_v18, 0.0  ;;  %v4897_v35 = vmul.f32 0.01, %v4753_v18 }
 0x287   : > { %4964 = vst.msk [vmem:[%s5611_s25 + $0x38] sm:$0xff] %vm4956_vm0, %v4931_v0  ;;  %v4693_v57 = vadd.f32 %v5347_v61, %v8200_v55 }
 0x288   : > { %v5280_v38 = vpop.f32.mrf.mxu0  ;;  %v5383_v39 = vpop.f32.mrf.mxu1  ;;  %v4929_v16 = vsel %vm4865_vm5, %v4753_v18, %v4897_v35 }
 0x289   : > { %v5281_v46 = vadd.f32 %v5280_v38, %v5279_v62  ;;  %4962 = vst.msk [vmem:[%s5611_s25 + $0x28] sm:$0xff] %vm4956_vm0, %v4929_v16  ;;  %v4669_v38 = vadd.f32 %v8111_v41, %v8200_v55  ;;  %v4696_v16 = vadd.f32 %v5350_v2, %v8200_v55 }
 0x28a   : > { %v5282_v24 = vpop.f32.mrf.mxu0  ;;  %v4765_v45 = vpop.f32.mrf.mxu1 }
 0x28b   : > { %v4605_v5 = vadd.f32 %v5281_v46, %v8200_v55 }
 0x28c   : > { %v5283_v22 = vpop.f32.mrf.mxu0  ;;  %v5384_v7 = vpop.f32.mrf.mxu1 }
 0x28d   : > { %v5284_v27 = vadd.f32 %v5283_v22, %v5282_v24  ;;  %v4766_v11 = vadd.f32 %v4765_v45, %v4605_v5  ;;  %v4672_v24 = vadd.f32 %v8120_v58, %v8200_v55  ;;  %v4685_v45 = vadd.f32 %v8170_v42, %v8200_v55 }
 0x28e   : > { %v4768_v23 = vpop.f32.mrf.mxu1 }
 0x28f   : > { %vm4868_vm6 = vcmp.ge.f32.partialorder %v4766_v11, 0.0  ;;  %v4900_v50 = vmul.f32 0.01, %v4766_v11  ;;  %v4608_v56 = vadd.f32 %v5284_v27, %v8200_v55 }
 0x290   : > { %v8230_v19 = vpop.f32.mrf.mxu1 }
 0x291   : > { %v4932_v26 = vsel %vm4868_vm6, %v4766_v11, %v4900_v50  ;;  %v4769_v51 = vadd.f32 %v4768_v23, %v4608_v56 }
 0x292   : > { %4965 = vst.msk [vmem:[%s5611_s25 + $0x40] sm:$0xff] %vm4956_vm0, %v4932_v26  ;;  %v8232_v14 = vpop.f32.mrf.mxu1 }
 0x293   : > { %vm4869_vm7 = vcmp.ge.f32.partialorder %v4769_v51, 0.0  ;;  %v4901_v60 = vmul.f32 0.01, %v4769_v51 }
 0x294   : > { %v8236_v47 = vpop.f32.mrf.mxu1 }
 0x295   : > { %v4933_v8 = vsel %vm4869_vm7, %v4769_v51, %v4901_v60 }
 0x296   : > { %4966 = vst.msk [vmem:[%s5611_s25 + $0x48] sm:$0xff] %vm4956_vm0, %v4933_v8  ;;  %v8238_v4 = vpop.f32.mrf.mxu1 }
 0x299   : > { %v8240_v3 = vpop.f32.mrf.mxu1 }
 0x29b   : > { %v8242_v36 = vpop.f32.mrf.mxu1 }
 0x29d   : > { %v8244_v20 = vpop.f32.mrf.mxu1 }
 0x29f   : > { %v8246_v13 = vpop.f32.mrf.mxu1 }
 0x2a6   : > { %v5285_v10 = vpop.f32.mrf.mxu0  ;;  %v8248_v63 = vpop.f32.mrf.mxu1 }
 0x2a8   : > { %v5286_v44 = vpop.f32.mrf.mxu0  ;;  %v8251_v1 = vpop.f32.mrf.mxu1 }
 0x2a9   : > { %v5287_v12 = vadd.f32 %v5286_v44, %v5285_v10  ;;  %v4688_v10 = vadd.f32 %v8174_v48, %v8200_v55 }
 0x2aa   : > { %v5288_v9 = vpop.f32.mrf.mxu0  ;;  %v8253_v30 = vpop.f32.mrf.mxu1 }
 0x2ab   : > { %v4613_v40 = vadd.f32 %v5287_v12, %v8200_v55 }
 0x2ac   : > { %v5289_v21 = vpop.f32.mrf.mxu0  ;;  %v8256_v54 = vpop.f32.mrf.mxu1 }
 0x2ad   : > { %v4774_v49 = vadd.f32 %v5383_v39, %v4613_v40  ;;  %v5290_v37 = vadd.f32 %v5289_v21, %v5288_v9 }
 0x2af   : > { %vm4870_vm8 = vcmp.ge.f32.partialorder %v4774_v49, 0.0  ;;  %v4902_v59 = vmul.f32 0.01, %v4774_v49  ;;  %v4616_v15 = vadd.f32 %v5290_v37, %v8200_v55 }
 0x2b0   : > { %v5399_v6 = vpop.f32.mrf.mxu1 }
 0x2b1   : > { %v4934_v34 = vsel %vm4870_vm8, %v4774_v49, %v4902_v59  ;;  %v4777_v62 = vadd.f32 %v5384_v7, %v4616_v15  ;;  %v4838_v29 = vadd.f32 %v5399_v6, %v4677_v43 }
 0x2b2   : > { %4967 = vst.msk [vmem:[%s5611_s25 + $0x50] sm:$0xff] %vm4956_vm0, %v4934_v34  ;;  %v4829_v32 = vpop.f32.mrf.mxu1 }
 0x2b3   : > { %vm4871_vm9 = vcmp.ge.f32.partialorder %v4777_v62, 0.0  ;;  %v4903_v53 = vmul.f32 0.01, %v4777_v62  ;;  %vm4886_vm10 = vcmp.ge.f32.partialorder %v4838_v29, 0.0  ;;  %v4918_v28 = vmul.f32 0.01, %v4838_v29 }
 0x2b4   : > { %v4830_v46 = vadd.f32 %v4829_v32, %v4669_v38  ;;  %v5400_v18 = vpop.f32.mrf.mxu1 }
 0x2b5   : > { %v4935_v33 = vsel %vm4871_vm9, %v4777_v62, %v4903_v53  ;;  %v4950_v41 = vsel %vm4886_vm10, %v4838_v29, %v4918_v28  ;;  %v4841_v0 = vadd.f32 %v5400_v18, %v4680_v17 }
 0x2b6   : > { %4968 = vst.msk [vmem:[%s5611_s25 + $0x58] sm:$0xff] %vm4956_vm0, %v4935_v33  ;;  %vm4884_vm11 = vcmp.ge.f32.partialorder %v4830_v46, 0.0  ;;  %v4916_v39 = vmul.f32 0.01, %v4830_v46  ;;  %4983 = vst.msk [vmem:[%s5611_s25 + $0xd0] sm:$0xff] %vm4956_vm0, %v4950_v41  ;;  %v4832_v25 = vpop.f32.mrf.mxu1 }
 0x2b7   : > { %vm4887_vm12 = vcmp.ge.f32.partialorder %v4841_v0, 0.0  ;;  %v4919_v35 = vmul.f32 0.01, %v4841_v0  ;;  %v4833_v22 = vadd.f32 %v4832_v25, %v4672_v24 }
 0x2b8   : > { %v4948_v5 = vsel %vm4884_vm11, %v4830_v46, %v4916_v39 }
 0x2b9   : > { %4981 = vst.msk [vmem:[%s5611_s25 + $0xc0] sm:$0xff] %vm4956_vm0, %v4948_v5  ;;  %v4951_v27 = vsel %vm4887_vm12, %v4841_v0, %v4919_v35  ;;  %vm4885_vm13 = vcmp.ge.f32.partialorder %v4833_v22, 0.0  ;;  %v4917_v11 = vmul.f32 0.01, %v4833_v22 }
 0x2ba   : > { %4984 = vst.msk [vmem:[%s5611_s25 + $0xd8] sm:$0xff] %vm4956_vm0, %v4951_v27 }
 0x2bb   : > { %v4949_v7 = vsel %vm4885_vm13, %v4833_v22, %v4917_v11 }
 0x2bc   : > { %4982 = vst.msk [vmem:[%s5611_s25 + $0xc8] sm:$0xff] %vm4956_vm0, %v4949_v7 }
 0x2be   : > { %v5403_v58 = vpop.f32.mrf.mxu1 }
 0x2bf   : > { %v4854_v31 = vadd.f32 %v5403_v58, %v4693_v57 }
 0x2c0   : > { %v4845_v52 = vpop.f32.mrf.mxu1 }
 0x2c1   : > { %vm4890_vm14 = vcmp.ge.f32.partialorder %v4854_v31, 0.0  ;;  %v4922_v50 = vmul.f32 0.01, %v4854_v31  ;;  %v4846_v56 = vadd.f32 %v4845_v52, %v4685_v45 }
 0x2c2   : > { %v5404_v26 = vpop.f32.mrf.mxu1 }
 0x2c3   : > { %v4954_v42 = vsel %vm4890_vm14, %v4854_v31, %v4922_v50  ;;  %vm4888_vm15 = vcmp.ge.f32.partialorder %v4846_v56, 0.0  ;;  %v4920_v51 = vmul.f32 0.01, %v4846_v56  ;;  %v4857_v60 = vadd.f32 %v5404_v26, %v4696_v16 }
 0x2c4   : > { %v5291_v23 = vpop.f32.mrf.mxu0  ;;  %4987 = vst.msk [vmem:[%s5611_s25 + $0xf0] sm:$0xff] %vm4956_vm0, %v4954_v42  ;;  %v4848_v44 = vpop.f32.mrf.mxu1 }
 0x2c5   : > { %v4952_v12 = vsel %vm4888_vm15, %v4846_v56, %v4920_v51  ;;  %vm4891_vm1 = vcmp.ge.f32.partialorder %v4857_v60, 0.0  ;;  %v4923_v9 = vmul.f32 0.01, %v4857_v60  ;;  %v4849_v21 = vadd.f32 %v4848_v44, %v4688_v10 }
 0x2c6   : > { %v5292_v8 = vpop.f32.mrf.mxu0  ;;  %4985 = vst.msk [vmem:[%s5611_s25 + $0xe0] sm:$0xff] %vm4956_vm0, %v4952_v12 }
 0x2c7   : > { %v5293_v40 = vadd.f32 %v5292_v8, %v5291_v23  ;;  %v4955_v37 = vsel %vm4891_vm1, %v4857_v60, %v4923_v9  ;;  %vm4889_vm2 = vcmp.ge.f32.partialorder %v4849_v21, 0.0  ;;  %v4921_v15 = vmul.f32 0.01, %v4849_v21 }
 0x2c8   : > { %v5294_v49 = vpop.f32.mrf.mxu0  ;;  %4988 = vst.msk [vmem:[%s5611_s25 + $0xf8] sm:$0xff] %vm4956_vm0, %v4955_v37 }
 0x2c9   : > { %v4621_v59 = vadd.f32 %v5293_v40, %v8200_v55  ;;  %v4953_v43 = vsel %vm4889_vm2, %v4849_v21, %v4921_v15 }
 0x2ca   : > { %v5295_v48 = vpop.f32.mrf.mxu0  ;;  %4986 = vst.msk [vmem:[%s5611_s25 + $0xe8] sm:$0xff] %vm4956_vm0, %v4953_v43 }
 0x2cb   : > { %v4782_v34 = vadd.f32 %v8232_v14, %v4621_v59  ;;  %v5296_v62 = vadd.f32 %v5295_v48, %v5294_v49 }
 0x2cd   : > { %vm4872_vm3 = vcmp.ge.f32.partialorder %v4782_v34, 0.0  ;;  %v4904_v6 = vmul.f32 0.01, %v4782_v34  ;;  %v4624_v53 = vadd.f32 %v5296_v62, %v8200_v55 }
 0x2cf   : > { %v4936_v29 = vsel %vm4872_vm3, %v4782_v34, %v4904_v6  ;;  %v4785_v38 = vadd.f32 %v8238_v4, %v4624_v53 }
 0x2d0   : > { %4969 = vst.msk [vmem:[%s5611_s25 + $0x60] sm:$0xff] %vm4956_vm0, %v4936_v29 }
 0x2d1   : > { %vm4873_vm4 = vcmp.ge.f32.partialorder %v4785_v38, 0.0  ;;  %v4905_v61 = vmul.f32 0.01, %v4785_v38 }
 0x2d3   : > { %v4937_v32 = vsel %vm4873_vm4, %v4785_v38, %v4905_v61 }
 0x2d4   : > { %4970 = vst.msk [vmem:[%s5611_s25 + $0x68] sm:$0xff] %vm4956_vm0, %v4937_v32  ;;  %v5297_v14 = vpop.f32.mrf.mxu0 }
 0x2d6   : > { %v5298_v17 = vpop.f32.mrf.mxu0 }
 0x2d7   : > { %v5299_v33 = vadd.f32 %v5298_v17, %v5297_v14 }
 0x2d8   : > { %v5300_v28 = vpop.f32.mrf.mxu0 }
 0x2d9   : > { %v4629_v46 = vadd.f32 %v5299_v33, %v8200_v55 }
 0x2da   : > { %v5301_v18 = vpop.f32.mrf.mxu0 }
 0x2db   : > { %v4790_v24 = vadd.f32 %v8230_v19, %v4629_v46  ;;  %v5302_v41 = vadd.f32 %v5301_v18, %v5300_v28 }
 0x2dd   : > { %vm4874_vm5 = vcmp.ge.f32.partialorder %v4790_v24, 0.0  ;;  %v4906_v4 = vmul.f32 0.01, %v4790_v24  ;;  %v4632_v39 = vadd.f32 %v5302_v41, %v8200_v55 }
 0x2df   : > { %v4938_v0 = vsel %vm4874_vm5, %v4790_v24, %v4906_v4  ;;  %v4793_v2 = vadd.f32 %v8236_v47, %v4632_v39 }
 0x2e0   : > { %4971 = vst.msk [vmem:[%s5611_s25 + $0x70] sm:$0xff] %vm4956_vm0, %v4938_v0 }
 0x2e1   : > { %vm4875_vm6 = vcmp.ge.f32.partialorder %v4793_v2, 0.0  ;;  %v4907_v25 = vmul.f32 0.01, %v4793_v2 }
 0x2e3   : > { %v4939_v57 = vsel %vm4875_vm6, %v4793_v2, %v4907_v25 }
 0x2e4   : > { %4972 = vst.msk [vmem:[%s5611_s25 + $0x78] sm:$0xff] %vm4956_vm0, %v4939_v57 }
 0x2ec   : > { %v5303_v5 = vpop.f32.mrf.mxu0 }
 0x2ee   : > { %v5304_v35 = vpop.f32.mrf.mxu0 }
 0x2ef   : > { %v5305_v19 = vadd.f32 %v5304_v35, %v5303_v5 }
 0x2f0   : > { %v5306_v22 = vpop.f32.mrf.mxu0 }
 0x2f1   : > { %v4637_v58 = vadd.f32 %v5305_v19, %v8200_v55 }
 0x2f2   : > { %v5307_v45 = vpop.f32.mrf.mxu0 }
 0x2f3   : > { %v4798_v27 = vadd.f32 %v8242_v36, %v4637_v58  ;;  %v5308_v11 = vadd.f32 %v5307_v45, %v5306_v22 }
 0x2f5   : > { %vm4876_vm7 = vcmp.ge.f32.partialorder %v4798_v27, 0.0  ;;  %v4908_v47 = vmul.f32 0.01, %v4798_v27  ;;  %v4640_v31 = vadd.f32 %v5308_v11, %v8200_v55 }
 0x2f7   : > { %v4940_v52 = vsel %vm4876_vm7, %v4798_v27, %v4908_v47  ;;  %v4801_v16 = vadd.f32 %v8246_v13, %v4640_v31 }
 0x2f8   : > { %4973 = vst.msk [vmem:[%s5611_s25 + $0x80] sm:$0xff] %vm4956_vm0, %v4940_v52 }
 0x2f9   : > { %vm4877_vm8 = vcmp.ge.f32.partialorder %v4801_v16, 0.0  ;;  %v4909_v7 = vmul.f32 0.01, %v4801_v16 }
 0x2fb   : > { %v4941_v50 = vsel %vm4877_vm8, %v4801_v16, %v4909_v7 }
 0x2fc   : > { %4974 = vst.msk [vmem:[%s5611_s25 + $0x88] sm:$0xff] %vm4956_vm0, %v4941_v50 }
 0x304   : > { %v5309_v56 = vpop.f32.mrf.mxu0 }
 0x306   : > { %v5310_v23 = vpop.f32.mrf.mxu0 }
 0x307   : > { %v5311_v36 = vadd.f32 %v5310_v23, %v5309_v56 }
 0x308   : > { %v5312_v26 = vpop.f32.mrf.mxu0 }
 0x309   : > { %v4645_v42 = vadd.f32 %v5311_v36, %v8200_v55 }
 0x30a   : > { %v5313_v51 = vpop.f32.mrf.mxu0 }
 0x30b   : > { %v4806_v60 = vadd.f32 %v8240_v3, %v4645_v42  ;;  %v5314_v8 = vadd.f32 %v5313_v51, %v5312_v26 }
 0x30d   : > { %vm4878_vm9 = vcmp.ge.f32.partialorder %v4806_v60, 0.0  ;;  %v4910_v13 = vmul.f32 0.01, %v4806_v60  ;;  %v4648_v10 = vadd.f32 %v5314_v8, %v8200_v55 }
 0x30f   : > { %v4942_v44 = vsel %vm4878_vm9, %v4806_v60, %v4910_v13  ;;  %v4809_v12 = vadd.f32 %v8244_v20, %v4648_v10 }
 0x310   : > { %4975 = vst.msk [vmem:[%s5611_s25 + $0x90] sm:$0xff] %vm4956_vm0, %v4942_v44 }
 0x311   : > { %vm4879_vm10 = vcmp.ge.f32.partialorder %v4809_v12, 0.0  ;;  %v4911_v9 = vmul.f32 0.01, %v4809_v12 }
 0x313   : > { %v4943_v40 = vsel %vm4879_vm10, %v4809_v12, %v4911_v9 }
 0x314   : > { %4976 = vst.msk [vmem:[%s5611_s25 + $0x98] sm:$0xff] %vm4956_vm0, %v4943_v40 }
 0x31c   : > { %v5315_v21 = vpop.f32.mrf.mxu0 }
 0x31e   : > { %v5316_v49 = vpop.f32.mrf.mxu0 }
 0x31f   : > { %v5317_v3 = vadd.f32 %v5316_v49, %v5315_v21 }
 0x320   : > { %v5318_v37 = vpop.f32.mrf.mxu0 }
 0x321   : > { %v4653_v59 = vadd.f32 %v5317_v3, %v8200_v55 }
 0x322   : > { %v5319_v15 = vpop.f32.mrf.mxu0 }
 0x323   : > { %v4814_v48 = vadd.f32 %v8251_v1, %v4653_v59  ;;  %v5320_v34 = vadd.f32 %v5319_v15, %v5318_v37 }
 0x325   : > { %vm4880_vm11 = vcmp.ge.f32.partialorder %v4814_v48, 0.0  ;;  %v4912_v20 = vmul.f32 0.01, %v4814_v48  ;;  %v4656_v62 = vadd.f32 %v5320_v34, %v8200_v55 }
 0x327   : > { %v4944_v43 = vsel %vm4880_vm11, %v4814_v48, %v4912_v20  ;;  %v4817_v6 = vadd.f32 %v8256_v54, %v4656_v62 }
 0x328   : > { %4977 = vst.msk [vmem:[%s5611_s25 + $0xa0] sm:$0xff] %vm4956_vm0, %v4944_v43 }
 0x329   : > { %vm4881_vm12 = vcmp.ge.f32.partialorder %v4817_v6, 0.0  ;;  %v4913_v53 = vmul.f32 0.01, %v4817_v6 }
 0x32b   : > { %v4945_v29 = vsel %vm4881_vm12, %v4817_v6, %v4913_v53 }
 0x32c   : > { %4978 = vst.msk [vmem:[%s5611_s25 + $0xa8] sm:$0xff] %vm4956_vm0, %v4945_v29 }
 0x338   : > { %v5321_v38 = vpop.f32.mrf.mxu0 }
 0x33a   : > { %v5322_v61 = vpop.f32.mrf.mxu0 }
 0x33b   : > { %v5323_v1 = vadd.f32 %v5322_v61, %v5321_v38 }
 0x33c   : > { %v5324_v32 = vpop.f32.mrf.mxu0 }
 0x33d   : > { %v4661_v14 = vadd.f32 %v5323_v1, %v8200_v55 }
 0x33e   : > { %v5325_v17 = vpop.f32.mrf.mxu0 }
 0x33f   : > { %v4822_v33 = vadd.f32 %v8248_v63, %v4661_v14  ;;  %v5326_v28 = vadd.f32 %v5325_v17, %v5324_v32 }
 0x341   : > { %vm4882_vm13 = vcmp.ge.f32.partialorder %v4822_v33, 0.0  ;;  %v4914_v54 = vmul.f32 0.01, %v4822_v33  ;;  %v4664_v46 = vadd.f32 %v5326_v28, %v8200_v55 }
 0x343   : > { %v4946_v18 = vsel %vm4882_vm13, %v4822_v33, %v4914_v54  ;;  %v4825_v24 = vadd.f32 %v8253_v30, %v4664_v46 }
 0x344   : > { %4979 = vst.msk [vmem:[%s5611_s25 + $0xb0] sm:$0xff] %vm4956_vm0, %v4946_v18 }
 0x345   : > { %vm4883_vm14 = vcmp.ge.f32.partialorder %v4825_v24, 0.0  ;;  %v4915_v41 = vmul.f32 0.01, %v4825_v24 }
 0x347   : > { %v4947_v4 = vsel %vm4883_vm14, %v4825_v24, %v4915_v41 }
 0x348   : > { %4980 = vst.msk [vmem:[%s5611_s25 + $0xb8] sm:$0xff] %vm4956_vm0, %v4947_v4 }
 0x349 PF: > { %s13_s14 = sadd.s32 1, %s5541_s14   ;;  %s8428_s12 = smov %s5537_s13 }
 0x34a   : > { %p10_p9 = scmp.ge.s32.totalorder %s13_s14, 6   ;;  %s8429_s13 = smov %s8431_s15 }
 0x34c   :  { %12 = sbr.rel (!%p10_p9) target bundleno = 2 (0x2), region = 85 }

</bundles_post_ra>
